<compile_context>
chip_gen: v5e
topology: v5e:2x2
jax: 0.10.0
libtpu: 0.0.40
codegen_flags: <defaults>
</compile_context>

<pallas_src>
import numpy as np
import jax
import jax.numpy as jnp
from jax import lax
from jax.experimental import pallas as pl
from jax.experimental.pallas import tpu as pltpu

_BN_EPS = 1e-5
_B_TILE = 8          # images per grid step (M = B_TILE*rows in every matmul)


def _conv_out(size):
    # 3x3 conv, stride 2, padding 1.
    return (size - 1) // 2 + 1


# ---------------------------------------------------------------------------
# Constant selection matrices (built once per shape, at trace time, in numpy)
# ---------------------------------------------------------------------------
def _row_select(hi, ho, b_tile):
    """(3, b*ho, b*hi) one-hot vertical-tap + stride-2 + zero-pad selection,
    block-diagonal over the batch tile so images never mix."""
    rs = np.zeros((3, b_tile * ho, b_tile * hi), np.float32)
    for kh in range(3):
        for i in range(ho):
            r = 2 * i + kh - 1
            if 0 <= r < hi:
                for b in range(b_tile):
                    rs[kh, b * ho + i, b * hi + r] = 1.0
    return rs


def _col_select(wi, wo, ci):
    """(3, wi*ci, wo*ci) one-hot horizontal-tap + stride-2 + zero-pad selection
    acting on the width*channel lane axis (channel-identity blocks)."""
    cs = np.zeros((3, wi * ci, wo * ci), np.float32)
    eye = np.eye(ci, dtype=np.float32)
    for kw in range(3):
        for j in range(wo):
            s = 2 * j + kw - 1
            if 0 <= s < wi:
                cs[kw, s * ci:(s + 1) * ci, j * ci:(j + 1) * ci] = eye
    return cs


# ---------------------------------------------------------------------------
# Parameter preparation (BN folding + PyTorch layout -> kernel layout)
# ---------------------------------------------------------------------------
def _fold_bn(gamma, beta, mean, var, conv_bias, eps=_BN_EPS):
    """Eval-mode BN folded into the preceding conv: BN(conv_raw + b) =
    scale*conv_raw + bias."""
    scale = gamma / jnp.sqrt(var + eps)
    bias = beta + scale * (conv_bias - mean)
    return scale, bias


def _prepare_inputs(params, h, w, b_tile):
    blocks = params["blocks"]
    flat = []
    hi, wi = h, w
    for blk in blocks:
        ci = blk["dw_w"].shape[0]
        co = blk["pw_w"].shape[0]
        ho, wo = _conv_out(hi), _conv_out(wi)

        rs = jnp.asarray(_row_select(hi, ho, b_tile))            # (3, B*ho, B*hi)
        cs = jnp.asarray(_col_select(wi, wo, ci))                # (3, wi*ci, wo*ci)

        # depthwise (ci,1,3,3) -> (9, ci), k = kh*3+kw; fold BN scale; tile over wo.
        w9 = jnp.transpose(blk["dw_w"][:, 0], (1, 2, 0)).reshape(9, ci)
        dsc, dbi = _fold_bn(blk["dw_gamma"], blk["dw_beta"], blk["dw_mean"],
                            blk["dw_var"], blk["dw_b"])
        dwp = jnp.concatenate([w9 * dsc[None, :], dbi[None, :]], axis=0)
        dwp = jnp.tile(dwp, (1, wo))                             # (10, wo*ci)

        # pointwise (co,ci,1,1) -> (ci, co); fold BN scale; block-diagonal over wo.
        pw = jnp.transpose(blk["pw_w"][:, :, 0, 0], (1, 0))
        psc, pbi = _fold_bn(blk["pw_gamma"], blk["pw_beta"], blk["pw_mean"],
                            blk["pw_var"], blk["pw_b"])
        pw_bd = jnp.kron(jnp.eye(wo, dtype=jnp.float32), pw * psc[None, :])
        pwb = jnp.tile(pbi[None, :], (1, wo))                    # (1, wo*co)

        flat += [rs, cs, dwp, pw_bd, pwb]
        hi, wi = ho, wo

    ho3, wo3 = hi, wi
    co3 = blocks[-1]["pw_w"].shape[0]
    num_classes = params["fc_w"].shape[0]
    assert num_classes <= 128 and params["fc_w"].shape[1] == co3

    # Head: AdaptiveAvgPool2d(1) + Flatten + Linear folded into two small
    # matmuls, with a lane-dense 128-wide (zero padded) output slab.
    rowpool = np.zeros((b_tile, b_tile * ho3), np.float32)
    for b in range(b_tile):
        rowpool[b, b * ho3:(b + 1) * ho3] = 1.0 / ho3
    colpool = np.kron(np.ones((wo3, 1), np.float32) / wo3,
                      np.eye(co3, dtype=np.float32))             # (wo3*co3, co3)
    fc_w = jnp.zeros((co3, 128), jnp.float32).at[:, :num_classes].set(
        jnp.transpose(params["fc_w"], (1, 0)))
    fc_eff = jnp.asarray(colpool) @ fc_w                         # (wo3*co3, 128)
    fc_b = jnp.zeros((1, 128), jnp.float32).at[0, :num_classes].set(params["fc_b"])

    flat += [jnp.asarray(rowpool), fc_eff, fc_b]
    return flat, num_classes


# ---------------------------------------------------------------------------
# Fused kernel: whole network, one pallas_call, grid over batch tiles
# ---------------------------------------------------------------------------
def _ds_block(a, rs, cs, dwp, pw_bd, pwb):
    """One ds_conv block on the (B*rows, width*channels) slab.

    a: (B*hi, wi*ci).  Returns (B*ho, wo*co).
    Depthwise 3x3/s2/p1: for each tap, rs[kh] @ a @ cs[kw] gathers the shifted,
    stride-2-subsampled, zero-padded plane; taps are reduced with 9 FMAs using
    the (BN-scale-folded) per-channel weights.  Pointwise 1x1 conv is a single
    block-diagonal matmul on the lane axis."""
    y = None
    for kh in range(3):
        r = jnp.dot(rs[kh], a, preferred_element_type=jnp.float32)      # (B*ho, wi*ci)
        for kw in range(3):
            t = jnp.dot(r, cs[kw], preferred_element_type=jnp.float32)  # (B*ho, wo*ci)
            k = kh * 3 + kw
            tap = t * dwp[k:k + 1, :]
            y = tap if y is None else y + tap
    y = jnp.maximum(y + dwp[9:10, :], 0.0)                # depthwise BN (folded) + ReLU
    z = jnp.dot(y, pw_bd, preferred_element_type=jnp.float32)           # (B*ho, wo*co)
    return jnp.maximum(z + pwb, 0.0)                      # pointwise BN (folded) + ReLU


def _fused_kernel(x_ref,
                  rs1, cs1, dwp1, pw1, pwb1,
                  rs2, cs2, dwp2, pw2, pwb2,
                  rs3, cs3, dwp3, pw3, pwb3,
                  rowpool, fc_eff, fc_b,
                  out_ref):
    a = x_ref[...]                                                # (B*H, W*C0)
    z1 = _ds_block(a, rs1[...], cs1[...], dwp1[...], pw1[...], pwb1[...])
    z2 = _ds_block(z1, rs2[...], cs2[...], dwp2[...], pw2[...], pwb2[...])
    z3 = _ds_block(z2, rs3[...], cs3[...], dwp3[...], pw3[...], pwb3[...])
    pooled = jnp.dot(rowpool[...], z3, preferred_element_type=jnp.float32)  # (B, wo3*co3)
    out_ref[...] = (jnp.dot(pooled, fc_eff[...], preferred_element_type=jnp.float32)
                    + fc_b[...])                                  # (B, 128) lane-dense


@jax.jit
def depthwise_separable_cnn(x_nchw, params):
    """Forward pass.  x_nchw: (N, C, H, W), same convention as PyTorch."""
    blocks = params["blocks"]
    assert len(blocks) == 3
    n, cin, h, w = x_nchw.shape
    b_tile = _B_TILE
    n_pad = ((n + b_tile - 1) // b_tile) * b_tile

    flat, num_classes = _prepare_inputs(params, h, w, b_tile)

    # NCHW -> per-image (rows=H, lanes=W*C) slabs, batch-stacked along rows.
    x = jnp.transpose(x_nchw.astype(jnp.float32), (0, 2, 3, 1))   # (N, H, W, C)
    x = jnp.pad(x, ((0, n_pad - n), (0, 0), (0, 0), (0, 0)))
    x = x.reshape(n_pad * h, w * cin)

    in_specs = [pl.BlockSpec((b_tile * h, w * cin), lambda i: (i, 0))]
    for p in flat:
        zeros = (0,) * p.ndim
        in_specs.append(pl.BlockSpec(p.shape, lambda i, _z=zeros: _z))

    out = pl.pallas_call(
        _fused_kernel,
        grid=(n_pad // b_tile,),
        out_shape=jax.ShapeDtypeStruct((n_pad, 128), jnp.float32),
        in_specs=in_specs,
        out_specs=pl.BlockSpec((b_tile, 128), lambda i: (i, 0)),
        compiler_params=pltpu.CompilerParams(
            dimension_semantics=("parallel",),   # batch tiles across cores (v7x)
        ),
    )(x, *flat)
    return out[:n, :num_classes]


# ---------------------------------------------------------------------------
# Parameters (PyTorch layouts) + pure-JAX reference for correctness check
# ---------------------------------------------------------------------------
def init_params(key, in_channels=3, num_classes=10):
    chans = [(in_channels, 32), (32, 64), (64, 128)]
    blocks = []
    for i, (cin, cout) in enumerate(chans):
        ks = jax.random.split(jax.random.fold_in(key, i), 12)
        blocks.append(dict(
            dw_w=0.1 * jax.random.normal(ks[0], (cin, 1, 3, 3), jnp.float32),
            dw_b=0.01 * jax.random.normal(ks[1], (cin,), jnp.float32),
            dw_gamma=1.0 + 0.05 * jax.random.normal(ks[2], (cin,), jnp.float32),
            dw_beta=0.01 * jax.random.normal(ks[3], (cin,), jnp.float32),
            dw_mean=0.05 * jax.random.normal(ks[4], (cin,), jnp.float32),
            dw_var=0.8 + 0.4 * jax.random.uniform(ks[5], (cin,), jnp.float32),
            pw_w=0.1 * jax.random.normal(ks[6], (cout, cin, 1, 1), jnp.float32),
            pw_b=0.01 * jax.random.normal(ks[7], (cout,), jnp.float32),
            pw_gamma=1.0 + 0.05 * jax.random.normal(ks[8], (cout,), jnp.float32),
            pw_beta=0.01 * jax.random.normal(ks[9], (cout,), jnp.float32),
            pw_mean=0.05 * jax.random.normal(ks[10], (cout,), jnp.float32),
            pw_var=0.8 + 0.4 * jax.random.uniform(ks[11], (cout,), jnp.float32),
        ))
    kf = jax.random.split(jax.random.fold_in(key, 100), 2)
    fc_w = 0.1 * jax.random.normal(kf[0], (num_classes, 128), jnp.float32)
    fc_b = 0.01 * jax.random.normal(kf[1], (num_classes,), jnp.float32)
    return dict(blocks=blocks, fc_w=fc_w, fc_b=fc_b)


def _bn_eval_nchw(x, gamma, beta, mean, var, eps=_BN_EPS):
    inv = (gamma / jnp.sqrt(var + eps))[None, :, None, None]
    return (x - mean[None, :, None, None]) * inv + beta[None, :, None, None]


def reference_forward(x_nchw, params):
    """Pure-JAX (XLA) eval-mode reference matching the PyTorch module."""
    x = x_nchw.astype(jnp.float32)
    for blk in params["blocks"]:
        cin = blk["dw_w"].shape[0]
        x = lax.conv_general_dilated(
            x, blk["dw_w"], window_strides=(2, 2), padding=((1, 1), (1, 1)),
            dimension_numbers=("NCHW", "OIHW", "NCHW"), feature_group_count=cin,
            precision=lax.Precision.HIGHEST)
        x = x + blk["dw_b"][None, :, None, None]
        x = jnp.maximum(_bn_eval_nchw(x, blk["dw_gamma"], blk["dw_beta"],
                                      blk["dw_mean"], blk["dw_var"]), 0.0)
        x = lax.conv_general_dilated(
            x, blk["pw_w"], window_strides=(1, 1), padding=((0, 0), (0, 0)),
            dimension_numbers=("NCHW", "OIHW", "NCHW"),
            precision=lax.Precision.HIGHEST)
        x = x + blk["pw_b"][None, :, None, None]
        x = jnp.maximum(_bn_eval_nchw(x, blk["pw_gamma"], blk["pw_beta"],
                                      blk["pw_mean"], blk["pw_var"]), 0.0)
    pooled = jnp.mean(x, axis=(2, 3))                     # AdaptiveAvgPool2d(1)
    return pooled @ params["fc_w"].T + params["fc_b"][None, :]


if __name__ == "__main__":
    key = jax.random.PRNGKey(0)
    k_x, k_p = jax.random.split(key)

    # NCHW input, matching the PyTorch module (in_channels=3).
    x = jax.random.normal(k_x, (2, 3, 16, 16), jnp.float32)
    params = init_params(k_p, in_channels=3, num_classes=10)

    logits = depthwise_separable_cnn(x, params)
    jax.block_until_ready(logits)
    assert logits.shape == (2, 10) and logits.dtype == jnp.float32

    ref = reference_forward(x, params)
    err = float(jnp.max(jnp.abs(logits - ref)))
    assert err < 5e-2, f"kernel/reference mismatch: max abs err = {err}"
    print("KERNEL_OK")
</pallas_src>

<mosaic_0001>
module attributes {stable_mosaic.version = 11 : i64} {
  func.func @_fused_kernel(%arg0: i32, %arg1: memref<128x48xf32, #tpu.memory_space<vmem>>, %arg2: memref<3x64x128xf32, #tpu.memory_space<vmem>>, %arg3: memref<3x48x24xf32, #tpu.memory_space<vmem>>, %arg4: memref<10x24xf32, #tpu.memory_space<vmem>>, %arg5: memref<24x256xf32, #tpu.memory_space<vmem>>, %arg6: memref<1x256xf32, #tpu.memory_space<vmem>>, %arg7: memref<3x32x64xf32, #tpu.memory_space<vmem>>, %arg8: memref<3x256x128xf32, #tpu.memory_space<vmem>>, %arg9: memref<10x128xf32, #tpu.memory_space<vmem>>, %arg10: memref<128x256xf32, #tpu.memory_space<vmem>>, %arg11: memref<1x256xf32, #tpu.memory_space<vmem>>, %arg12: memref<3x16x32xf32, #tpu.memory_space<vmem>>, %arg13: memref<3x256x128xf32, #tpu.memory_space<vmem>>, %arg14: memref<10x128xf32, #tpu.memory_space<vmem>>, %arg15: memref<128x256xf32, #tpu.memory_space<vmem>>, %arg16: memref<1x256xf32, #tpu.memory_space<vmem>>, %arg17: memref<8x16xf32, #tpu.memory_space<vmem>>, %arg18: memref<256x128xf32, #tpu.memory_space<vmem>>, %arg19: memref<1x128xf32, #tpu.memory_space<vmem>>, %arg20: memref<8x128xf32, #tpu.memory_space<vmem>>) attributes {dimension_semantics = [#tpu.dimension_semantics<parallel>], iteration_bounds = array<i64: 1>, scalar_prefetch = 0 : i64, scratch_operands = 0 : i64, tpu.core_type = #tpu.core_type<tc>, window_params = [{transform_indices = @transform_0, window_bounds = array<i64: 128, 48>}, {pipeline_mode = #tpu.pipeline_mode<synchronous>, transform_indices = @transform_1, window_bounds = array<i64: 3, 64, 128>}, {pipeline_mode = #tpu.pipeline_mode<synchronous>, transform_indices = @transform_2, window_bounds = array<i64: 3, 48, 24>}, {pipeline_mode = #tpu.pipeline_mode<synchronous>, transform_indices = @transform_3, window_bounds = array<i64: 10, 24>}, {pipeline_mode = #tpu.pipeline_mode<synchronous>, transform_indices = @transform_4, window_bounds = array<i64: 24, 256>}, {pipeline_mode = #tpu.pipeline_mode<synchronous>, transform_indices = @transform_5, window_bounds = array<i64: 1, 256>}, {pipeline_mode = #tpu.pipeline_mode<synchronous>, transform_indices = @transform_6, window_bounds = array<i64: 3, 32, 64>}, {pipeline_mode = #tpu.pipeline_mode<synchronous>, transform_indices = @transform_7, window_bounds = array<i64: 3, 256, 128>}, {pipeline_mode = #tpu.pipeline_mode<synchronous>, transform_indices = @transform_8, window_bounds = array<i64: 10, 128>}, {pipeline_mode = #tpu.pipeline_mode<synchronous>, transform_indices = @transform_9, window_bounds = array<i64: 128, 256>}, {pipeline_mode = #tpu.pipeline_mode<synchronous>, transform_indices = @transform_10, window_bounds = array<i64: 1, 256>}, {pipeline_mode = #tpu.pipeline_mode<synchronous>, transform_indices = @transform_11, window_bounds = array<i64: 3, 16, 32>}, {pipeline_mode = #tpu.pipeline_mode<synchronous>, transform_indices = @transform_12, window_bounds = array<i64: 3, 256, 128>}, {pipeline_mode = #tpu.pipeline_mode<synchronous>, transform_indices = @transform_13, window_bounds = array<i64: 10, 128>}, {pipeline_mode = #tpu.pipeline_mode<synchronous>, transform_indices = @transform_14, window_bounds = array<i64: 128, 256>}, {pipeline_mode = #tpu.pipeline_mode<synchronous>, transform_indices = @transform_15, window_bounds = array<i64: 1, 256>}, {pipeline_mode = #tpu.pipeline_mode<synchronous>, transform_indices = @transform_16, window_bounds = array<i64: 8, 16>}, {pipeline_mode = #tpu.pipeline_mode<synchronous>, transform_indices = @transform_17, window_bounds = array<i64: 256, 128>}, {pipeline_mode = #tpu.pipeline_mode<synchronous>, transform_indices = @transform_18, window_bounds = array<i64: 1, 128>}, {transform_indices = @transform_19, window_bounds = array<i64: 8, 128>}]} {
    %c0 = arith.constant 0 : index
    %c0_0 = arith.constant 0 : index
    %0 = vector.load %arg1[%c0, %c0_0] : memref<128x48xf32, #tpu.memory_space<vmem>>, vector<128x48xf32>
    %c0_1 = arith.constant 0 : index
    %c0_2 = arith.constant 0 : index
    %c0_3 = arith.constant 0 : index
    %1 = vector.load %arg2[%c0_1, %c0_2, %c0_3] : memref<3x64x128xf32, #tpu.memory_space<vmem>>, vector<3x64x128xf32>
    %c0_4 = arith.constant 0 : index
    %c0_5 = arith.constant 0 : index
    %c0_6 = arith.constant 0 : index
    %2 = vector.load %arg3[%c0_4, %c0_5, %c0_6] : memref<3x48x24xf32, #tpu.memory_space<vmem>>, vector<3x48x24xf32>
    %c0_7 = arith.constant 0 : index
    %c0_8 = arith.constant 0 : index
    %3 = vector.load %arg4[%c0_7, %c0_8] : memref<10x24xf32, #tpu.memory_space<vmem>>, vector<10x24xf32>
    %c0_9 = arith.constant 0 : index
    %c0_10 = arith.constant 0 : index
    %4 = vector.load %arg5[%c0_9, %c0_10] : memref<24x256xf32, #tpu.memory_space<vmem>>, vector<24x256xf32>
    %c0_11 = arith.constant 0 : index
    %c0_12 = arith.constant 0 : index
    %5 = vector.load %arg6[%c0_11, %c0_12] : memref<1x256xf32, #tpu.memory_space<vmem>>, vector<1x256xf32>
    %6 = vector.extract_strided_slice %1 {offsets = [0, 0, 0], sizes = [1, 64, 128], strides = [1, 1, 1]} : vector<3x64x128xf32> to vector<1x64x128xf32>
    %7 = vector.shape_cast %6 : vector<1x64x128xf32> to vector<64x128xf32>
    %cst = arith.constant dense<0.000000e+00> : vector<64x48xf32>
    %8 = tpu.matmul %7, %0, %cst {dimension_numbers = #tpu.dot_dimension_numbers<[1], [0], [0], [1], [0, 0, 1, 1], [], []>} : vector<64x128xf32>, vector<128x48xf32>, vector<64x48xf32> -> vector<64x48xf32>
    %9 = vector.extract_strided_slice %2 {offsets = [0, 0, 0], sizes = [1, 48, 24], strides = [1, 1, 1]} : vector<3x48x24xf32> to vector<1x48x24xf32>
    %10 = vector.shape_cast %9 : vector<1x48x24xf32> to vector<48x24xf32>
    %cst_13 = arith.constant dense<0.000000e+00> : vector<64x24xf32>
    %11 = tpu.matmul %8, %10, %cst_13 {dimension_numbers = #tpu.dot_dimension_numbers<[1], [0], [0], [1], [0, 0, 1, 1], [], []>} : vector<64x48xf32>, vector<48x24xf32>, vector<64x24xf32> -> vector<64x24xf32>
    %12 = vector.extract_strided_slice %3 {offsets = [0, 0], sizes = [1, 24], strides = [1, 1]} : vector<10x24xf32> to vector<1x24xf32>
    %13 = vector.broadcast %12 : vector<1x24xf32> to vector<64x24xf32>
    %14 = arith.mulf %11, %13 : vector<64x24xf32>
    %15 = vector.extract_strided_slice %2 {offsets = [1, 0, 0], sizes = [1, 48, 24], strides = [1, 1, 1]} : vector<3x48x24xf32> to vector<1x48x24xf32>
    %16 = vector.shape_cast %15 : vector<1x48x24xf32> to vector<48x24xf32>
    %cst_14 = arith.constant dense<0.000000e+00> : vector<64x24xf32>
    %17 = tpu.matmul %8, %16, %cst_14 {dimension_numbers = #tpu.dot_dimension_numbers<[1], [0], [0], [1], [0, 0, 1, 1], [], []>} : vector<64x48xf32>, vector<48x24xf32>, vector<64x24xf32> -> vector<64x24xf32>
    %18 = vector.extract_strided_slice %3 {offsets = [1, 0], sizes = [1, 24], strides = [1, 1]} : vector<10x24xf32> to vector<1x24xf32>
    %19 = vector.broadcast %18 : vector<1x24xf32> to vector<64x24xf32>
    %20 = arith.mulf %17, %19 : vector<64x24xf32>
    %21 = arith.addf %14, %20 : vector<64x24xf32>
    %22 = vector.extract_strided_slice %2 {offsets = [2, 0, 0], sizes = [1, 48, 24], strides = [1, 1, 1]} : vector<3x48x24xf32> to vector<1x48x24xf32>
    %23 = vector.shape_cast %22 : vector<1x48x24xf32> to vector<48x24xf32>
    %cst_15 = arith.constant dense<0.000000e+00> : vector<64x24xf32>
    %24 = tpu.matmul %8, %23, %cst_15 {dimension_numbers = #tpu.dot_dimension_numbers<[1], [0], [0], [1], [0, 0, 1, 1], [], []>} : vector<64x48xf32>, vector<48x24xf32>, vector<64x24xf32> -> vector<64x24xf32>
    %25 = vector.extract_strided_slice %3 {offsets = [2, 0], sizes = [1, 24], strides = [1, 1]} : vector<10x24xf32> to vector<1x24xf32>
    %26 = vector.broadcast %25 : vector<1x24xf32> to vector<64x24xf32>
    %27 = arith.mulf %24, %26 : vector<64x24xf32>
    %28 = arith.addf %21, %27 : vector<64x24xf32>
    %29 = vector.extract_strided_slice %1 {offsets = [1, 0, 0], sizes = [1, 64, 128], strides = [1, 1, 1]} : vector<3x64x128xf32> to vector<1x64x128xf32>
    %30 = vector.shape_cast %29 : vector<1x64x128xf32> to vector<64x128xf32>
    %cst_16 = arith.constant dense<0.000000e+00> : vector<64x48xf32>
    %31 = tpu.matmul %30, %0, %cst_16 {dimension_numbers = #tpu.dot_dimension_numbers<[1], [0], [0], [1], [0, 0, 1, 1], [], []>} : vector<64x128xf32>, vector<128x48xf32>, vector<64x48xf32> -> vector<64x48xf32>
    %32 = vector.extract_strided_slice %2 {offsets = [0, 0, 0], sizes = [1, 48, 24], strides = [1, 1, 1]} : vector<3x48x24xf32> to vector<1x48x24xf32>
    %33 = vector.shape_cast %32 : vector<1x48x24xf32> to vector<48x24xf32>
    %cst_17 = arith.constant dense<0.000000e+00> : vector<64x24xf32>
    %34 = tpu.matmul %31, %33, %cst_17 {dimension_numbers = #tpu.dot_dimension_numbers<[1], [0], [0], [1], [0, 0, 1, 1], [], []>} : vector<64x48xf32>, vector<48x24xf32>, vector<64x24xf32> -> vector<64x24xf32>
    %35 = vector.extract_strided_slice %3 {offsets = [3, 0], sizes = [1, 24], strides = [1, 1]} : vector<10x24xf32> to vector<1x24xf32>
    %36 = vector.broadcast %35 : vector<1x24xf32> to vector<64x24xf32>
    %37 = arith.mulf %34, %36 : vector<64x24xf32>
    %38 = arith.addf %28, %37 : vector<64x24xf32>
    %39 = vector.extract_strided_slice %2 {offsets = [1, 0, 0], sizes = [1, 48, 24], strides = [1, 1, 1]} : vector<3x48x24xf32> to vector<1x48x24xf32>
    %40 = vector.shape_cast %39 : vector<1x48x24xf32> to vector<48x24xf32>
    %cst_18 = arith.constant dense<0.000000e+00> : vector<64x24xf32>
    %41 = tpu.matmul %31, %40, %cst_18 {dimension_numbers = #tpu.dot_dimension_numbers<[1], [0], [0], [1], [0, 0, 1, 1], [], []>} : vector<64x48xf32>, vector<48x24xf32>, vector<64x24xf32> -> vector<64x24xf32>
    %42 = vector.extract_strided_slice %3 {offsets = [4, 0], sizes = [1, 24], strides = [1, 1]} : vector<10x24xf32> to vector<1x24xf32>
    %43 = vector.broadcast %42 : vector<1x24xf32> to vector<64x24xf32>
    %44 = arith.mulf %41, %43 : vector<64x24xf32>
    %45 = arith.addf %38, %44 : vector<64x24xf32>
    %46 = vector.extract_strided_slice %2 {offsets = [2, 0, 0], sizes = [1, 48, 24], strides = [1, 1, 1]} : vector<3x48x24xf32> to vector<1x48x24xf32>
    %47 = vector.shape_cast %46 : vector<1x48x24xf32> to vector<48x24xf32>
    %cst_19 = arith.constant dense<0.000000e+00> : vector<64x24xf32>
    %48 = tpu.matmul %31, %47, %cst_19 {dimension_numbers = #tpu.dot_dimension_numbers<[1], [0], [0], [1], [0, 0, 1, 1], [], []>} : vector<64x48xf32>, vector<48x24xf32>, vector<64x24xf32> -> vector<64x24xf32>
    %49 = vector.extract_strided_slice %3 {offsets = [5, 0], sizes = [1, 24], strides = [1, 1]} : vector<10x24xf32> to vector<1x24xf32>
    %50 = vector.broadcast %49 : vector<1x24xf32> to vector<64x24xf32>
    %51 = arith.mulf %48, %50 : vector<64x24xf32>
    %52 = arith.addf %45, %51 : vector<64x24xf32>
    %53 = vector.extract_strided_slice %1 {offsets = [2, 0, 0], sizes = [1, 64, 128], strides = [1, 1, 1]} : vector<3x64x128xf32> to vector<1x64x128xf32>
    %54 = vector.shape_cast %53 : vector<1x64x128xf32> to vector<64x128xf32>
    %cst_20 = arith.constant dense<0.000000e+00> : vector<64x48xf32>
    %55 = tpu.matmul %54, %0, %cst_20 {dimension_numbers = #tpu.dot_dimension_numbers<[1], [0], [0], [1], [0, 0, 1, 1], [], []>} : vector<64x128xf32>, vector<128x48xf32>, vector<64x48xf32> -> vector<64x48xf32>
    %56 = vector.extract_strided_slice %2 {offsets = [0, 0, 0], sizes = [1, 48, 24], strides = [1, 1, 1]} : vector<3x48x24xf32> to vector<1x48x24xf32>
    %57 = vector.shape_cast %56 : vector<1x48x24xf32> to vector<48x24xf32>
    %cst_21 = arith.constant dense<0.000000e+00> : vector<64x24xf32>
    %58 = tpu.matmul %55, %57, %cst_21 {dimension_numbers = #tpu.dot_dimension_numbers<[1], [0], [0], [1], [0, 0, 1, 1], [], []>} : vector<64x48xf32>, vector<48x24xf32>, vector<64x24xf32> -> vector<64x24xf32>
    %59 = vector.extract_strided_slice %3 {offsets = [6, 0], sizes = [1, 24], strides = [1, 1]} : vector<10x24xf32> to vector<1x24xf32>
    %60 = vector.broadcast %59 : vector<1x24xf32> to vector<64x24xf32>
    %61 = arith.mulf %58, %60 : vector<64x24xf32>
    %62 = arith.addf %52, %61 : vector<64x24xf32>
    %63 = vector.extract_strided_slice %2 {offsets = [1, 0, 0], sizes = [1, 48, 24], strides = [1, 1, 1]} : vector<3x48x24xf32> to vector<1x48x24xf32>
    %64 = vector.shape_cast %63 : vector<1x48x24xf32> to vector<48x24xf32>
    %cst_22 = arith.constant dense<0.000000e+00> : vector<64x24xf32>
    %65 = tpu.matmul %55, %64, %cst_22 {dimension_numbers = #tpu.dot_dimension_numbers<[1], [0], [0], [1], [0, 0, 1, 1], [], []>} : vector<64x48xf32>, vector<48x24xf32>, vector<64x24xf32> -> vector<64x24xf32>
    %66 = vector.extract_strided_slice %3 {offsets = [7, 0], sizes = [1, 24], strides = [1, 1]} : vector<10x24xf32> to vector<1x24xf32>
    %67 = vector.broadcast %66 : vector<1x24xf32> to vector<64x24xf32>
    %68 = arith.mulf %65, %67 : vector<64x24xf32>
    %69 = arith.addf %62, %68 : vector<64x24xf32>
    %70 = vector.extract_strided_slice %2 {offsets = [2, 0, 0], sizes = [1, 48, 24], strides = [1, 1, 1]} : vector<3x48x24xf32> to vector<1x48x24xf32>
    %71 = vector.shape_cast %70 : vector<1x48x24xf32> to vector<48x24xf32>
    %cst_23 = arith.constant dense<0.000000e+00> : vector<64x24xf32>
    %72 = tpu.matmul %55, %71, %cst_23 {dimension_numbers = #tpu.dot_dimension_numbers<[1], [0], [0], [1], [0, 0, 1, 1], [], []>} : vector<64x48xf32>, vector<48x24xf32>, vector<64x24xf32> -> vector<64x24xf32>
    %73 = vector.extract_strided_slice %3 {offsets = [8, 0], sizes = [1, 24], strides = [1, 1]} : vector<10x24xf32> to vector<1x24xf32>
    %74 = vector.broadcast %73 : vector<1x24xf32> to vector<64x24xf32>
    %75 = arith.mulf %72, %74 : vector<64x24xf32>
    %76 = arith.addf %69, %75 : vector<64x24xf32>
    %77 = vector.extract_strided_slice %3 {offsets = [9, 0], sizes = [1, 24], strides = [1, 1]} : vector<10x24xf32> to vector<1x24xf32>
    %78 = vector.broadcast %77 : vector<1x24xf32> to vector<64x24xf32>
    %79 = arith.addf %76, %78 : vector<64x24xf32>
    %cst_24 = arith.constant 0.000000e+00 : f32
    %80 = vector.broadcast %cst_24 : f32 to vector<64x24xf32>
    %81 = arith.maximumf %79, %80 : vector<64x24xf32>
    %cst_25 = arith.constant dense<0.000000e+00> : vector<64x256xf32>
    %82 = tpu.matmul %81, %4, %cst_25 {dimension_numbers = #tpu.dot_dimension_numbers<[1], [0], [0], [1], [0, 0, 1, 1], [], []>} : vector<64x24xf32>, vector<24x256xf32>, vector<64x256xf32> -> vector<64x256xf32>
    %83 = vector.broadcast %5 : vector<1x256xf32> to vector<64x256xf32>
    %84 = arith.addf %82, %83 : vector<64x256xf32>
    %cst_26 = arith.constant 0.000000e+00 : f32
    %85 = vector.broadcast %cst_26 : f32 to vector<64x256xf32>
    %86 = arith.maximumf %84, %85 : vector<64x256xf32>
    %c0_27 = arith.constant 0 : index
    %c0_28 = arith.constant 0 : index
    %c0_29 = arith.constant 0 : index
    %87 = vector.load %arg7[%c0_27, %c0_28, %c0_29] : memref<3x32x64xf32, #tpu.memory_space<vmem>>, vector<3x32x64xf32>
    %c0_30 = arith.constant 0 : index
    %c0_31 = arith.constant 0 : index
    %c0_32 = arith.constant 0 : index
    %88 = vector.load %arg8[%c0_30, %c0_31, %c0_32] : memref<3x256x128xf32, #tpu.memory_space<vmem>>, vector<3x256x128xf32>
    %c0_33 = arith.constant 0 : index
    %c0_34 = arith.constant 0 : index
    %89 = vector.load %arg9[%c0_33, %c0_34] : memref<10x128xf32, #tpu.memory_space<vmem>>, vector<10x128xf32>
    %c0_35 = arith.constant 0 : index
    %c0_36 = arith.constant 0 : index
    %90 = vector.load %arg10[%c0_35, %c0_36] : memref<128x256xf32, #tpu.memory_space<vmem>>, vector<128x256xf32>
    %c0_37 = arith.constant 0 : index
    %c0_38 = arith.constant 0 : index
    %91 = vector.load %arg11[%c0_37, %c0_38] : memref<1x256xf32, #tpu.memory_space<vmem>>, vector<1x256xf32>
    %92 = vector.extract_strided_slice %87 {offsets = [0, 0, 0], sizes = [1, 32, 64], strides = [1, 1, 1]} : vector<3x32x64xf32> to vector<1x32x64xf32>
    %93 = vector.shape_cast %92 : vector<1x32x64xf32> to vector<32x64xf32>
    %cst_39 = arith.constant dense<0.000000e+00> : vector<32x256xf32>
    %94 = tpu.matmul %93, %86, %cst_39 {dimension_numbers = #tpu.dot_dimension_numbers<[1], [0], [0], [1], [0, 0, 1, 1], [], []>} : vector<32x64xf32>, vector<64x256xf32>, vector<32x256xf32> -> vector<32x256xf32>
    %95 = vector.extract_strided_slice %88 {offsets = [0, 0, 0], sizes = [1, 256, 128], strides = [1, 1, 1]} : vector<3x256x128xf32> to vector<1x256x128xf32>
    %96 = vector.shape_cast %95 : vector<1x256x128xf32> to vector<256x128xf32>
    %cst_40 = arith.constant dense<0.000000e+00> : vector<32x128xf32>
    %97 = tpu.matmul %94, %96, %cst_40 {dimension_numbers = #tpu.dot_dimension_numbers<[1], [0], [0], [1], [0, 0, 1, 1], [], []>} : vector<32x256xf32>, vector<256x128xf32>, vector<32x128xf32> -> vector<32x128xf32>
    %98 = vector.extract_strided_slice %89 {offsets = [0, 0], sizes = [1, 128], strides = [1, 1]} : vector<10x128xf32> to vector<1x128xf32>
    %99 = vector.broadcast %98 : vector<1x128xf32> to vector<32x128xf32>
    %100 = arith.mulf %97, %99 : vector<32x128xf32>
    %101 = vector.extract_strided_slice %88 {offsets = [1, 0, 0], sizes = [1, 256, 128], strides = [1, 1, 1]} : vector<3x256x128xf32> to vector<1x256x128xf32>
    %102 = vector.shape_cast %101 : vector<1x256x128xf32> to vector<256x128xf32>
    %cst_41 = arith.constant dense<0.000000e+00> : vector<32x128xf32>
    %103 = tpu.matmul %94, %102, %cst_41 {dimension_numbers = #tpu.dot_dimension_numbers<[1], [0], [0], [1], [0, 0, 1, 1], [], []>} : vector<32x256xf32>, vector<256x128xf32>, vector<32x128xf32> -> vector<32x128xf32>
    %104 = vector.extract_strided_slice %89 {offsets = [1, 0], sizes = [1, 128], strides = [1, 1]} : vector<10x128xf32> to vector<1x128xf32>
    %105 = vector.broadcast %104 : vector<1x128xf32> to vector<32x128xf32>
    %106 = arith.mulf %103, %105 : vector<32x128xf32>
    %107 = arith.addf %100, %106 : vector<32x128xf32>
    %108 = vector.extract_strided_slice %88 {offsets = [2, 0, 0], sizes = [1, 256, 128], strides = [1, 1, 1]} : vector<3x256x128xf32> to vector<1x256x128xf32>
    %109 = vector.shape_cast %108 : vector<1x256x128xf32> to vector<256x128xf32>
    %cst_42 = arith.constant dense<0.000000e+00> : vector<32x128xf32>
    %110 = tpu.matmul %94, %109, %cst_42 {dimension_numbers = #tpu.dot_dimension_numbers<[1], [0], [0], [1], [0, 0, 1, 1], [], []>} : vector<32x256xf32>, vector<256x128xf32>, vector<32x128xf32> -> vector<32x128xf32>
    %111 = vector.extract_strided_slice %89 {offsets = [2, 0], sizes = [1, 128], strides = [1, 1]} : vector<10x128xf32> to vector<1x128xf32>
    %112 = vector.broadcast %111 : vector<1x128xf32> to vector<32x128xf32>
    %113 = arith.mulf %110, %112 : vector<32x128xf32>
    %114 = arith.addf %107, %113 : vector<32x128xf32>
    %115 = vector.extract_strided_slice %87 {offsets = [1, 0, 0], sizes = [1, 32, 64], strides = [1, 1, 1]} : vector<3x32x64xf32> to vector<1x32x64xf32>
    %116 = vector.shape_cast %115 : vector<1x32x64xf32> to vector<32x64xf32>
    %cst_43 = arith.constant dense<0.000000e+00> : vector<32x256xf32>
    %117 = tpu.matmul %116, %86, %cst_43 {dimension_numbers = #tpu.dot_dimension_numbers<[1], [0], [0], [1], [0, 0, 1, 1], [], []>} : vector<32x64xf32>, vector<64x256xf32>, vector<32x256xf32> -> vector<32x256xf32>
    %118 = vector.extract_strided_slice %88 {offsets = [0, 0, 0], sizes = [1, 256, 128], strides = [1, 1, 1]} : vector<3x256x128xf32> to vector<1x256x128xf32>
    %119 = vector.shape_cast %118 : vector<1x256x128xf32> to vector<256x128xf32>
    %cst_44 = arith.constant dense<0.000000e+00> : vector<32x128xf32>
    %120 = tpu.matmul %117, %119, %cst_44 {dimension_numbers = #tpu.dot_dimension_numbers<[1], [0], [0], [1], [0, 0, 1, 1], [], []>} : vector<32x256xf32>, vector<256x128xf32>, vector<32x128xf32> -> vector<32x128xf32>
    %121 = vector.extract_strided_slice %89 {offsets = [3, 0], sizes = [1, 128], strides = [1, 1]} : vector<10x128xf32> to vector<1x128xf32>
    %122 = vector.broadcast %121 : vector<1x128xf32> to vector<32x128xf32>
    %123 = arith.mulf %120, %122 : vector<32x128xf32>
    %124 = arith.addf %114, %123 : vector<32x128xf32>
    %125 = vector.extract_strided_slice %88 {offsets = [1, 0, 0], sizes = [1, 256, 128], strides = [1, 1, 1]} : vector<3x256x128xf32> to vector<1x256x128xf32>
    %126 = vector.shape_cast %125 : vector<1x256x128xf32> to vector<256x128xf32>
    %cst_45 = arith.constant dense<0.000000e+00> : vector<32x128xf32>
    %127 = tpu.matmul %117, %126, %cst_45 {dimension_numbers = #tpu.dot_dimension_numbers<[1], [0], [0], [1], [0, 0, 1, 1], [], []>} : vector<32x256xf32>, vector<256x128xf32>, vector<32x128xf32> -> vector<32x128xf32>
    %128 = vector.extract_strided_slice %89 {offsets = [4, 0], sizes = [1, 128], strides = [1, 1]} : vector<10x128xf32> to vector<1x128xf32>
    %129 = vector.broadcast %128 : vector<1x128xf32> to vector<32x128xf32>
    %130 = arith.mulf %127, %129 : vector<32x128xf32>
    %131 = arith.addf %124, %130 : vector<32x128xf32>
    %132 = vector.extract_strided_slice %88 {offsets = [2, 0, 0], sizes = [1, 256, 128], strides = [1, 1, 1]} : vector<3x256x128xf32> to vector<1x256x128xf32>
    %133 = vector.shape_cast %132 : vector<1x256x128xf32> to vector<256x128xf32>
    %cst_46 = arith.constant dense<0.000000e+00> : vector<32x128xf32>
    %134 = tpu.matmul %117, %133, %cst_46 {dimension_numbers = #tpu.dot_dimension_numbers<[1], [0], [0], [1], [0, 0, 1, 1], [], []>} : vector<32x256xf32>, vector<256x128xf32>, vector<32x128xf32> -> vector<32x128xf32>
    %135 = vector.extract_strided_slice %89 {offsets = [5, 0], sizes = [1, 128], strides = [1, 1]} : vector<10x128xf32> to vector<1x128xf32>
    %136 = vector.broadcast %135 : vector<1x128xf32> to vector<32x128xf32>
    %137 = arith.mulf %134, %136 : vector<32x128xf32>
    %138 = arith.addf %131, %137 : vector<32x128xf32>
    %139 = vector.extract_strided_slice %87 {offsets = [2, 0, 0], sizes = [1, 32, 64], strides = [1, 1, 1]} : vector<3x32x64xf32> to vector<1x32x64xf32>
    %140 = vector.shape_cast %139 : vector<1x32x64xf32> to vector<32x64xf32>
    %cst_47 = arith.constant dense<0.000000e+00> : vector<32x256xf32>
    %141 = tpu.matmul %140, %86, %cst_47 {dimension_numbers = #tpu.dot_dimension_numbers<[1], [0], [0], [1], [0, 0, 1, 1], [], []>} : vector<32x64xf32>, vector<64x256xf32>, vector<32x256xf32> -> vector<32x256xf32>
    %142 = vector.extract_strided_slice %88 {offsets = [0, 0, 0], sizes = [1, 256, 128], strides = [1, 1, 1]} : vector<3x256x128xf32> to vector<1x256x128xf32>
    %143 = vector.shape_cast %142 : vector<1x256x128xf32> to vector<256x128xf32>
    %cst_48 = arith.constant dense<0.000000e+00> : vector<32x128xf32>
    %144 = tpu.matmul %141, %143, %cst_48 {dimension_numbers = #tpu.dot_dimension_numbers<[1], [0], [0], [1], [0, 0, 1, 1], [], []>} : vector<32x256xf32>, vector<256x128xf32>, vector<32x128xf32> -> vector<32x128xf32>
    %145 = vector.extract_strided_slice %89 {offsets = [6, 0], sizes = [1, 128], strides = [1, 1]} : vector<10x128xf32> to vector<1x128xf32>
    %146 = vector.broadcast %145 : vector<1x128xf32> to vector<32x128xf32>
    %147 = arith.mulf %144, %146 : vector<32x128xf32>
    %148 = arith.addf %138, %147 : vector<32x128xf32>
    %149 = vector.extract_strided_slice %88 {offsets = [1, 0, 0], sizes = [1, 256, 128], strides = [1, 1, 1]} : vector<3x256x128xf32> to vector<1x256x128xf32>
    %150 = vector.shape_cast %149 : vector<1x256x128xf32> to vector<256x128xf32>
    %cst_49 = arith.constant dense<0.000000e+00> : vector<32x128xf32>
    %151 = tpu.matmul %141, %150, %cst_49 {dimension_numbers = #tpu.dot_dimension_numbers<[1], [0], [0], [1], [0, 0, 1, 1], [], []>} : vector<32x256xf32>, vector<256x128xf32>, vector<32x128xf32> -> vector<32x128xf32>
    %152 = vector.extract_strided_slice %89 {offsets = [7, 0], sizes = [1, 128], strides = [1, 1]} : vector<10x128xf32> to vector<1x128xf32>
    %153 = vector.broadcast %152 : vector<1x128xf32> to vector<32x128xf32>
    %154 = arith.mulf %151, %153 : vector<32x128xf32>
    %155 = arith.addf %148, %154 : vector<32x128xf32>
    %156 = vector.extract_strided_slice %88 {offsets = [2, 0, 0], sizes = [1, 256, 128], strides = [1, 1, 1]} : vector<3x256x128xf32> to vector<1x256x128xf32>
    %157 = vector.shape_cast %156 : vector<1x256x128xf32> to vector<256x128xf32>
    %cst_50 = arith.constant dense<0.000000e+00> : vector<32x128xf32>
    %158 = tpu.matmul %141, %157, %cst_50 {dimension_numbers = #tpu.dot_dimension_numbers<[1], [0], [0], [1], [0, 0, 1, 1], [], []>} : vector<32x256xf32>, vector<256x128xf32>, vector<32x128xf32> -> vector<32x128xf32>
    %159 = vector.extract_strided_slice %89 {offsets = [8, 0], sizes = [1, 128], strides = [1, 1]} : vector<10x128xf32> to vector<1x128xf32>
    %160 = vector.broadcast %159 : vector<1x128xf32> to vector<32x128xf32>
    %161 = arith.mulf %158, %160 : vector<32x128xf32>
    %162 = arith.addf %155, %161 : vector<32x128xf32>
    %163 = vector.extract_strided_slice %89 {offsets = [9, 0], sizes = [1, 128], strides = [1, 1]} : vector<10x128xf32> to vector<1x128xf32>
    %164 = vector.broadcast %163 : vector<1x128xf32> to vector<32x128xf32>
    %165 = arith.addf %162, %164 : vector<32x128xf32>
    %cst_51 = arith.constant 0.000000e+00 : f32
    %166 = vector.broadcast %cst_51 : f32 to vector<32x128xf32>
    %167 = arith.maximumf %165, %166 : vector<32x128xf32>
    %cst_52 = arith.constant dense<0.000000e+00> : vector<32x256xf32>
    %168 = tpu.matmul %167, %90, %cst_52 {dimension_numbers = #tpu.dot_dimension_numbers<[1], [0], [0], [1], [0, 0, 1, 1], [], []>} : vector<32x128xf32>, vector<128x256xf32>, vector<32x256xf32> -> vector<32x256xf32>
    %169 = vector.broadcast %91 : vector<1x256xf32> to vector<32x256xf32>
    %170 = arith.addf %168, %169 : vector<32x256xf32>
    %cst_53 = arith.constant 0.000000e+00 : f32
    %171 = vector.broadcast %cst_53 : f32 to vector<32x256xf32>
    %172 = arith.maximumf %170, %171 : vector<32x256xf32>
    %c0_54 = arith.constant 0 : index
    %c0_55 = arith.constant 0 : index
    %c0_56 = arith.constant 0 : index
    %173 = vector.load %arg12[%c0_54, %c0_55, %c0_56] : memref<3x16x32xf32, #tpu.memory_space<vmem>>, vector<3x16x32xf32>
    %c0_57 = arith.constant 0 : index
    %c0_58 = arith.constant 0 : index
    %c0_59 = arith.constant 0 : index
    %174 = vector.load %arg13[%c0_57, %c0_58, %c0_59] : memref<3x256x128xf32, #tpu.memory_space<vmem>>, vector<3x256x128xf32>
    %c0_60 = arith.constant 0 : index
    %c0_61 = arith.constant 0 : index
    %175 = vector.load %arg14[%c0_60, %c0_61] : memref<10x128xf32, #tpu.memory_space<vmem>>, vector<10x128xf32>
    %c0_62 = arith.constant 0 : index
    %c0_63 = arith.constant 0 : index
    %176 = vector.load %arg15[%c0_62, %c0_63] : memref<128x256xf32, #tpu.memory_space<vmem>>, vector<128x256xf32>
    %c0_64 = arith.constant 0 : index
    %c0_65 = arith.constant 0 : index
    %177 = vector.load %arg16[%c0_64, %c0_65] : memref<1x256xf32, #tpu.memory_space<vmem>>, vector<1x256xf32>
    %178 = vector.extract_strided_slice %173 {offsets = [0, 0, 0], sizes = [1, 16, 32], strides = [1, 1, 1]} : vector<3x16x32xf32> to vector<1x16x32xf32>
    %179 = vector.shape_cast %178 : vector<1x16x32xf32> to vector<16x32xf32>
    %cst_66 = arith.constant dense<0.000000e+00> : vector<16x256xf32>
    %180 = tpu.matmul %179, %172, %cst_66 {dimension_numbers = #tpu.dot_dimension_numbers<[1], [0], [0], [1], [0, 0, 1, 1], [], []>} : vector<16x32xf32>, vector<32x256xf32>, vector<16x256xf32> -> vector<16x256xf32>
    %181 = vector.extract_strided_slice %174 {offsets = [0, 0, 0], sizes = [1, 256, 128], strides = [1, 1, 1]} : vector<3x256x128xf32> to vector<1x256x128xf32>
    %182 = vector.shape_cast %181 : vector<1x256x128xf32> to vector<256x128xf32>
    %cst_67 = arith.constant dense<0.000000e+00> : vector<16x128xf32>
    %183 = tpu.matmul %180, %182, %cst_67 {dimension_numbers = #tpu.dot_dimension_numbers<[1], [0], [0], [1], [0, 0, 1, 1], [], []>} : vector<16x256xf32>, vector<256x128xf32>, vector<16x128xf32> -> vector<16x128xf32>
    %184 = vector.extract_strided_slice %175 {offsets = [0, 0], sizes = [1, 128], strides = [1, 1]} : vector<10x128xf32> to vector<1x128xf32>
    %185 = vector.broadcast %184 : vector<1x128xf32> to vector<16x128xf32>
    %186 = arith.mulf %183, %185 : vector<16x128xf32>
    %187 = vector.extract_strided_slice %174 {offsets = [1, 0, 0], sizes = [1, 256, 128], strides = [1, 1, 1]} : vector<3x256x128xf32> to vector<1x256x128xf32>
    %188 = vector.shape_cast %187 : vector<1x256x128xf32> to vector<256x128xf32>
    %cst_68 = arith.constant dense<0.000000e+00> : vector<16x128xf32>
    %189 = tpu.matmul %180, %188, %cst_68 {dimension_numbers = #tpu.dot_dimension_numbers<[1], [0], [0], [1], [0, 0, 1, 1], [], []>} : vector<16x256xf32>, vector<256x128xf32>, vector<16x128xf32> -> vector<16x128xf32>
    %190 = vector.extract_strided_slice %175 {offsets = [1, 0], sizes = [1, 128], strides = [1, 1]} : vector<10x128xf32> to vector<1x128xf32>
    %191 = vector.broadcast %190 : vector<1x128xf32> to vector<16x128xf32>
    %192 = arith.mulf %189, %191 : vector<16x128xf32>
    %193 = arith.addf %186, %192 : vector<16x128xf32>
    %194 = vector.extract_strided_slice %174 {offsets = [2, 0, 0], sizes = [1, 256, 128], strides = [1, 1, 1]} : vector<3x256x128xf32> to vector<1x256x128xf32>
    %195 = vector.shape_cast %194 : vector<1x256x128xf32> to vector<256x128xf32>
    %cst_69 = arith.constant dense<0.000000e+00> : vector<16x128xf32>
    %196 = tpu.matmul %180, %195, %cst_69 {dimension_numbers = #tpu.dot_dimension_numbers<[1], [0], [0], [1], [0, 0, 1, 1], [], []>} : vector<16x256xf32>, vector<256x128xf32>, vector<16x128xf32> -> vector<16x128xf32>
    %197 = vector.extract_strided_slice %175 {offsets = [2, 0], sizes = [1, 128], strides = [1, 1]} : vector<10x128xf32> to vector<1x128xf32>
    %198 = vector.broadcast %197 : vector<1x128xf32> to vector<16x128xf32>
    %199 = arith.mulf %196, %198 : vector<16x128xf32>
    %200 = arith.addf %193, %199 : vector<16x128xf32>
    %201 = vector.extract_strided_slice %173 {offsets = [1, 0, 0], sizes = [1, 16, 32], strides = [1, 1, 1]} : vector<3x16x32xf32> to vector<1x16x32xf32>
    %202 = vector.shape_cast %201 : vector<1x16x32xf32> to vector<16x32xf32>
    %cst_70 = arith.constant dense<0.000000e+00> : vector<16x256xf32>
    %203 = tpu.matmul %202, %172, %cst_70 {dimension_numbers = #tpu.dot_dimension_numbers<[1], [0], [0], [1], [0, 0, 1, 1], [], []>} : vector<16x32xf32>, vector<32x256xf32>, vector<16x256xf32> -> vector<16x256xf32>
    %204 = vector.extract_strided_slice %174 {offsets = [0, 0, 0], sizes = [1, 256, 128], strides = [1, 1, 1]} : vector<3x256x128xf32> to vector<1x256x128xf32>
    %205 = vector.shape_cast %204 : vector<1x256x128xf32> to vector<256x128xf32>
    %cst_71 = arith.constant dense<0.000000e+00> : vector<16x128xf32>
    %206 = tpu.matmul %203, %205, %cst_71 {dimension_numbers = #tpu.dot_dimension_numbers<[1], [0], [0], [1], [0, 0, 1, 1], [], []>} : vector<16x256xf32>, vector<256x128xf32>, vector<16x128xf32> -> vector<16x128xf32>
    %207 = vector.extract_strided_slice %175 {offsets = [3, 0], sizes = [1, 128], strides = [1, 1]} : vector<10x128xf32> to vector<1x128xf32>
    %208 = vector.broadcast %207 : vector<1x128xf32> to vector<16x128xf32>
    %209 = arith.mulf %206, %208 : vector<16x128xf32>
    %210 = arith.addf %200, %209 : vector<16x128xf32>
    %211 = vector.extract_strided_slice %174 {offsets = [1, 0, 0], sizes = [1, 256, 128], strides = [1, 1, 1]} : vector<3x256x128xf32> to vector<1x256x128xf32>
    %212 = vector.shape_cast %211 : vector<1x256x128xf32> to vector<256x128xf32>
    %cst_72 = arith.constant dense<0.000000e+00> : vector<16x128xf32>
    %213 = tpu.matmul %203, %212, %cst_72 {dimension_numbers = #tpu.dot_dimension_numbers<[1], [0], [0], [1], [0, 0, 1, 1], [], []>} : vector<16x256xf32>, vector<256x128xf32>, vector<16x128xf32> -> vector<16x128xf32>
    %214 = vector.extract_strided_slice %175 {offsets = [4, 0], sizes = [1, 128], strides = [1, 1]} : vector<10x128xf32> to vector<1x128xf32>
    %215 = vector.broadcast %214 : vector<1x128xf32> to vector<16x128xf32>
    %216 = arith.mulf %213, %215 : vector<16x128xf32>
    %217 = arith.addf %210, %216 : vector<16x128xf32>
    %218 = vector.extract_strided_slice %174 {offsets = [2, 0, 0], sizes = [1, 256, 128], strides = [1, 1, 1]} : vector<3x256x128xf32> to vector<1x256x128xf32>
    %219 = vector.shape_cast %218 : vector<1x256x128xf32> to vector<256x128xf32>
    %cst_73 = arith.constant dense<0.000000e+00> : vector<16x128xf32>
    %220 = tpu.matmul %203, %219, %cst_73 {dimension_numbers = #tpu.dot_dimension_numbers<[1], [0], [0], [1], [0, 0, 1, 1], [], []>} : vector<16x256xf32>, vector<256x128xf32>, vector<16x128xf32> -> vector<16x128xf32>
    %221 = vector.extract_strided_slice %175 {offsets = [5, 0], sizes = [1, 128], strides = [1, 1]} : vector<10x128xf32> to vector<1x128xf32>
    %222 = vector.broadcast %221 : vector<1x128xf32> to vector<16x128xf32>
    %223 = arith.mulf %220, %222 : vector<16x128xf32>
    %224 = arith.addf %217, %223 : vector<16x128xf32>
    %225 = vector.extract_strided_slice %173 {offsets = [2, 0, 0], sizes = [1, 16, 32], strides = [1, 1, 1]} : vector<3x16x32xf32> to vector<1x16x32xf32>
    %226 = vector.shape_cast %225 : vector<1x16x32xf32> to vector<16x32xf32>
    %cst_74 = arith.constant dense<0.000000e+00> : vector<16x256xf32>
    %227 = tpu.matmul %226, %172, %cst_74 {dimension_numbers = #tpu.dot_dimension_numbers<[1], [0], [0], [1], [0, 0, 1, 1], [], []>} : vector<16x32xf32>, vector<32x256xf32>, vector<16x256xf32> -> vector<16x256xf32>
    %228 = vector.extract_strided_slice %174 {offsets = [0, 0, 0], sizes = [1, 256, 128], strides = [1, 1, 1]} : vector<3x256x128xf32> to vector<1x256x128xf32>
    %229 = vector.shape_cast %228 : vector<1x256x128xf32> to vector<256x128xf32>
    %cst_75 = arith.constant dense<0.000000e+00> : vector<16x128xf32>
    %230 = tpu.matmul %227, %229, %cst_75 {dimension_numbers = #tpu.dot_dimension_numbers<[1], [0], [0], [1], [0, 0, 1, 1], [], []>} : vector<16x256xf32>, vector<256x128xf32>, vector<16x128xf32> -> vector<16x128xf32>
    %231 = vector.extract_strided_slice %175 {offsets = [6, 0], sizes = [1, 128], strides = [1, 1]} : vector<10x128xf32> to vector<1x128xf32>
    %232 = vector.broadcast %231 : vector<1x128xf32> to vector<16x128xf32>
    %233 = arith.mulf %230, %232 : vector<16x128xf32>
    %234 = arith.addf %224, %233 : vector<16x128xf32>
    %235 = vector.extract_strided_slice %174 {offsets = [1, 0, 0], sizes = [1, 256, 128], strides = [1, 1, 1]} : vector<3x256x128xf32> to vector<1x256x128xf32>
    %236 = vector.shape_cast %235 : vector<1x256x128xf32> to vector<256x128xf32>
    %cst_76 = arith.constant dense<0.000000e+00> : vector<16x128xf32>
    %237 = tpu.matmul %227, %236, %cst_76 {dimension_numbers = #tpu.dot_dimension_numbers<[1], [0], [0], [1], [0, 0, 1, 1], [], []>} : vector<16x256xf32>, vector<256x128xf32>, vector<16x128xf32> -> vector<16x128xf32>
    %238 = vector.extract_strided_slice %175 {offsets = [7, 0], sizes = [1, 128], strides = [1, 1]} : vector<10x128xf32> to vector<1x128xf32>
    %239 = vector.broadcast %238 : vector<1x128xf32> to vector<16x128xf32>
    %240 = arith.mulf %237, %239 : vector<16x128xf32>
    %241 = arith.addf %234, %240 : vector<16x128xf32>
    %242 = vector.extract_strided_slice %174 {offsets = [2, 0, 0], sizes = [1, 256, 128], strides = [1, 1, 1]} : vector<3x256x128xf32> to vector<1x256x128xf32>
    %243 = vector.shape_cast %242 : vector<1x256x128xf32> to vector<256x128xf32>
    %cst_77 = arith.constant dense<0.000000e+00> : vector<16x128xf32>
    %244 = tpu.matmul %227, %243, %cst_77 {dimension_numbers = #tpu.dot_dimension_numbers<[1], [0], [0], [1], [0, 0, 1, 1], [], []>} : vector<16x256xf32>, vector<256x128xf32>, vector<16x128xf32> -> vector<16x128xf32>
    %245 = vector.extract_strided_slice %175 {offsets = [8, 0], sizes = [1, 128], strides = [1, 1]} : vector<10x128xf32> to vector<1x128xf32>
    %246 = vector.broadcast %245 : vector<1x128xf32> to vector<16x128xf32>
    %247 = arith.mulf %244, %246 : vector<16x128xf32>
    %248 = arith.addf %241, %247 : vector<16x128xf32>
    %249 = vector.extract_strided_slice %175 {offsets = [9, 0], sizes = [1, 128], strides = [1, 1]} : vector<10x128xf32> to vector<1x128xf32>
    %250 = vector.broadcast %249 : vector<1x128xf32> to vector<16x128xf32>
    %251 = arith.addf %248, %250 : vector<16x128xf32>
    %cst_78 = arith.constant 0.000000e+00 : f32
    %252 = vector.broadcast %cst_78 : f32 to vector<16x128xf32>
    %253 = arith.maximumf %251, %252 : vector<16x128xf32>
    %cst_79 = arith.constant dense<0.000000e+00> : vector<16x256xf32>
    %254 = tpu.matmul %253, %176, %cst_79 {dimension_numbers = #tpu.dot_dimension_numbers<[1], [0], [0], [1], [0, 0, 1, 1], [], []>} : vector<16x128xf32>, vector<128x256xf32>, vector<16x256xf32> -> vector<16x256xf32>
    %255 = vector.broadcast %177 : vector<1x256xf32> to vector<16x256xf32>
    %256 = arith.addf %254, %255 : vector<16x256xf32>
    %cst_80 = arith.constant 0.000000e+00 : f32
    %257 = vector.broadcast %cst_80 : f32 to vector<16x256xf32>
    %258 = arith.maximumf %256, %257 : vector<16x256xf32>
    %c0_81 = arith.constant 0 : index
    %c0_82 = arith.constant 0 : index
    %259 = vector.load %arg17[%c0_81, %c0_82] : memref<8x16xf32, #tpu.memory_space<vmem>>, vector<8x16xf32>
    %cst_83 = arith.constant dense<0.000000e+00> : vector<8x256xf32>
    %260 = tpu.matmul %259, %258, %cst_83 {dimension_numbers = #tpu.dot_dimension_numbers<[1], [0], [0], [1], [0, 0, 1, 1], [], []>} : vector<8x16xf32>, vector<16x256xf32>, vector<8x256xf32> -> vector<8x256xf32>
    %c0_84 = arith.constant 0 : index
    %c0_85 = arith.constant 0 : index
    %261 = vector.load %arg18[%c0_84, %c0_85] : memref<256x128xf32, #tpu.memory_space<vmem>>, vector<256x128xf32>
    %cst_86 = arith.constant dense<0.000000e+00> : vector<8x128xf32>
    %262 = tpu.matmul %260, %261, %cst_86 {dimension_numbers = #tpu.dot_dimension_numbers<[1], [0], [0], [1], [0, 0, 1, 1], [], []>} : vector<8x256xf32>, vector<256x128xf32>, vector<8x128xf32> -> vector<8x128xf32>
    %c0_87 = arith.constant 0 : index
    %c0_88 = arith.constant 0 : index
    %263 = vector.load %arg19[%c0_87, %c0_88] : memref<1x128xf32, #tpu.memory_space<vmem>>, vector<1x128xf32>
    %264 = vector.broadcast %263 : vector<1x128xf32> to vector<8x128xf32>
    %265 = arith.addf %262, %264 : vector<8x128xf32>
    %c0_89 = arith.constant 0 : index
    %c0_90 = arith.constant 0 : index
    %266 = vector.load %arg20[%c0_89, %c0_90] : memref<8x128xf32, #tpu.memory_space<vmem>>, vector<8x128xf32>
    tpu.vector_store %arg20[%c0_89, %c0_90], %265 {strides = array<i32>} : memref<8x128xf32, #tpu.memory_space<vmem>>, vector<8x128xf32>,
    return
  }
  func.func @transform_0(%arg0: i32) -> (i32, i32) {
    %c0_i32 = arith.constant 0 : i32
    %c0_i32_0 = arith.constant 0 : i32
    return %arg0, %c0_i32 : i32, i32
  }
  func.func @transform_1(%arg0: i32) -> (i32, i32, i32) {
    %c0_i32 = arith.constant 0 : i32
    %c0_i32_0 = arith.constant 0 : i32
    %c0_i32_1 = arith.constant 0 : i32
    %c0_i32_2 = arith.constant 0 : i32
    return %c0_i32, %c0_i32_0, %c0_i32_1 : i32, i32, i32
  }
  func.func @transform_2(%arg0: i32) -> (i32, i32, i32) {
    %c0_i32 = arith.constant 0 : i32
    %c0_i32_0 = arith.constant 0 : i32
    %c0_i32_1 = arith.constant 0 : i32
    %c0_i32_2 = arith.constant 0 : i32
    return %c0_i32, %c0_i32_0, %c0_i32_1 : i32, i32, i32
  }
  func.func @transform_3(%arg0: i32) -> (i32, i32) {
    %c0_i32 = arith.constant 0 : i32
    %c0_i32_0 = arith.constant 0 : i32
    %c0_i32_1 = arith.constant 0 : i32
    return %c0_i32, %c0_i32_0 : i32, i32
  }
  func.func @transform_4(%arg0: i32) -> (i32, i32) {
    %c0_i32 = arith.constant 0 : i32
    %c0_i32_0 = arith.constant 0 : i32
    %c0_i32_1 = arith.constant 0 : i32
    return %c0_i32, %c0_i32_0 : i32, i32
  }
  func.func @transform_5(%arg0: i32) -> (i32, i32) {
    %c0_i32 = arith.constant 0 : i32
    %c0_i32_0 = arith.constant 0 : i32
    %c0_i32_1 = arith.constant 0 : i32
    return %c0_i32, %c0_i32_0 : i32, i32
  }
  func.func @transform_6(%arg0: i32) -> (i32, i32, i32) {
    %c0_i32 = arith.constant 0 : i32
    %c0_i32_0 = arith.constant 0 : i32
    %c0_i32_1 = arith.constant 0 : i32
    %c0_i32_2 = arith.constant 0 : i32
    return %c0_i32, %c0_i32_0, %c0_i32_1 : i32, i32, i32
  }
  func.func @transform_7(%arg0: i32) -> (i32, i32, i32) {
    %c0_i32 = arith.constant 0 : i32
    %c0_i32_0 = arith.constant 0 : i32
    %c0_i32_1 = arith.constant 0 : i32
    %c0_i32_2 = arith.constant 0 : i32
    return %c0_i32, %c0_i32_0, %c0_i32_1 : i32, i32, i32
  }
  func.func @transform_8(%arg0: i32) -> (i32, i32) {
    %c0_i32 = arith.constant 0 : i32
    %c0_i32_0 = arith.constant 0 : i32
    %c0_i32_1 = arith.constant 0 : i32
    return %c0_i32, %c0_i32_0 : i32, i32
  }
  func.func @transform_9(%arg0: i32) -> (i32, i32) {
    %c0_i32 = arith.constant 0 : i32
    %c0_i32_0 = arith.constant 0 : i32
    %c0_i32_1 = arith.constant 0 : i32
    return %c0_i32, %c0_i32_0 : i32, i32
  }
  func.func @transform_10(%arg0: i32) -> (i32, i32) {
    %c0_i32 = arith.constant 0 : i32
    %c0_i32_0 = arith.constant 0 : i32
    %c0_i32_1 = arith.constant 0 : i32
    return %c0_i32, %c0_i32_0 : i32, i32
  }
  func.func @transform_11(%arg0: i32) -> (i32, i32, i32) {
    %c0_i32 = arith.constant 0 : i32
    %c0_i32_0 = arith.constant 0 : i32
    %c0_i32_1 = arith.constant 0 : i32
    %c0_i32_2 = arith.constant 0 : i32
    return %c0_i32, %c0_i32_0, %c0_i32_1 : i32, i32, i32
  }
  func.func @transform_12(%arg0: i32) -> (i32, i32, i32) {
    %c0_i32 = arith.constant 0 : i32
    %c0_i32_0 = arith.constant 0 : i32
    %c0_i32_1 = arith.constant 0 : i32
    %c0_i32_2 = arith.constant 0 : i32
    return %c0_i32, %c0_i32_0, %c0_i32_1 : i32, i32, i32
  }
  func.func @transform_13(%arg0: i32) -> (i32, i32) {
    %c0_i32 = arith.constant 0 : i32
    %c0_i32_0 = arith.constant 0 : i32
    %c0_i32_1 = arith.constant 0 : i32
    return %c0_i32, %c0_i32_0 : i32, i32
  }
  func.func @transform_14(%arg0: i32) -> (i32, i32) {
    %c0_i32 = arith.constant 0 : i32
    %c0_i32_0 = arith.constant 0 : i32
    %c0_i32_1 = arith.constant 0 : i32
    return %c0_i32, %c0_i32_0 : i32, i32
  }
  func.func @transform_15(%arg0: i32) -> (i32, i32) {
    %c0_i32 = arith.constant 0 : i32
    %c0_i32_0 = arith.constant 0 : i32
    %c0_i32_1 = arith.constant 0 : i32
    return %c0_i32, %c0_i32_0 : i32, i32
  }
  func.func @transform_16(%arg0: i32) -> (i32, i32) {
    %c0_i32 = arith.constant 0 : i32
    %c0_i32_0 = arith.constant 0 : i32
    %c0_i32_1 = arith.constant 0 : i32
    return %c0_i32, %c0_i32_0 : i32, i32
  }
  func.func @transform_17(%arg0: i32) -> (i32, i32) {
    %c0_i32 = arith.constant 0 : i32
    %c0_i32_0 = arith.constant 0 : i32
    %c0_i32_1 = arith.constant 0 : i32
    return %c0_i32, %c0_i32_0 : i32, i32
  }
  func.func @transform_18(%arg0: i32) -> (i32, i32) {
    %c0_i32 = arith.constant 0 : i32
    %c0_i32_0 = arith.constant 0 : i32
    %c0_i32_1 = arith.constant 0 : i32
    return %c0_i32, %c0_i32_0 : i32, i32
  }
  func.func @transform_19(%arg0: i32) -> (i32, i32) {
    %c0_i32 = arith.constant 0 : i32
    %c0_i32_0 = arith.constant 0 : i32
    return %arg0, %c0_i32 : i32, i32
  }
}

</mosaic_0001>

<bundles_post_ra>
// kernel: tile.31
= control target key start
LH: loop header
LB: loop body
LE: loop exit
PB: predicated region body
PF: predicated region fallthrough
CT: control target
= control target key end

     0   :  { %vm35_vm0 = vcmask 80896   ;;  %s152_s0 = inlined_call_operand.vmem [shape: f32[10,8,3], index: 0, kind: input, shape index: {}]   ;;  %s153_s1 = inlined_call_operand.vmem [shape: f32[10,24], index: 1, kind: output, shape index: {}]  }
   0x1   :  { %v72_v0 = vld [vmem:[%s152_s0 + $0x1c] sm:$0xf]  ;;  %v73_v1 = vld [vmem:[%s152_s0 + $0x18] sm:$0xf]  ;;  %v74_v2 = vld [vmem:[%s152_s0 + $0x14] sm:$0xf] }
   0x2   :  { %7 = vst [vmem:[#allocation0 + $0x8] sm:$0xf] %v72_v0  ;;  %v75_v3 = vld [vmem:[%s152_s0 + $0x10] sm:$0xf]  ;;  %v76_v4 = vld [vmem:[%s152_s0 + $0xc] sm:$0xf] }
   0x3   :  { %11 = vst [vmem:[#allocation0 + $0x38] sm:$0xf] %v73_v1  ;;  %v77_v5 = vld [vmem:[%s152_s0 + $0x8] sm:$0xf]  ;;  %v78_v6 = vld [vmem:[%s152_s0 + $0x4] sm:$0xf] }
   0x4   :  { %15 = vst [vmem:[#allocation0 + $0x20] sm:$0xf] %v74_v2  ;;  %v32_v7 = vld [vmem:[%s152_s0] sm:$0xf] }
   0x5   :  { %19 = vst [vmem:[#allocation0 + $0x28] sm:$0xf] %v75_v3 }
   0x6   :  { %23 = vst [vmem:[#allocation0 + $0x30] sm:$0xf] %v76_v4 }
   0x7   :  { %27 = vst [vmem:[#allocation0 + $0x18] sm:$0xf] %v77_v5 }
   0x8   :  { %31 = vst [vmem:[#allocation0 + $0x10] sm:$0xf] %v78_v6 }
   0x9   :  { %33 = vst [vmem:[#allocation0] sm:$0xf] %v32_v7  ;;  %v68_v8 = vld [vmem:[#allocation0 + $0x8] sm:$0x7]  }
   0xa   :  { %v63_v9 = vld [vmem:[#allocation0 + $0x38] sm:$0x7]   ;;  %85 = vst.msk [vmem:[%s153_s1 + $0x15] sm:$0x7] %vm35_vm0, %v68_v8  }
   0xb   :  { %v58_v10 = vld [vmem:[#allocation0 + $0x20] sm:$0x7]   ;;  %84 = vst.msk [vmem:[%s153_s1 + $0x12] sm:$0x7] %vm35_vm0, %v63_v9  }
   0xc   :  { %v53_v11 = vld [vmem:[#allocation0 + $0x28] sm:$0x7]   ;;  %83 = vst.msk [vmem:[%s153_s1 + $0xf] sm:$0x7] %vm35_vm0, %v58_v10  }
   0xd   :  { %v48_v12 = vld [vmem:[#allocation0 + $0x30] sm:$0x7]   ;;  %82 = vst.msk [vmem:[%s153_s1 + $0xc] sm:$0x7] %vm35_vm0, %v53_v11  }
   0xe   :  { %v43_v13 = vld [vmem:[#allocation0 + $0x18] sm:$0x7]   ;;  %81 = vst.msk [vmem:[%s153_s1 + $0x9] sm:$0x7] %vm35_vm0, %v48_v12  }
   0xf   :  { %v38_v14 = vld [vmem:[#allocation0 + $0x10] sm:$0x7]   ;;  %80 = vst.msk [vmem:[%s153_s1 + $0x6] sm:$0x7] %vm35_vm0, %v43_v13  }
  0x10   :  { %v34_v15 = vld [vmem:[#allocation0] sm:$0x7]   ;;  %79 = vst.msk [vmem:[%s153_s1 + $0x3] sm:$0x7] %vm35_vm0, %v38_v14  }
  0x11   :  { %36 = vst.msk [vmem:[%s153_s1] sm:$0x7] %vm35_vm0, %v34_v15  }

// kernel: tile.40
= control target key start
LH: loop header
LB: loop body
LE: loop exit
PB: predicated region body
PF: predicated region fallthrough
CT: control target
= control target key end

     0   :  { %vm44_vm0 = vcmask 1047556   ;;  %s125_s26 = smov 64   ;;  %s126_s27 = smov 32   ;;  %vm46_vm1 = vcmask 261120   ;;  %vm62_vm2 = vcmask 1048320   ;;  %vm80_vm3 = vcmask 785920   ;;  %s195_s0 = inlined_call_operand.vmem [shape: f32[10,4,32], index: 0, kind: input, shape index: {}]   ;;  %s196_s1 = inlined_call_operand.vmem [shape: f32[10,128], index: 1, kind: output, shape index: {}]  }
   0x1   :  { %v110_v0 = vld [vmem:[%s195_s0 + $0x1c] sm:$0xf]  ;;  %v111_v1 = vld [vmem:[%s195_s0 + $0x18] sm:$0xf]  ;;  %v112_v2 = vld [vmem:[%s195_s0 + $0x14] sm:$0xf] }
   0x2   :  { %15 = vst [vmem:[#allocation0 + $0x38] sm:$0xf] %v110_v0  ;;  %v113_v3 = vld [vmem:[%s195_s0 + $0x10] sm:$0xf]  ;;  %v114_v4 = vld [vmem:[%s195_s0 + $0xc] sm:$0xf] }
   0x3   :  { %19 = vst [vmem:[#allocation0 + $0x30] sm:$0xf] %v111_v1  ;;  %v115_v5 = vld [vmem:[%s195_s0 + $0x8] sm:$0xf]  ;;  %v116_v6 = vld [vmem:[%s195_s0 + $0x4] sm:$0xf] }
   0x4   :  { %23 = vst [vmem:[#allocation0 + $0x28] sm:$0xf] %v112_v2  ;;  %v40_v7 = vld [vmem:[%s195_s0] sm:$0xf]  ;;  %v108_v8 = vld [vmem:[%s195_s0 + $0x24] sm:$0xf] }
   0x5   :  { %27 = vst [vmem:[#allocation0 + $0x20] sm:$0xf] %v113_v3  ;;  %v109_v9 = vld [vmem:[%s195_s0 + $0x20] sm:$0xf]  ;;  %s124_s0 = smov 96   ;;  %s65_s28 = smov 3 }
   0x6   :  { %31 = vst [vmem:[#allocation0 + $0x18] sm:$0xf] %v114_v4  ;;  %s83_s29 = smov 3  ;;  %s101_s30 = smov 3  ;;  %vm98_vm4 = vcmask 523520  }
   0x7   :  { %35 = vst [vmem:[#allocation0 + $0x10] sm:$0xf] %v115_v5  ;;  %s49_s4 = smov 3 }
   0x8   :  { %39 = vst [vmem:[#allocation0 + $0x8] sm:$0xf] %v116_v6 }
   0x9   :  { %41 = vst [vmem:[#allocation0] sm:$0xf] %v40_v7 }
   0xa   :  { %7 = vst [vmem:[#allocation0 + $0x48] sm:$0xf] %v108_v8 }
   0xb   :  { %11 = vst [vmem:[#allocation0 + $0x40] sm:$0xf] %v109_v9 }
   0xc   :  { %v57_v10 = vld [vmem:[#allocation0 + $0x3] ss:$8 sm:$0xf0]   ;;  %v75_v11 = vld [vmem:[#allocation0 + $0x2] ss:$8 sm:$0xf0]  }
   0xd   :  { %v93_v12 = vld [vmem:[#allocation0 + $0x1] ss:$8 sm:$0xf0]   ;;  %v43_v23 = vld [vmem:[#allocation0] ss:$8 sm:$0xf0]  }
  0x10   :  { %v55_v13 = vld [vmem:[#allocation0 + $0x3] ss:$8 sm:$0xf]   ;;  %v73_v14 = vld [vmem:[#allocation0 + $0x2] ss:$8 sm:$0xf]  }
  0x11   :  { %v59_v15 = vsel %vm44_vm0, %v57_v10, %v55_v13  ;;  %v77_v16 = vsel %vm44_vm0, %v75_v11, %v73_v14  ;;  %v91_v17 = vld [vmem:[#allocation0 + $0x1] ss:$8 sm:$0xf]   ;;  %v42_v22 = vld [vmem:[#allocation0] ss:$8 sm:$0xf]  }
  0x12   :  { %60 = vrot.lane.b32.xlu0 %v59_v15, %s124_s0  ;;  %78 = vrot.lane.b32.xlu1 %v77_v16, %s125_s26  ;;  %v95_v18 = vsel %vm44_vm0, %v93_v12, %v91_v17  ;;  %v66_v19 = vld [vmem:[#allocation0 + $0x43] ss:$8 sm:%s65_s28]   ;;  %v84_v20 = vld [vmem:[#allocation0 + $0x42] ss:$8 sm:%s83_s29]   ;;  %v45_v24 = vsel %vm44_vm0, %v43_v23, %v42_v22 }
  0x13   :  { %96 = vrot.lane.b32.xlu2 %v95_v18, %s126_s27  ;;  %v102_v21 = vld [vmem:[#allocation0 + $0x41] ss:$8 sm:%s101_s30]   ;;  %47 = vst.msk [vmem:[%s196_s1] sm:$0xff] %vm46_vm1, %v45_v24   ;;  %v50_v25 = vld [vmem:[#allocation0 + $0x40] ss:$8 sm:%s49_s4]  }
  0x14   :  { %117 = vst.msk [vmem:[%s196_s1 + $0x8] sm:$0x3] %vm46_vm1, %v50_v25  }
  0x1a   :  { %67 = vrot.lane.b32.xlu0 %v66_v19, %s124_s0  ;;  %85 = vrot.lane.b32.xlu1 %v84_v20, %s125_s26 }
  0x1b   :  { %103 = vrot.lane.b32.xlu2 %v102_v21, %s126_s27 }
  0x6d   :  { %v97_v26 = vpop.permute.xlu2 %96  }
  0x75   :  { %v104_v27 = vpop.permute.xlu2 %103  }
  0x84   :  { %v61_v28 = vpop.permute.xlu0 %60   ;;  %v79_v29 = vpop.permute.xlu1 %78  }
  0x85   :  { %63 = vst.msk [vmem:[%s196_s1] sm:$0xff] %vm62_vm2, %v61_v28  }
  0x86   :  { %81 = vst.msk [vmem:[%s196_s1] sm:$0xff] %vm80_vm3, %v79_v29  }
  0x87   :  { %99 = vst.msk [vmem:[%s196_s1] sm:$0xff] %vm98_vm4, %v97_v26  }
  0x8c   :  { %v68_v30 = vpop.permute.xlu0 %67   ;;  %v86_v31 = vpop.permute.xlu1 %85  }
  0x8d   :  { %118 = vst.msk [vmem:[%s196_s1 + $0x8] sm:$0x3] %vm62_vm2, %v68_v30  }
  0x8e   :  { %119 = vst.msk [vmem:[%s196_s1 + $0x8] sm:$0x3] %vm80_vm3, %v86_v31  }
  0x8f   :  { %120 = vst.msk [vmem:[%s196_s1 + $0x8] sm:$0x3] %vm98_vm4, %v104_v27  }

// kernel: tile.49
= control target key start
LH: loop header
LB: loop body
LE: loop exit
PB: predicated region body
PF: predicated region fallthrough
CT: control target
= control target key end

     0   :  { %vm44_vm0 = vcmask 1047556   ;;  %vm46_vm1 = vcmask 523264   ;;  %s65_s28 = smov 3  ;;  %s49_s29 = smov 3  ;;  %vm62_vm2 = vcmask 1048064   ;;  %s137_s0 = inlined_call_operand.vmem [shape: f32[10,2,64], index: 0, kind: input, shape index: {}]   ;;  %s138_s1 = inlined_call_operand.vmem [shape: f32[10,128], index: 1, kind: output, shape index: {}]  }
   0x1   :  { %v74_v0 = vld [vmem:[%s137_s0 + $0xe] sm:$0x3]  ;;  %v75_v1 = vld [vmem:[%s137_s0 + $0xc] sm:$0x3]  ;;  %v76_v2 = vld [vmem:[%s137_s0 + $0xa] sm:$0x3] }
   0x2   :  { %15 = vst [vmem:[#allocation0 + $0x38] sm:$0x3] %v74_v0  ;;  %v77_v3 = vld [vmem:[%s137_s0 + $0x8] sm:$0x3]  ;;  %v78_v4 = vld [vmem:[%s137_s0 + $0x6] sm:$0x3] }
   0x3   :  { %19 = vst [vmem:[#allocation0 + $0x30] sm:$0x3] %v75_v1  ;;  %v79_v5 = vld [vmem:[%s137_s0 + $0x4] sm:$0x3]  ;;  %v80_v6 = vld [vmem:[%s137_s0 + $0x2] sm:$0x3] }
   0x4   :  { %23 = vst [vmem:[#allocation0 + $0x28] sm:$0x3] %v76_v2  ;;  %v40_v7 = vld [vmem:[%s137_s0] sm:$0x3]  ;;  %v72_v8 = vld [vmem:[%s137_s0 + $0x12] sm:$0x3] }
   0x5   :  { %27 = vst [vmem:[#allocation0 + $0x20] sm:$0x3] %v77_v3  ;;  %v73_v9 = vld [vmem:[%s137_s0 + $0x10] sm:$0x3]  ;;  %s84_s0 = smov 64  }
   0x6   :  { %31 = vst [vmem:[#allocation0 + $0x18] sm:$0x3] %v78_v4 }
   0x7   :  { %35 = vst [vmem:[#allocation0 + $0x10] sm:$0x3] %v79_v5 }
   0x8   :  { %39 = vst [vmem:[#allocation0 + $0x8] sm:$0x3] %v80_v6 }
   0x9   :  { %41 = vst [vmem:[#allocation0] sm:$0x3] %v40_v7 }
   0xa   :  { %7 = vst [vmem:[#allocation0 + $0x48] sm:$0x3] %v72_v8 }
   0xb   :  { %11 = vst [vmem:[#allocation0 + $0x40] sm:$0x3] %v73_v9 }
   0xc   :  { %v57_v10 = vld [vmem:[#allocation0 + $0x1] ss:$8 sm:$0xf0]   ;;  %v43_v11 = vld [vmem:[#allocation0] ss:$8 sm:$0xf0]  }
  0x10   :  { %v42_v12 = vld [vmem:[#allocation0] ss:$8 sm:$0xf]   ;;  %v55_v13 = vld [vmem:[#allocation0 + $0x1] ss:$8 sm:$0xf]  }
  0x11   :  { %v59_v14 = vsel %vm44_vm0, %v57_v10, %v55_v13  ;;  %v45_v15 = vsel %vm44_vm0, %v43_v11, %v42_v12 }
  0x12   :  { %60 = vrot.lane.b32.xlu0 %v59_v14, %s84_s0  ;;  %47 = vst.msk [vmem:[%s138_s1] sm:$0xff] %vm46_vm1, %v45_v15   ;;  %v66_v16 = vld [vmem:[#allocation0 + $0x41] ss:$8 sm:%s65_s28]   ;;  %v50_v17 = vld [vmem:[#allocation0 + $0x40] ss:$8 sm:%s49_s29]  }
  0x13   :  { %81 = vst.msk [vmem:[%s138_s1 + $0x8] sm:$0x3] %vm46_vm1, %v50_v17  }
  0x1a   :  { %67 = vrot.lane.b32.xlu0 %v66_v16, %s84_s0 }
  0x84   :  { %v61_v18 = vpop.permute.xlu0 %60  }
  0x85   :  { %63 = vst.msk [vmem:[%s138_s1] sm:$0xff] %vm62_vm2, %v61_v18  }
  0x8c   :  { %v68_v19 = vpop.permute.xlu0 %67  }
  0x8d   :  { %82 = vst.msk [vmem:[%s138_s1 + $0x8] sm:$0x3] %vm62_vm2, %v68_v19  }

// kernel: depthwise_separable_cnn.1
= control target key start
LH: loop header
LB: loop body
LE: loop exit
PB: predicated region body
PF: predicated region fallthrough
CT: control target
= control target key end

     0   :  { %vm170_vm0 = vcmask 392192   ;;  %vm861_vm1 = vcmask 195584   ;;  %vm1127_vm2 = vcmask 523264   ;;  %vm2154_vm3 = vcmask 261120   ;;  %s6292_s0 = inlined_call_operand.vmem [shape: f32[128,48], index: 0, kind: input, shape index: {}]   ;;  %s6293_s1 = inlined_call_operand.vmem [shape: f32[3,64,128], index: 1, kind: input, shape index: {}]   ;;  %s6294_s2 = inlined_call_operand.vmem [shape: f32[3,48,24], index: 2, kind: input, shape index: {}]   ;;  %s6295_s4 = inlined_call_operand.vmem [shape: f32[24,256], index: 4, kind: input, shape index: {}]   ;;  %s6296_s3 = inlined_call_operand.vmem [shape: f32[10,24], index: 3, kind: input, shape index: {}]   ;;  %s6297_s7 = inlined_call_operand.vmem [shape: f32[3,256,128], index: 7, kind: input, shape index: {}]   ;;  %s6298_s5 = inlined_call_operand.vmem [shape: f32[1,256], index: 5, kind: input, shape index: {}]   ;;  %s6299_s6 = inlined_call_operand.vmem [shape: f32[3,32,64], index: 6, kind: input, shape index: {}]   ;;  %s6300_s9 = inlined_call_operand.vmem [shape: f32[128,256], index: 9, kind: input, shape index: {}]   ;;  %s6301_s8 = inlined_call_operand.vmem [shape: f32[10,128], index: 8, kind: input, shape index: {}]   ;;  %s6302_s12 = inlined_call_operand.vmem [shape: f32[3,256,128], index: 12, kind: input, shape index: {}]   ;;  %s6303_s10 = inlined_call_operand.vmem [shape: f32[1,256], index: 10, kind: input, shape index: {}]   ;;  %s6304_s11 = inlined_call_operand.vmem [shape: f32[3,16,32], index: 11, kind: input, shape index: {}]   ;;  %s6305_s13 = inlined_call_operand.vmem [shape: f32[10,128], index: 13, kind: input, shape index: {}]   ;;  %s6306_s14 = inlined_call_operand.vmem [shape: f32[128,256], index: 14, kind: input, shape index: {}]   ;;  %s6307_s17 = inlined_call_operand.vmem [shape: f32[256,128], index: 17, kind: input, shape index: {}]   ;;  %s6308_s15 = inlined_call_operand.vmem [shape: f32[1,256], index: 15, kind: input, shape index: {}]   ;;  %s6309_s16 = inlined_call_operand.vmem [shape: f32[8,16], index: 16, kind: input, shape index: {}]   ;;  %s6310_s18 = inlined_call_operand.vmem [shape: f32[1,128], index: 18, kind: input, shape index: {}]   ;;  %s6311_s19 = inlined_call_operand.vmem [shape: f32[8,128], index: 19, kind: output, shape index: {}]  }
   0x1   :  { %6515 = sst [smem:[#allocation68_spill]] %s6292_s0  ;;  %vm2829_vm4 = vcmask 130048  }
   0x2   :  { %6516 = sst [smem:[#allocation69_spill]] %s6293_s1 }
   0x3   :  { %6517 = sst [smem:[#allocation70_spill]] %s6294_s2 }
   0x4   :  { %6518 = sst [smem:[#allocation71_spill]] %s6295_s4 }
   0x5   :  { %s6519_s20 = sld [smem:[#allocation68_spill]] }
   0x6   :  { %s6520_s23 = sld [smem:[#allocation69_spill]] }
   0x7   :  { %s6521_s0 = sld [smem:[#allocation70_spill]] }
   0x8   :  { %s6522_s4 = sld [smem:[#allocation71_spill]] }
   0xb   :  { %v3190_v0 = vld [vmem:[%s6519_s20 + $0x78] sm:$0xff]  ;;  %v3195_v1 = vld [vmem:[%s6519_s20 + $0x70] sm:$0xff]  ;;  %v3201_v2 = vld [vmem:[%s6519_s20 + $0x68] sm:$0xff] }
   0xc   :  { %129 = vmatpush.msra.mxu0 %v3190_v0  ;;  %v3207_v3 = vld [vmem:[%s6519_s20 + $0x60] sm:$0xff]  ;;  %v3213_v4 = vld [vmem:[%s6519_s20 + $0x58] sm:$0xff]  ;;  %v3219_v5 = vld [vmem:[%s6519_s20 + $0x50] sm:$0xff] }
   0xd   :  { %v3225_v6 = vld [vmem:[%s6519_s20 + $0x48] sm:$0xff]  ;;  %v3231_v7 = vld [vmem:[%s6519_s20 + $0x40] sm:$0xff]  ;;  %v3237_v8 = vld [vmem:[%s6519_s20 + $0x38] sm:$0xff] }
   0xe   :  { %130 = vmatpush.msra.mxu0 %v3195_v1  ;;  %v3243_v9 = vld [vmem:[%s6519_s20 + $0x30] sm:$0xff]  ;;  %v3249_v10 = vld [vmem:[%s6519_s20 + $0x28] sm:$0xff]  ;;  %v3255_v11 = vld [vmem:[%s6519_s20 + $0x20] sm:$0xff] }
   0xf   :  { %v3261_v12 = vld [vmem:[%s6519_s20 + $0x18] sm:$0xff]  ;;  %v3267_v13 = vld [vmem:[%s6519_s20 + $0x10] sm:$0xff]  ;;  %v3273_v14 = vld [vmem:[%s6519_s20 + $0x8] sm:$0xff] }
  0x10   :  { %131 = vmatpush.msra.mxu0 %v3201_v2  ;;  %v3279_v15 = vld [vmem:[%s6519_s20] sm:$0xff]  ;;  %v79_v17 = vld [vmem:[%s6520_s23 + $0x8] sm:$0xff]  ;;  %v80_v18 = vld [vmem:[%s6520_s23 + $0x10] sm:$0xff] }
  0x11   :  { %v78_v16 = vld [vmem:[%s6520_s23] sm:$0xff]  ;;  %v81_v19 = vld [vmem:[%s6520_s23 + $0x18] sm:$0xff]  ;;  %v3298_v20 = vld [vmem:[%s6521_s0 + $0x28] sm:$0xff] }
  0x12   :  { %132 = vmatpush.msra.mxu0 %v3207_v3  ;;  %v3303_v21 = vld [vmem:[%s6521_s0 + $0x58] sm:$0xff]  ;;  %v3308_v22 = vld [vmem:[%s6521_s0 + $0x88] sm:$0xff]  ;;  %205 = vmatpush.msra.mxu1 %v3298_v20  ;;  %v3315_v23 = vld [vmem:[%s6521_s0 + $0x20] sm:$0xff] }
  0x13   :  { %255 = vmatpush.msra.mxu2 %v3303_v21  ;;  %v3320_v24 = vld [vmem:[%s6521_s0 + $0x50] sm:$0xff]  ;;  %v3325_v25 = vld [vmem:[%s6521_s0 + $0x80] sm:$0xff]  ;;  %313 = vmatpush.msra.mxu3 %v3308_v22  ;;  %v3331_v26 = vld [vmem:[%s6521_s0 + $0x18] sm:$0xff] }
  0x14   :  { %133 = vmatpush.msra.mxu0 %v3213_v4  ;;  %v3336_v27 = vld [vmem:[%s6521_s0 + $0x48] sm:$0xff]  ;;  %206 = vmatpush.msra.mxu1 %v3315_v23  ;;  %v3344_v28 = vld [vmem:[%s6521_s0 + $0x78] sm:$0xff]  ;;  %v3350_v29 = vld [vmem:[%s6521_s0 + $0x10] sm:$0xff] }
  0x15   :  { %256 = vmatpush.msra.mxu2 %v3320_v24  ;;  %314 = vmatpush.msra.mxu3 %v3325_v25  ;;  %v3355_v30 = vld [vmem:[%s6521_s0 + $0x40] sm:$0xff]  ;;  %v3366_v32 = vld [vmem:[%s6521_s0 + $0x70] sm:$0xff]  ;;  %v3372_v33 = vld [vmem:[%s6521_s0 + $0x8] sm:$0xff] }
  0x16   :  { %134 = vmatpush.msra.mxu0 %v3219_v5  ;;  %v82_v31 = vld [vmem:[%s6520_s23 + $0x20] sm:$0xff]  ;;  %207 = vmatpush.msra.mxu1 %v3331_v26  ;;  %v3377_v34 = vld [vmem:[%s6521_s0 + $0x38] sm:$0xff]  ;;  %v3385_v35 = vld [vmem:[%s6521_s0 + $0x68] sm:$0xff] }
  0x17   :  { %257 = vmatpush.msra.mxu2 %v3336_v27  ;;  %315 = vmatpush.msra.mxu3 %v3344_v28  ;;  %v83_v36 = vld [vmem:[%s6520_s23 + $0x28] sm:$0xff]  ;;  %v84_v37 = vld [vmem:[%s6520_s23 + $0x30] sm:$0xff]  ;;  %v85_v38 = vld [vmem:[%s6520_s23 + $0x38] sm:$0xff] }
  0x18   :  { %135 = vmatpush.msra.mxu0 %v3225_v6  ;;  %208 = vmatpush.msra.mxu1 %v3350_v29  ;;  %v3405_v39 = vld [vmem:[%s6521_s0] sm:$0xff]  ;;  %v3410_v40 = vld [vmem:[%s6521_s0 + $0x30] sm:$0xff]  ;;  %v87_v51 = vld [vmem:[%s6520_s23 + $0x48] sm:$0xff] }
  0x19   :  { %258 = vmatpush.msra.mxu2 %v3355_v30  ;;  %316 = vmatpush.msra.mxu3 %v3366_v32  ;;  %v3415_v41 = vld [vmem:[%s6521_s0 + $0x60] sm:$0xff]  ;;  %v88_v52 = vld [vmem:[%s6520_s23 + $0x50] sm:$0xff]  ;;  %v89_v53 = vld [vmem:[%s6520_s23 + $0x58] sm:$0xff] }
  0x1a   :  { %136 = vmatpush.msra.mxu0 %v3231_v7  ;;  %209 = vmatpush.msra.mxu1 %v3372_v33  ;;  %v86_v50 = vld [vmem:[%s6520_s23 + $0x40] sm:$0xff]  ;;  %v91_v55 = vld [vmem:[%s6520_s23 + $0x68] sm:$0xff]  ;;  %v92_v56 = vld [vmem:[%s6520_s23 + $0x70] sm:$0xff] }
  0x1b   :  { %259 = vmatpush.msra.mxu2 %v3377_v34  ;;  %317 = vmatpush.msra.mxu3 %v3385_v35  ;;  %v90_v54 = vld [vmem:[%s6520_s23 + $0x60] sm:$0xff]  ;;  %v93_v57 = vld [vmem:[%s6520_s23 + $0x78] sm:$0xff]  ;;  %v95_v61 = vld [vmem:[%s6520_s23 + $0x88] sm:$0xff] }
  0x1c   :  { %137 = vmatpush.msra.mxu0 %v3237_v8  ;;  %210 = vmatpush.msra.mxu1 %v3405_v39  ;;  %v94_v59 = vld [vmem:[%s6520_s23 + $0x80] sm:$0xff]  ;;  %v96_v63 = vld [vmem:[%s6520_s23 + $0x90] sm:$0xff] }
  0x1d   :  { %260 = vmatpush.msra.mxu2 %v3410_v40  ;;  %318 = vmatpush.msra.mxu3 %v3415_v41 }
  0x1e   :  { %138 = vmatpush.msra.mxu0 %v3243_v9  ;;  %361 = vmatpush.msrb.mxu1 %v3190_v0 }
  0x1f   :  { %436 = vmatpush.msrb.mxu2 %v3298_v20  ;;  %494 = vmatpush.msrb.mxu3 %v3303_v21 }
  0x20   :  { %139 = vmatpush.msra.mxu0 %v3249_v10  ;;  %362 = vmatpush.msrb.mxu1 %v3195_v1 }
  0x21   :  { %437 = vmatpush.msrb.mxu2 %v3315_v23  ;;  %495 = vmatpush.msrb.mxu3 %v3320_v24 }
  0x22   :  { %140 = vmatpush.msra.mxu0 %v3255_v11  ;;  %363 = vmatpush.msrb.mxu1 %v3201_v2 }
  0x23   :  { %438 = vmatpush.msrb.mxu2 %v3331_v26  ;;  %496 = vmatpush.msrb.mxu3 %v3336_v27 }
  0x24   :  { %141 = vmatpush.msra.mxu0 %v3261_v12  ;;  %364 = vmatpush.msrb.mxu1 %v3207_v3 }
  0x25   :  { %439 = vmatpush.msrb.mxu2 %v3350_v29  ;;  %497 = vmatpush.msrb.mxu3 %v3355_v30 }
  0x26   :  { %142 = vmatpush.msra.mxu0 %v3267_v13  ;;  %365 = vmatpush.msrb.mxu1 %v3213_v4 }
  0x27   :  { %440 = vmatpush.msrb.mxu2 %v3372_v33  ;;  %498 = vmatpush.msrb.mxu3 %v3377_v34 }
  0x28   :  { %143 = vmatpush.msra.mxu0 %v3273_v14  ;;  %366 = vmatpush.msrb.mxu1 %v3219_v5 }
  0x29   :  { %441 = vmatpush.msrb.mxu2 %v3405_v39  ;;  %499 = vmatpush.msrb.mxu3 %v3410_v40 }
  0x2a   :  { %144 = vmatpush.msra.mxu0 %v3279_v15  ;;  %367 = vmatpush.msrb.mxu1 %v3225_v6 }
  0x2b   :  { %145 = vmatmul.f32.vlgmr.msra.gmra.mxu0 %v78_v16 }
  0x2c   :  { %552 = vmatpush.msrb.mxu0 %v3308_v22  ;;  %368 = vmatpush.msrb.mxu1 %v3231_v7 }
  0x2e   :  { %553 = vmatpush.msrb.mxu0 %v3325_v25  ;;  %369 = vmatpush.msrb.mxu1 %v3237_v8 }
  0x30   :  { %554 = vmatpush.msrb.mxu0 %v3344_v28  ;;  %370 = vmatpush.msrb.mxu1 %v3243_v9 }
  0x32   :  { %555 = vmatpush.msrb.mxu0 %v3366_v32  ;;  %371 = vmatpush.msrb.mxu1 %v3249_v10 }
  0x33   :  { %148 = vmatmul.f32.gmra.mxu0 %v79_v17 }
  0x34   :  { %556 = vmatpush.msrb.mxu0 %v3385_v35  ;;  %372 = vmatpush.msrb.mxu1 %v3255_v11 }
  0x36   :  { %557 = vmatpush.msrb.mxu0 %v3415_v41  ;;  %373 = vmatpush.msrb.mxu1 %v3261_v12 }
  0x38   :  { %791 = vmatpush.msra.mxu0 %v3308_v22  ;;  %374 = vmatpush.msrb.mxu1 %v3267_v13 }
  0x3a   :  { %792 = vmatpush.msra.mxu0 %v3325_v25  ;;  %375 = vmatpush.msrb.mxu1 %v3273_v14 }
  0x3b   :  { %151 = vmatmul.f32.gmra.mxu0 %v80_v18 }
  0x3c   :  { %793 = vmatpush.msra.mxu0 %v3344_v28  ;;  %376 = vmatpush.msrb.mxu1 %v3279_v15 }
  0x3e   :  { %794 = vmatpush.msra.mxu0 %v3366_v32 }
  0x40   :  { %795 = vmatpush.msra.mxu0 %v3385_v35 }
  0x42   :  { %796 = vmatpush.msra.mxu0 %v3415_v41 }
  0x43   :  { %154 = vmatmul.f32.gmra.mxu0 %v81_v19 }
  0x4b   :  { %157 = vmatmul.f32.gmra.mxu0 %v82_v31 }
  0x53   :  { %160 = vmatmul.f32.gmra.mxu0 %v83_v36 }
  0x5b   :  { %163 = vmatmul.f32.gmra.mxu0 %v84_v37 }
  0x63   :  { %166 = vmatmul.f32.gmra.mxu0 %v85_v38 }
  0xa8   :  { %v146_v42 = vpop.f32.mrf.mxu0 }
  0xa9   :  { %2954 = vmatmul.msk.f32.vlgmr.msra.gmra.mxu1 %vm170_vm0, %v146_v42  ;;  %2962 = vmatmul.msk.f32.vlgmr.msra.gmra.mxu2 %vm170_vm0, %v146_v42 }
  0xaa   :  { %2970 = vmatmul.msk.f32.vlgmr.msra.gmra.mxu3 %vm170_vm0, %v146_v42  ;;  %600 = vmatpush.msra.mxu1 %v3190_v0 }
  0xab   :  { %675 = vmatpush.msra.mxu2 %v3298_v20  ;;  %733 = vmatpush.msra.mxu3 %v3303_v21 }
  0xac   :  { %601 = vmatpush.msra.mxu1 %v3195_v1  ;;  %v97_v1 = vld [vmem:[%s6520_s23 + $0x98] sm:$0xff] }
  0xad   :  { %676 = vmatpush.msra.mxu2 %v3315_v23  ;;  %734 = vmatpush.msra.mxu3 %v3320_v24 }
  0xae   :  { %602 = vmatpush.msra.mxu1 %v3201_v2 }
  0xaf   :  { %677 = vmatpush.msra.mxu2 %v3331_v26  ;;  %735 = vmatpush.msra.mxu3 %v3336_v27 }
  0xb0   :  { %v149_v43 = vpop.f32.mrf.mxu0  ;;  %603 = vmatpush.msra.mxu1 %v3207_v3  ;;  %v98_v3 = vld [vmem:[%s6520_s23 + $0xa0] sm:$0xff] }
  0xb1   :  { %2955 = vmatmul.msk.f32.gmra.mxu1 %vm170_vm0, %v149_v43  ;;  %2963 = vmatmul.msk.f32.gmra.mxu2 %vm170_vm0, %v149_v43 }
  0xb2   :  { %2971 = vmatmul.msk.f32.gmra.mxu3 %vm170_vm0, %v149_v43  ;;  %604 = vmatpush.msra.mxu1 %v3213_v4 }
  0xb3   :  { %678 = vmatpush.msra.mxu2 %v3350_v29  ;;  %736 = vmatpush.msra.mxu3 %v3355_v30 }
  0xb4   :  { %605 = vmatpush.msra.mxu1 %v3219_v5  ;;  %v99_v5 = vld [vmem:[%s6520_s23 + $0xa8] sm:$0xff] }
  0xb5   :  { %679 = vmatpush.msra.mxu2 %v3372_v33  ;;  %737 = vmatpush.msra.mxu3 %v3377_v34 }
  0xb6   :  { %606 = vmatpush.msra.mxu1 %v3225_v6 }
  0xb7   :  { %680 = vmatpush.msra.mxu2 %v3405_v39  ;;  %738 = vmatpush.msra.mxu3 %v3410_v40 }
  0xb8   :  { %v152_v44 = vpop.f32.mrf.mxu0  ;;  %607 = vmatpush.msra.mxu1 %v3231_v7  ;;  %v100_v7 = vld [vmem:[%s6520_s23 + $0xb0] sm:$0xff] }
  0xb9   :  { %2956 = vmatmul.msk.f32.gmra.mxu1 %vm170_vm0, %v152_v44  ;;  %2964 = vmatmul.msk.f32.gmra.mxu2 %vm170_vm0, %v152_v44 }
  0xba   :  { %2972 = vmatmul.msk.f32.gmra.mxu3 %vm170_vm0, %v152_v44  ;;  %608 = vmatpush.msra.mxu1 %v3237_v8 }
  0xbc   :  { %609 = vmatpush.msra.mxu1 %v3243_v9  ;;  %v101_v9 = vld [vmem:[%s6520_s23 + $0xb8] sm:$0xff] }
  0xbe   :  { %610 = vmatpush.msra.mxu1 %v3249_v10 }
  0xc0   :  { %v155_v45 = vpop.f32.mrf.mxu0  ;;  %611 = vmatpush.msra.mxu1 %v3255_v11 }
  0xc1   :  { %2957 = vmatmul.msk.f32.gmra.mxu1 %vm170_vm0, %v155_v45  ;;  %2965 = vmatmul.msk.f32.gmra.mxu2 %vm170_vm0, %v155_v45 }
  0xc2   :  { %2973 = vmatmul.msk.f32.gmra.mxu3 %vm170_vm0, %v155_v45  ;;  %612 = vmatpush.msra.mxu1 %v3261_v12 }
  0xc4   :  { %613 = vmatpush.msra.mxu1 %v3267_v13 }
  0xc6   :  { %614 = vmatpush.msra.mxu1 %v3273_v14 }
  0xc8   :  { %v158_v46 = vpop.f32.mrf.mxu0  ;;  %615 = vmatpush.msra.mxu1 %v3279_v15 }
  0xc9   :  { %2958 = vmatmul.msk.f32.gmra.mxu1 %vm170_vm0, %v158_v46  ;;  %2966 = vmatmul.msk.f32.gmra.mxu2 %vm170_vm0, %v158_v46 }
  0xca   :  { %2974 = vmatmul.msk.f32.gmra.mxu3 %vm170_vm0, %v158_v46 }
  0xd0   :  { %v161_v47 = vpop.f32.mrf.mxu0 }
  0xd1   :  { %2959 = vmatmul.msk.f32.gmra.mxu1 %vm170_vm0, %v161_v47  ;;  %2967 = vmatmul.msk.f32.gmra.mxu2 %vm170_vm0, %v161_v47 }
  0xd2   :  { %2975 = vmatmul.msk.f32.gmra.mxu3 %vm170_vm0, %v161_v47 }
  0xd8   :  { %v164_v48 = vpop.f32.mrf.mxu0 }
  0xd9   :  { %2960 = vmatmul.msk.f32.gmra.mxu1 %vm170_vm0, %v164_v48  ;;  %2968 = vmatmul.msk.f32.gmra.mxu2 %vm170_vm0, %v164_v48 }
  0xda   :  { %2976 = vmatmul.msk.f32.gmra.mxu3 %vm170_vm0, %v164_v48 }
  0xe0   :  { %v167_v49 = vpop.f32.mrf.mxu0 }
  0xe1   :  { %2961 = vmatmul.msk.f32.gmra.mxu1 %vm170_vm0, %v167_v49  ;;  %2969 = vmatmul.msk.f32.gmra.mxu2 %vm170_vm0, %v167_v49 }
  0xe2   :  { %2977 = vmatmul.msk.f32.gmra.mxu3 %vm170_vm0, %v167_v49 }
  0xe9   :  { %377 = vmatmul.f32.vlgmr.msrb.gmra.mxu1 %v86_v50 }
  0xea   :  { %3080 = vmatpush.msrb.mxu1 %v3308_v22 }
  0xec   :  { %3081 = vmatpush.msrb.mxu1 %v3325_v25 }
  0xee   :  { %3082 = vmatpush.msrb.mxu1 %v3344_v28 }
  0xf0   :  { %3083 = vmatpush.msrb.mxu1 %v3366_v32 }
  0xf1   :  { %380 = vmatmul.f32.gmra.mxu1 %v87_v51 }
  0xf2   :  { %3084 = vmatpush.msrb.mxu1 %v3385_v35 }
  0xf4   :  { %3085 = vmatpush.msrb.mxu1 %v3415_v41 }
  0xf9   :  { %383 = vmatmul.f32.gmra.mxu1 %v88_v52 }
 0x101   :  { %386 = vmatmul.f32.gmra.mxu1 %v89_v53 }
 0x109   :  { %389 = vmatmul.f32.gmra.mxu1 %v90_v54 }
 0x111   :  { %392 = vmatmul.f32.gmra.mxu1 %v91_v55  ;;  %v127_v55 = vld [vmem:[%s6522_s4 + $0x28] sm:$0xff] }
 0x119   :  { %395 = vmatmul.f32.gmra.mxu1 %v92_v56 }
 0x121   :  { %398 = vmatmul.f32.gmra.mxu1 %v93_v57 }
 0x126   :  { %v3537_v58 = vpop.f32.mrf.mxu1 }
 0x129   :  { %616 = vmatmul.f32.vlgmr.msra.gmra.mxu1 %v94_v59 }
 0x12c   :  { %v3598_v17 = vpop.f32.mrf.mxu2 }
 0x12d   :  { %v3600_v18 = vpop.f32.mrf.mxu3 }
 0x12e   :  { %v3542_v60 = vpop.f32.mrf.mxu1 }
 0x131   :  { %619 = vmatmul.f32.gmra.mxu1 %v95_v61 }
 0x134   :  { %v3605_v20 = vpop.f32.mrf.mxu2 }
 0x135   :  { %v3607_v21 = vpop.f32.mrf.mxu3 }
 0x136   :  { %v3547_v62 = vpop.f32.mrf.mxu1 }
 0x139   :  { %622 = vmatmul.f32.gmra.mxu1 %v96_v63 }
 0x13c   :  { %v3612_v24 = vpop.f32.mrf.mxu2 }
 0x13d   :  { %v3616_v25 = vpop.f32.mrf.mxu3 }
 0x13e   :  { %v3552_v0 = vpop.f32.mrf.mxu1 }
 0x141   :  { %625 = vmatmul.f32.gmra.mxu1 %v97_v1  ;;  %v126_v1 = vld [vmem:[%s6522_s4 + $0x20] sm:$0xff] }
 0x142   :  { %899 = vmatpush.msra.mxu1 %v126_v1 }
 0x144   :  { %v3622_v27 = vpop.f32.mrf.mxu2 }
 0x145   :  { %v3624_v28 = vpop.f32.mrf.mxu3 }
 0x146   :  { %v3557_v2 = vpop.f32.mrf.mxu1 }
 0x149   :  { %628 = vmatmul.f32.gmra.mxu1 %v98_v3  ;;  %v120_v3 = vld [vmem:[%s6296_s3] sm:$0xff] }
 0x14c   :  { %v3629_v30 = vpop.f32.mrf.mxu2 }
 0x14d   :  { %v3631_v31 = vpop.f32.mrf.mxu3 }
 0x14e   :  { %v3562_v4 = vpop.f32.mrf.mxu1 }
 0x151   :  { %631 = vmatmul.f32.gmra.mxu1 %v99_v5  ;;  %v124_v5 = vld [vmem:[%s6522_s4 + $0x10] sm:$0xff] }
 0x152   :  { %900 = vmatpush.msra.mxu1 %v124_v5 }
 0x154   :  { %v3636_v33 = vpop.f32.mrf.mxu2 }
 0x155   :  { %v3638_v34 = vpop.f32.mrf.mxu3 }
 0x156   :  { %v3567_v6 = vpop.f32.mrf.mxu1 }
 0x159   :  { %634 = vmatmul.f32.gmra.mxu1 %v100_v7  ;;  %v125_v7 = vld [vmem:[%s6522_s4 + $0x18] sm:$0xff] }
 0x15c   :  { %v3645_v37 = vpop.f32.mrf.mxu2 }
 0x15d   :  { %v3647_v38 = vpop.f32.mrf.mxu3 }
 0x15e   :  { %v3572_v8 = vpop.f32.mrf.mxu1 }
 0x161   :  { %637 = vmatmul.f32.gmra.mxu1 %v101_v9  ;;  %v3702_v9 = vperm.slane %v120_v3, 1 }
 0x164   :  { %v3653_v40 = vpop.f32.mrf.mxu2 }
 0x165   :  { %v3655_v41 = vpop.f32.mrf.mxu3 }
 0x166   :  { %v378_v10 = vpop.f32.mrf.mxu1 }
 0x167   :  { %2978 = vmatmul.msk.f32.vlgmr.msrb.gmra.mxu2 %vm170_vm0, %v378_v10  ;;  %2986 = vmatmul.msk.f32.vlgmr.msrb.gmra.mxu3 %vm170_vm0, %v378_v10 }
 0x168   :  { %2994 = vmatmul.msk.f32.vlgmr.msrb.gmra.mxu0 %vm170_vm0, %v378_v10  ;;  %940 = vmatpush.msrb.mxu2 %v127_v55 }
 0x16a   :  { %941 = vmatpush.msrb.mxu2 %v125_v7 }
 0x16e   :  { %v381_v11 = vpop.f32.mrf.mxu1 }
 0x16f   :  { %2979 = vmatmul.msk.f32.gmra.mxu2 %vm170_vm0, %v381_v11  ;;  %2987 = vmatmul.msk.f32.gmra.mxu3 %vm170_vm0, %v381_v11 }
 0x170   :  { %2995 = vmatmul.msk.f32.gmra.mxu0 %vm170_vm0, %v381_v11  ;;  %v122_v11 = vld [vmem:[%s6522_s4] sm:$0xff] }
 0x171   :  { %901 = vmatpush.msra.mxu1 %v122_v11  ;;  %v3741_v11 = vperm.slane %v120_v3, 5 }
 0x176   :  { %v384_v12 = vpop.f32.mrf.mxu1 }
 0x177   :  { %2980 = vmatmul.msk.f32.gmra.mxu2 %vm170_vm0, %v384_v12  ;;  %2988 = vmatmul.msk.f32.gmra.mxu3 %vm170_vm0, %v384_v12 }
 0x178   :  { %2996 = vmatmul.msk.f32.gmra.mxu0 %vm170_vm0, %v384_v12  ;;  %v123_v12 = vld [vmem:[%s6522_s4 + $0x8] sm:$0xff] }
 0x179   :  { %942 = vmatpush.msrb.mxu2 %v123_v12 }
 0x17e   :  { %v387_v13 = vpop.f32.mrf.mxu1 }
 0x17f   :  { %2981 = vmatmul.msk.f32.gmra.mxu2 %vm170_vm0, %v387_v13  ;;  %2989 = vmatmul.msk.f32.gmra.mxu3 %vm170_vm0, %v387_v13 }
 0x180   :  { %2997 = vmatmul.msk.f32.gmra.mxu0 %vm170_vm0, %v387_v13  ;;  %v3712_v13 = vperm.slane %v120_v3, 0 }
 0x182   :  { %v238_v1 = vmul.f32 %v3712_v13, %v3542_v60  ;;  %v121_v60 = vld [vmem:[%s6296_s3 + $0x8] sm:$0x3] }
 0x186   :  { %v390_v14 = vpop.f32.mrf.mxu1 }
 0x187   :  { %2982 = vmatmul.msk.f32.gmra.mxu2 %vm170_vm0, %v390_v14  ;;  %2990 = vmatmul.msk.f32.gmra.mxu3 %vm170_vm0, %v390_v14 }
 0x188   :  { %2998 = vmatmul.msk.f32.gmra.mxu0 %vm170_vm0, %v390_v14  ;;  %v287_v14 = vmul.f32 %v3702_v9, %v3598_v17 }
 0x18e   :  { %v393_v15 = vpop.f32.mrf.mxu1 }
 0x18f   :  { %2983 = vmatmul.msk.f32.gmra.mxu2 %vm170_vm0, %v393_v15  ;;  %2991 = vmatmul.msk.f32.gmra.mxu3 %vm170_vm0, %v393_v15 }
 0x190   :  { %2999 = vmatmul.msk.f32.gmra.mxu0 %vm170_vm0, %v393_v15 }
 0x196   :  { %v396_v16 = vpop.f32.mrf.mxu1 }
 0x197   :  { %2984 = vmatmul.msk.f32.gmra.mxu2 %vm170_vm0, %v396_v16  ;;  %2992 = vmatmul.msk.f32.gmra.mxu3 %vm170_vm0, %v396_v16 }
 0x198   :  { %3000 = vmatmul.msk.f32.gmra.mxu0 %vm170_vm0, %v396_v16 }
 0x19e   :  { %v399_v19 = vpop.f32.mrf.mxu1 }
 0x19f   :  { %2985 = vmatmul.msk.f32.gmra.mxu2 %vm170_vm0, %v399_v19  ;;  %2993 = vmatmul.msk.f32.gmra.mxu3 %vm170_vm0, %v399_v19 }
 0x1a0   :  { %3001 = vmatmul.msk.f32.gmra.mxu0 %vm170_vm0, %v399_v19  ;;  %v237_v19 = vmul.f32 %v3712_v13, %v3537_v58 }
 0x1a6   :  { %v617_v22 = vpop.f32.mrf.mxu1 }
 0x1a7   :  { %3002 = vmatmul.msk.f32.vlgmr.msra.gmra.mxu2 %vm170_vm0, %v617_v22  ;;  %3010 = vmatmul.msk.f32.vlgmr.msra.gmra.mxu3 %vm170_vm0, %v617_v22 }
 0x1a8   :  { %3018 = vmatmul.msk.f32.vlgmr.msra.gmra.mxu0 %vm170_vm0, %v617_v22  ;;  %v3722_v22 = vperm.slane %v120_v3, 2 }
 0x1aa   :  { %v346_v12 = vmul.f32 %v3722_v22, %v3607_v21  ;;  %v239_v21 = vmul.f32 %v3712_v13, %v3547_v62 }
 0x1ae   :  { %v620_v23 = vpop.f32.mrf.mxu1 }
 0x1af   :  { %3003 = vmatmul.msk.f32.gmra.mxu2 %vm170_vm0, %v620_v23  ;;  %3011 = vmatmul.msk.f32.gmra.mxu3 %vm170_vm0, %v620_v23 }
 0x1b0   :  { %3019 = vmatmul.msk.f32.gmra.mxu0 %vm170_vm0, %v620_v23  ;;  %v3724_v23 = vperm.slane %v120_v3, 3 }
 0x1b6   :  { %v623_v26 = vpop.f32.mrf.mxu1 }
 0x1b7   :  { %3004 = vmatmul.msk.f32.gmra.mxu2 %vm170_vm0, %v623_v26  ;;  %3012 = vmatmul.msk.f32.gmra.mxu3 %vm170_vm0, %v623_v26 }
 0x1b8   :  { %3020 = vmatmul.msk.f32.gmra.mxu0 %vm170_vm0, %v623_v26  ;;  %v295_v26 = vadd.f32 %v287_v14, %v237_v19  ;;  %v3747_v19 = vperm.slane %v120_v3, 6 }
 0x1be   :  { %v626_v29 = vpop.f32.mrf.mxu1 }
 0x1bf   :  { %3005 = vmatmul.msk.f32.gmra.mxu2 %vm170_vm0, %v626_v29  ;;  %3013 = vmatmul.msk.f32.gmra.mxu3 %vm170_vm0, %v626_v29 }
 0x1c0   :  { %3021 = vmatmul.msk.f32.gmra.mxu0 %vm170_vm0, %v626_v29 }
 0x1c6   :  { %v629_v32 = vpop.f32.mrf.mxu1 }
 0x1c7   :  { %3006 = vmatmul.msk.f32.gmra.mxu2 %vm170_vm0, %v629_v32  ;;  %3014 = vmatmul.msk.f32.gmra.mxu3 %vm170_vm0, %v629_v32 }
 0x1c8   :  { %3022 = vmatmul.msk.f32.gmra.mxu0 %vm170_vm0, %v629_v32  ;;  %v345_v32 = vmul.f32 %v3722_v22, %v3600_v18 }
 0x1ca   :  { %v353_v17 = vadd.f32 %v345_v32, %v295_v26  ;;  %v289_v26 = vmul.f32 %v3702_v9, %v3612_v24 }
 0x1ce   :  { %v632_v35 = vpop.f32.mrf.mxu1 }
 0x1cf   :  { %3007 = vmatmul.msk.f32.gmra.mxu2 %vm170_vm0, %v632_v35  ;;  %3015 = vmatmul.msk.f32.gmra.mxu3 %vm170_vm0, %v632_v35 }
 0x1d0   :  { %3023 = vmatmul.msk.f32.gmra.mxu0 %vm170_vm0, %v632_v35 }
 0x1d6   :  { %v635_v36 = vpop.f32.mrf.mxu1 }
 0x1d7   :  { %3008 = vmatmul.msk.f32.gmra.mxu2 %vm170_vm0, %v635_v36  ;;  %3016 = vmatmul.msk.f32.gmra.mxu3 %vm170_vm0, %v635_v36 }
 0x1d8   :  { %3024 = vmatmul.msk.f32.gmra.mxu0 %vm170_vm0, %v635_v36  ;;  %v288_v36 = vmul.f32 %v3702_v9, %v3605_v20 }
 0x1da   :  { %v296_v7 = vadd.f32 %v288_v36, %v238_v1  ;;  %v3760_v1 = vperm.slane %v121_v60, 0 }
 0x1dc   :  { %v354_v32 = vadd.f32 %v346_v12, %v296_v7 }
 0x1de   :  { %v638_v39 = vpop.f32.mrf.mxu1 }
 0x1df   :  { %3009 = vmatmul.msk.f32.gmra.mxu2 %vm170_vm0, %v638_v39  ;;  %3017 = vmatmul.msk.f32.gmra.mxu3 %vm170_vm0, %v638_v39 }
 0x1e0   :  { %3025 = vmatmul.msk.f32.vlgmr.msrb.gmra.mxu1 %vm170_vm0, %v638_v39  ;;  %v3733_v39 = vperm.slane %v120_v3, 4 }
 0x1e5   :  { %v3657_v42 = vpop.f32.mrf.mxu0 }
 0x1ea   :  { %v443_v43 = vpop.f32.mrf.mxu2  ;;  %v501_v44 = vpop.f32.mrf.mxu3 }
 0x1eb   :  { %v468_v35 = vmul.f32 %v3724_v23, %v443_v43  ;;  %v526_v18 = vmul.f32 %v3733_v39, %v501_v44  ;;  %v584_v44 = vmul.f32 %v3741_v11, %v3657_v42 }
 0x1ed   :  { %v3659_v45 = vpop.f32.mrf.mxu0  ;;  %v476_v5 = vadd.f32 %v468_v35, %v353_v17  ;;  %v3756_v35 = vperm.slane %v120_v3, 7 }
 0x1ef   :  { %v534_v20 = vadd.f32 %v526_v18, %v476_v5  ;;  %v297_v18 = vadd.f32 %v289_v26, %v239_v21  ;;  %v585_v21 = vmul.f32 %v3741_v11, %v3659_v45 }
 0x1f1   :  { %v592_v5 = vadd.f32 %v584_v44, %v534_v20  ;;  %v3771_v20 = vperm.slane %v121_v60, 1 }
 0x1f2   :  { %v446_v46 = vpop.f32.mrf.mxu2  ;;  %v3661_v47 = vpop.f32.mrf.mxu3 }
 0x1f3   :  { %v469_v14 = vmul.f32 %v3724_v23, %v446_v46  ;;  %v527_v7 = vmul.f32 %v3733_v39, %v3661_v47  ;;  %v290_v47 = vmul.f32 %v3702_v9, %v3622_v27 }
 0x1f5   :  { %v3663_v48 = vpop.f32.mrf.mxu0  ;;  %v477_v36 = vadd.f32 %v469_v14, %v354_v32 }
 0x1f7   :  { %v535_v14 = vadd.f32 %v527_v7, %v477_v36 }
 0x1fa   :  { %v3665_v49 = vpop.f32.mrf.mxu2  ;;  %v3667_v50 = vpop.f32.mrf.mxu3 }
 0x1fb   :  { %v470_v62 = vmul.f32 %v3724_v23, %v3665_v49  ;;  %v240_v49 = vmul.f32 %v3712_v13, %v3552_v0 }
 0x1fd   :  { %v3669_v51 = vpop.f32.mrf.mxu0  ;;  %v298_v27 = vadd.f32 %v290_v47, %v240_v49 }
 0x202   :  { %v3671_v52 = vpop.f32.mrf.mxu2  ;;  %v3673_v53 = vpop.f32.mrf.mxu3 }
 0x203   :  { %v471_v0 = vmul.f32 %v3724_v23, %v3671_v52 }
 0x205   :  { %v3675_v54 = vpop.f32.mrf.mxu0 }
 0x20a   :  { %v3680_v56 = vpop.f32.mrf.mxu2  ;;  %v3682_v57 = vpop.f32.mrf.mxu3 }
 0x20d   :  { %v3684_v59 = vpop.f32.mrf.mxu0 }
 0x212   :  { %v3686_v61 = vpop.f32.mrf.mxu2  ;;  %v3688_v63 = vpop.f32.mrf.mxu3 }
 0x215   :  { %v3704_v10 = vpop.f32.mrf.mxu0 }
 0x21a   :  { %v3716_v15 = vpop.f32.mrf.mxu2  ;;  %v3718_v16 = vpop.f32.mrf.mxu3 }
 0x21d   :  { %v3726_v29 = vpop.f32.mrf.mxu0 }
 0x21e   :  { %6523 = vst [vmem:[#allocation2_spill] sm:$0xff] %v3726_v29  ;;  %v347_v29 = vmul.f32 %v3722_v22, %v3616_v25 }
 0x220   :  { %v355_v26 = vadd.f32 %v347_v29, %v297_v18  ;;  %v528_v29 = vmul.f32 %v3733_v39, %v3667_v50  ;;  %v291_v50 = vmul.f32 %v3702_v9, %v3629_v30  ;;  %v529_v30 = vmul.f32 %v3733_v39, %v3673_v53 }
 0x222   :  { %v3735_v55 = vpop.f32.mrf.mxu2  ;;  %v3737_v58 = vpop.f32.mrf.mxu3 }
 0x225   :  { %v798_v43 = vpop.f32.mrf.mxu0 }
 0x226   :  { %v823_v32 = vmul.f32 %v3760_v1, %v798_v43  ;;  %v593_v43 = vadd.f32 %v585_v21, %v535_v14 }
 0x22a   :  { %v682_v17 = vpop.f32.mrf.mxu2  ;;  %v740_v46 = vpop.f32.mrf.mxu3 }
 0x22b   :  { %v707_v24 = vmul.f32 %v3747_v19, %v682_v17  ;;  %v765_v42 = vmul.f32 %v3756_v35, %v740_v46  ;;  %v478_v46 = vadd.f32 %v470_v62, %v355_v26 }
 0x22d   :  { %v715_v12 = vadd.f32 %v707_v24, %v592_v5  ;;  %v801_v3 = vpop.f32.mrf.mxu0 }
 0x22e   :  { %v824_v62 = vmul.f32 %v3760_v1, %v801_v3 }
 0x22f   :  { %v773_v44 = vadd.f32 %v765_v42, %v715_v12  ;;  %v348_v12 = vmul.f32 %v3722_v22, %v3624_v28  ;;  %v536_v42 = vadd.f32 %v528_v29, %v478_v46  ;;  %v241_v28 = vmul.f32 %v3712_v13, %v3557_v2 }
 0x230   :  { %v349_v2 = vmul.f32 %v3722_v22, %v3631_v31 }
 0x231   :  { %v831_v17 = vadd.f32 %v823_v32, %v773_v44  ;;  %v356_v32 = vadd.f32 %v348_v12, %v298_v27  ;;  %v586_v44 = vmul.f32 %v3741_v11, %v3663_v48 }
 0x232   :  { %v685_v5 = vpop.f32.mrf.mxu2  ;;  %v743_v25 = vpop.f32.mrf.mxu3 }
 0x233   :  { %v840_v36 = vadd.f32 %v3771_v20, %v831_v17  ;;  %v708_v60 = vmul.f32 %v3747_v19, %v685_v5  ;;  %v766_v45 = vmul.f32 %v3756_v35, %v743_v25  ;;  %v479_v21 = vadd.f32 %v471_v0, %v356_v32 }
 0x234   :  { %v594_v17 = vadd.f32 %v586_v44, %v536_v42  ;;  %v299_v5 = vadd.f32 %v291_v50, %v241_v28  ;;  %v350_v44 = vmul.f32 %v3722_v22, %v3638_v34 }
 0x235   :  { %v848_v24 = vmax.f32 %v840_v36, 0.0  ;;  %v716_v18 = vadd.f32 %v708_v60, %v593_v43  ;;  %v804_v7 = vpop.f32.mrf.mxu0  ;;  %v472_v43 = vmul.f32 %v3724_v23, %v3680_v56  ;;  %v537_v60 = vadd.f32 %v529_v30, %v479_v21 }
 0x236   :  { %v825_v29 = vmul.f32 %v3760_v1, %v804_v7  ;;  %v357_v53 = vadd.f32 %v349_v2, %v299_v5  ;;  %v242_v56 = vmul.f32 %v3712_v13, %v3562_v4  ;;  %v473_v4 = vmul.f32 %v3724_v23, %v3686_v61 }
 0x237   :  { %v774_v14 = vadd.f32 %v766_v45, %v716_v18  ;;  %3026 = vmatmul.msk.f32.vlgmr.msra.gmra.mxu1 %vm861_vm1, %v848_v24  ;;  %3034 = vmatmul.msk.f32.vlgmr.msrb.gmra.mxu2 %vm861_vm1, %v848_v24  ;;  %v292_v24 = vmul.f32 %v3702_v9, %v3636_v33  ;;  %v587_v18 = vmul.f32 %v3741_v11, %v3669_v51 }
 0x238   :  { %v480_v31 = vadd.f32 %v472_v43, %v357_v53  ;;  %v351_v43 = vmul.f32 %v3722_v22, %v3647_v38 }
 0x239   :  { %v832_v26 = vadd.f32 %v824_v62, %v774_v14  ;;  %v595_v0 = vadd.f32 %v587_v18, %v537_v60  ;;  %v530_v14 = vmul.f32 %v3733_v39, %v3682_v57  ;;  %v300_v50 = vadd.f32 %v292_v24, %v242_v56 }
 0x23a   :  { %v688_v47 = vpop.f32.mrf.mxu2  ;;  %v746_v52 = vpop.f32.mrf.mxu3  ;;  %v293_v57 = vmul.f32 %v3702_v9, %v3645_v37  ;;  %v531_v37 = vmul.f32 %v3733_v39, %v3688_v63  ;;  %v294_v63 = vmul.f32 %v3702_v9, %v3653_v40  ;;  %v589_v24 = vmul.f32 %v3741_v11, %v3684_v59 }
 0x23b   :  { %v841_v3 = vadd.f32 %v3771_v20, %v832_v26  ;;  %v709_v46 = vmul.f32 %v3747_v19, %v688_v47  ;;  %v767_v49 = vmul.f32 %v3756_v35, %v746_v52  ;;  %v538_v26 = vadd.f32 %v530_v14, %v480_v31 }
 0x23c   :  { %v358_v21 = vadd.f32 %v350_v44, %v300_v50  ;;  %v352_v14 = vmul.f32 %v3722_v22, %v3655_v41 }
 0x23d   :  { %v717_v25 = vadd.f32 %v709_v46, %v594_v17  ;;  %v807_v48 = vpop.f32.mrf.mxu0  ;;  %v849_v36 = vmax.f32 %v841_v3, 0.0  ;;  %v588_v3 = vmul.f32 %v3741_v11, %v3675_v54  ;;  %v243_v17 = vmul.f32 %v3712_v13, %v3567_v6 }
 0x23e   :  { %v826_v28 = vmul.f32 %v3760_v1, %v807_v48  ;;  %v481_v5 = vadd.f32 %v473_v4, %v358_v21  ;;  %v474_v6 = vmul.f32 %v3724_v23, %v3716_v15 }
 0x23f   :  { %v775_v27 = vadd.f32 %v767_v49, %v717_v25  ;;  %3027 = vmatmul.msk.f32.gmra.mxu1 %vm861_vm1, %v849_v36  ;;  %3035 = vmatmul.msk.f32.gmra.mxu2 %vm861_vm1, %v849_v36  ;;  %v596_v25 = vadd.f32 %v588_v3, %v538_v26  ;;  %v301_v48 = vadd.f32 %v293_v57, %v243_v17 }
 0x240   :  { %v539_v60 = vadd.f32 %v531_v37, %v481_v5 }
 0x241   :  { %v833_v45 = vadd.f32 %v825_v29, %v775_v27  ;;  %v359_v53 = vadd.f32 %v351_v43, %v301_v48 }
 0x242   :  { %v691_v12 = vpop.f32.mrf.mxu2  ;;  %v749_v42 = vpop.f32.mrf.mxu3  ;;  %v597_v56 = vadd.f32 %v589_v24, %v539_v60  ;;  %v3912_v60 = vld [vmem:[%s6297_s7 + $0x1f8] sm:$0xff]  ;;  %v3935_v24 = vld [vmem:[%s6297_s7 + $0x150] sm:$0xff] }
 0x243   :  { %v842_v7 = vadd.f32 %v3771_v20, %v833_v45  ;;  %v710_v62 = vmul.f32 %v3747_v19, %v691_v12  ;;  %v768_v32 = vmul.f32 %v3756_v35, %v749_v42  ;;  %v482_v45 = vadd.f32 %v474_v6, %v359_v53  ;;  %v3907_v6 = vld [vmem:[%s6297_s7 + $0x160] sm:$0xff]  ;;  %6526 = vst [vmem:[#allocation3_spill] sm:$0xff] %v3912_v60  ;;  %v3926_v53 = vld [vmem:[%s6297_s7 + $0x1f0] sm:$0xff] }
 0x244   :  { %v244_v12 = vmul.f32 %v3712_v13, %v3572_v8  ;;  %v475_v8 = vmul.f32 %v3724_v23, %v3735_v55  ;;  %1290 = vmatpush.msra.mxu2 %v3912_v60 }
 0x245   :  { %v718_v33 = vadd.f32 %v710_v62, %v595_v0  ;;  %v850_v51 = vmax.f32 %v842_v7, 0.0  ;;  %v810_v52 = vpop.f32.mrf.mxu0  ;;  %v532_v0 = vmul.f32 %v3733_v39, %v3718_v16 }
 0x246   :  { %v827_v29 = vmul.f32 %v3760_v1, %v810_v52  ;;  %v302_v40 = vadd.f32 %v294_v63, %v244_v12  ;;  %1291 = vmatpush.msra.mxu2 %v3926_v53 }
 0x247   :  { %v776_v47 = vadd.f32 %v768_v32, %v718_v33  ;;  %3028 = vmatmul.msk.f32.gmra.mxu1 %vm861_vm1, %v850_v51  ;;  %3036 = vmatmul.msk.f32.gmra.mxu2 %vm861_vm1, %v850_v51  ;;  %v540_v50 = vadd.f32 %v532_v0, %v482_v45  ;;  %v590_v32 = vmul.f32 %v3741_v11, %v3704_v10  ;;  %v3952_v45 = vld [vmem:[%s6297_s7 + $0x1e0] sm:$0xff]  ;;  %v3987_v0 = vld [vmem:[%s6297_s7 + $0x130] sm:$0xff] }
 0x248   :  { %v360_v16 = vadd.f32 %v352_v14, %v302_v40  ;;  %6528 = vst [vmem:[#allocation5_spill] sm:$0xff] %v3952_v45  ;;  %v3992_v40 = vld [vmem:[%s6297_s7 + $0x1c8] sm:$0xff]  ;;  %v4016_v14 = vld [vmem:[%s6297_s7 + $0x1b8] sm:$0xff] }
 0x249   :  { %v834_v34 = vadd.f32 %v826_v28, %v776_v47  ;;  %v598_v22 = vadd.f32 %v590_v32, %v540_v50  ;;  %v533_v28 = vmul.f32 %v3733_v39, %v3737_v58  ;;  %6529 = vst [vmem:[#allocation6_spill] sm:$0xff] %v3992_v40  ;;  %v4042_v32 = vld [vmem:[%s6297_s7 + $0x1a8] sm:$0xff] }
 0x24a   :  { %v694_v61 = vpop.f32.mrf.mxu2  ;;  %v752_v46 = vpop.f32.mrf.mxu3  ;;  %v483_v4 = vadd.f32 %v475_v8, %v360_v16  ;;  %v4025_v8 = vld [vmem:[%s6297_s7 + $0x118] sm:$0xff]  ;;  %v4037_v16 = vld [vmem:[%s6297_s7 + $0x110] sm:$0xff] }
 0x24b   :  { %v843_v30 = vadd.f32 %v3771_v20, %v834_v34  ;;  %v711_v49 = vmul.f32 %v3747_v19, %v694_v61  ;;  %v769_v2 = vmul.f32 %v3756_v35, %v752_v46  ;;  %v6524_v34 = vld [vmem:[#allocation2_spill] sm:$0xff]  ;;  %6531 = vst [vmem:[#allocation8_spill] sm:$0xff] %v4025_v8 }
 0x24c   :  { %v541_v21 = vadd.f32 %v533_v28, %v483_v4  ;;  %v591_v17 = vmul.f32 %v3741_v11, %v6524_v34  ;;  %6532 = vst [vmem:[#allocation9_spill] sm:$0xff] %v4037_v16  ;;  %v4066_v4 = vld [vmem:[%s6297_s7 + $0x198] sm:$0xff]  ;;  %v4085_v28 = vld [vmem:[%s6297_s7 + $0x180] sm:$0xff] }
 0x24d   :  { %v719_v36 = vadd.f32 %v711_v49, %v596_v25  ;;  %v851_v54 = vmax.f32 %v843_v30, 0.0  ;;  %v813_v38 = vpop.f32.mrf.mxu0  ;;  %6535 = vst [vmem:[#allocation12_spill] sm:$0xff] %v4066_v4 }
 0x24e   :  { %v828_v13 = vmul.f32 %v3760_v1, %v813_v38  ;;  %v599_v58 = vadd.f32 %v591_v17, %v541_v21  ;;  %v3947_v38 = vld [vmem:[%s6297_s7 + $0x148] sm:$0xff]  ;;  %6538 = vst [vmem:[#allocation15_spill] sm:$0xff] %v4085_v28 }
 0x24f   :  { %v777_v27 = vadd.f32 %v769_v2, %v719_v36  ;;  %3029 = vmatmul.msk.f32.gmra.mxu1 %vm861_vm1, %v851_v54  ;;  %3037 = vmatmul.msk.f32.gmra.mxu2 %vm861_vm1, %v851_v54 }
 0x251   :  { %v835_v18 = vadd.f32 %v827_v29, %v777_v27  ;;  %v3921_v27 = vld [vmem:[%s6297_s7 + $0x158] sm:$0xff] }
 0x252   :  { %v697_v31 = vpop.f32.mrf.mxu2  ;;  %v755_v15 = vpop.f32.mrf.mxu3 }
 0x253   :  { %v844_v42 = vadd.f32 %v3771_v20, %v835_v18  ;;  %v712_v7 = vmul.f32 %v3747_v19, %v697_v31  ;;  %v770_v59 = vmul.f32 %v3756_v35, %v755_v15  ;;  %v3940_v18 = vld [vmem:[%s6297_s7 + $0x1e8] sm:$0xff]  ;;  %v3959_v31 = vld [vmem:[%s6297_s7 + $0x140] sm:$0xff]  ;;  %v3964_v15 = vld [vmem:[%s6297_s7 + $0x1d8] sm:$0xff] }
 0x254   :  { %6527 = vst [vmem:[#allocation4_spill] sm:$0xff] %v3940_v18  ;;  %1292 = vmatpush.msra.mxu2 %v3940_v18 }
 0x255   :  { %v720_v9 = vadd.f32 %v712_v7, %v597_v56  ;;  %v852_v62 = vmax.f32 %v844_v42, 0.0  ;;  %v816_v55 = vpop.f32.mrf.mxu0  ;;  %v3973_v42 = vld [vmem:[%s6297_s7 + $0x138] sm:$0xff]  ;;  %v3978_v56 = vld [vmem:[%s6297_s7 + $0x1d0] sm:$0xff] }
 0x256   :  { %v829_v10 = vmul.f32 %v3760_v1, %v816_v55  ;;  %1293 = vmatpush.msra.mxu2 %v3952_v45  ;;  %v4079_v55 = vld [vmem:[%s6297_s7 + $0x188] sm:$0xff] }
 0x257   :  { %v778_v33 = vadd.f32 %v770_v59, %v720_v9  ;;  %3030 = vmatmul.msk.f32.gmra.mxu1 %vm861_vm1, %v852_v62  ;;  %3038 = vmatmul.msk.f32.gmra.mxu2 %vm861_vm1, %v852_v62  ;;  %v3999_v9 = vld [vmem:[%s6297_s7 + $0x128] sm:$0xff]  ;;  %v4004_v59 = vld [vmem:[%s6297_s7 + $0x1c0] sm:$0xff]  ;;  %6537 = vst [vmem:[#allocation14_spill] sm:$0xff] %v4079_v55 }
 0x258   :  { %1294 = vmatpush.msra.mxu2 %v3964_v15  ;;  %6530 = vst [vmem:[#allocation7_spill] sm:$0xff] %v4004_v59  ;;  %v4011_v62 = vld [vmem:[%s6297_s7 + $0x120] sm:$0xff] }
 0x259   :  { %v836_v51 = vadd.f32 %v828_v13, %v778_v33  ;;  %v4030_v13 = vld [vmem:[%s6297_s7 + $0x1b0] sm:$0xff] }
 0x25a   :  { %v700_v44 = vpop.f32.mrf.mxu2  ;;  %v758_v26 = vpop.f32.mrf.mxu3  ;;  %1295 = vmatpush.msra.mxu2 %v3978_v56 }
 0x25b   :  { %v845_v41 = vadd.f32 %v3771_v20, %v836_v51  ;;  %v713_v23 = vmul.f32 %v3747_v19, %v700_v44  ;;  %v771_v52 = vmul.f32 %v3756_v35, %v758_v26  ;;  %v4049_v51 = vld [vmem:[%s6297_s7 + $0x108] sm:$0xff]  ;;  %v4054_v44 = vld [vmem:[%s6297_s7 + $0x1a0] sm:$0xff] }
 0x25c   :  { %1296 = vmatpush.msra.mxu2 %v3992_v40  ;;  %6533 = vst [vmem:[#allocation10_spill] sm:$0xff] %v4049_v51  ;;  %v4061_v26 = vld [vmem:[%s6297_s7 + $0x100] sm:$0xff] }
 0x25d   :  { %v721_v47 = vadd.f32 %v713_v23, %v598_v22  ;;  %v853_v57 = vmax.f32 %v845_v41, 0.0  ;;  %v819_v25 = vpop.f32.mrf.mxu1  ;;  %6534 = vst [vmem:[#allocation11_spill] sm:$0xff] %v4061_v26  ;;  %v4073_v22 = vld [vmem:[%s6297_s7 + $0x190] sm:$0xff] }
 0x25e   :  { %v830_v36 = vmul.f32 %v3760_v1, %v819_v25  ;;  %v3895_v1 = vld [vmem:[%s6297_s7 + $0x170] sm:$0xff]  ;;  %1297 = vmatpush.msra.mxu2 %v4004_v59  ;;  %6536 = vst [vmem:[#allocation13_spill] sm:$0xff] %v4073_v22 }
 0x25f   :  { %v779_v3 = vadd.f32 %v771_v52, %v721_v47  ;;  %3031 = vmatmul.msk.f32.gmra.mxu1 %vm861_vm1, %v853_v57  ;;  %3039 = vmatmul.msk.f32.gmra.mxu2 %vm861_vm1, %v853_v57 }
 0x260   :  { %1298 = vmatpush.msra.mxu2 %v4016_v14 }
 0x261   :  { %v837_v61 = vadd.f32 %v829_v10, %v779_v3  ;;  %v128_v10 = vld [vmem:[%s6298_s5] sm:$0x3] }
 0x262   :  { %v703_v46 = vpop.f32.mrf.mxu2  ;;  %v761_v5 = vpop.f32.mrf.mxu3  ;;  %1299 = vmatpush.msra.mxu2 %v4030_v13  ;;  %v857_v34 = vperm.slane %v128_v10, 0 }
 0x263   :  { %v846_v39 = vadd.f32 %v3771_v20, %v837_v61  ;;  %v714_v30 = vmul.f32 %v3747_v19, %v703_v46  ;;  %v772_v48 = vmul.f32 %v3756_v35, %v761_v5  ;;  %v3887_v19 = vld [vmem:[%s6297_s7 + $0x178] sm:$0xff] }
 0x264   :  { %6525 = vst [vmem:[#allocation2_spill] sm:$0xff] %v3887_v19  ;;  %1261 = vmatpush.msrb.mxu1 %v3887_v19  ;;  %1300 = vmatpush.msra.mxu2 %v4042_v32 }
 0x265   :  { %v722_v49 = vadd.f32 %v714_v30, %v599_v58  ;;  %v854_v37 = vmax.f32 %v846_v39, 0.0  ;;  %v858_v58 = vperm.slane %v128_v10, 1 }
 0x266   :  { %1262 = vmatpush.msrb.mxu1 %v3895_v1  ;;  %1301 = vmatpush.msra.mxu2 %v4054_v44 }
 0x267   :  { %v780_v2 = vadd.f32 %v772_v48, %v722_v49  ;;  %3032 = vmatmul.msk.f32.gmra.mxu1 %vm861_vm1, %v854_v37  ;;  %3040 = vmatmul.msk.f32.gmra.mxu2 %vm861_vm1, %v854_v37 }
 0x268   :  { %1302 = vmatpush.msra.mxu2 %v4066_v4 }
 0x269   :  { %v838_v11 = vadd.f32 %v830_v36, %v780_v2 }
 0x26a   :  { %1303 = vmatpush.msra.mxu2 %v4073_v22 }
 0x26b   :  { %v847_v54 = vadd.f32 %v3771_v20, %v838_v11  ;;  %v3901_v20 = vld [vmem:[%s6297_s7 + $0x168] sm:$0xff] }
 0x26c   :  { %1263 = vmatpush.msrb.mxu1 %v3901_v20  ;;  %1304 = vmatpush.msra.mxu2 %v4079_v55 }
 0x26d   :  { %v855_v43 = vmax.f32 %v847_v54, 0.0 }
 0x26e   :  { %1264 = vmatpush.msrb.mxu1 %v3907_v6  ;;  %1305 = vmatpush.msra.mxu2 %v4085_v28 }
 0x26f   :  { %3033 = vmatmul.msk.f32.gmra.mxu1 %vm861_vm1, %v855_v43  ;;  %3041 = vmatmul.msk.f32.gmra.mxu2 %vm861_vm1, %v855_v43 }
 0x270   :  { %1265 = vmatpush.msrb.mxu1 %v3921_v27 }
 0x272   :  { %1266 = vmatpush.msrb.mxu1 %v3935_v24 }
 0x274   :  { %1267 = vmatpush.msrb.mxu1 %v3947_v38 }
 0x276   :  { %1268 = vmatpush.msrb.mxu1 %v3959_v31 }
 0x278   :  { %1269 = vmatpush.msrb.mxu1 %v3973_v42 }
 0x27a   :  { %1270 = vmatpush.msrb.mxu1 %v3987_v0 }
 0x27c   :  { %1271 = vmatpush.msrb.mxu1 %v3999_v9 }
 0x27e   :  { %1272 = vmatpush.msrb.mxu1 %v4011_v62 }
 0x280   :  { %1273 = vmatpush.msrb.mxu1 %v4025_v8 }
 0x282   :  { %1274 = vmatpush.msrb.mxu1 %v4037_v16 }
 0x284   :  { %1275 = vmatpush.msrb.mxu1 %v4049_v51 }
 0x286   :  { %1276 = vmatpush.msrb.mxu1 %v4061_v26 }
 0x2b4   :  { %v3890_v35 = vpop.f32.mrf.mxu1 }
 0x2ba   :  { %v3916_v29 = vpop.f32.mrf.mxu2 }
 0x2bc   :  { %v3930_v63 = vpop.f32.mrf.mxu1 }
 0x2c2   :  { %v3968_v12 = vpop.f32.mrf.mxu2 }
 0x2c4   :  { %v3982_v7 = vpop.f32.mrf.mxu1 }
 0x2c5   :  { %v910_v11 = vadd.f32 %v3982_v7, %v857_v34  ;;  %v904_v7 = vadd.f32 %v3890_v35, %v857_v34 }
 0x2c7   :  { %v4135_v35 = vmax.f32 %v904_v7, 0.0  ;;  %v4225_v7 = vld [vmem:[%s6297_s7 + $0x50] sm:$0xff] }
 0x2c9   :  { %6546 = vst [vmem:[#allocation23_spill] sm:$0xff] %v4135_v35 }
 0x2ca   :  { %v4020_v50 = vpop.f32.mrf.mxu2 }
 0x2cc   :  { %v912_v33 = vpop.f32.mrf.mxu1 }
 0x2cd   :  { %v913_v48 = vadd.f32 %v912_v33, %v857_v34  ;;  %v907_v33 = vadd.f32 %v3930_v63, %v857_v34 }
 0x2cf   :  { %v4126_v63 = vmax.f32 %v907_v33, 0.0  ;;  %v4213_v33 = vld [vmem:[%s6297_s7 + $0x58] sm:$0xff] }
 0x2d1   :  { %6544 = vst [vmem:[#allocation21_spill] sm:$0xff] %v4126_v63 }
 0x2d2   :  { %v953_v41 = vpop.f32.mrf.mxu2 }
 0x2d4   :  { %v915_v23 = vpop.f32.mrf.mxu1 }
 0x2d5   :  { %v916_v30 = vadd.f32 %v915_v23, %v857_v34 }
 0x2d7   :  { %v4102_v54 = vmax.f32 %v916_v30, 0.0 }
 0x2d9   :  { %6540 = vst [vmem:[#allocation17_spill] sm:$0xff] %v4102_v54 }
 0x2da   :  { %v956_v47 = vpop.f32.mrf.mxu2 }
 0x2dc   :  { %v918_v52 = vpop.f32.mrf.mxu1 }
 0x2dd   :  { %v919_v5 = vadd.f32 %v918_v52, %v857_v34  ;;  %v4109_v52 = vmax.f32 %v913_v48, 0.0  ;;  %v4183_v48 = vld [vmem:[%s6297_s7 + $0x68] sm:$0xff] }
 0x2df   :  { %v4097_v37 = vmax.f32 %v919_v5, 0.0  ;;  %6541 = vst [vmem:[#allocation18_spill] sm:$0xff] %v4109_v52 }
 0x2e1   :  { %6539 = vst [vmem:[#allocation16_spill] sm:$0xff] %v4097_v37 }
 0x2e2   :  { %v959_v57 = vpop.f32.mrf.mxu2 }
 0x2e3   :  { %v960_v43 = vadd.f32 %v959_v57, %v858_v58  ;;  %v4118_v57 = vmax.f32 %v910_v11, 0.0  ;;  %v4201_v11 = vld [vmem:[%s6297_s7 + $0x60] sm:$0xff] }
 0x2e4   :  { %v921_v21 = vpop.f32.mrf.mxu1 }
 0x2e5   :  { %v922_v61 = vadd.f32 %v921_v21, %v857_v34  ;;  %v957_v21 = vadd.f32 %v956_v47, %v858_v58  ;;  %6542 = vst [vmem:[#allocation19_spill] sm:$0xff] %v4118_v57  ;;  %v951_v47 = vadd.f32 %v4020_v50, %v858_v58  ;;  %v984_v50 = vld [vmem:[%s6299_s6] sm:$0xff] }
 0x2e7   :  { %v4093_v25 = vmax.f32 %v922_v61, 0.0  ;;  %v4129_v61 = vmax.f32 %v957_v21, 0.0  ;;  %v4148_v5 = vmax.f32 %v951_v47, 0.0  ;;  %v4219_v21 = vld [vmem:[%s6297_s7 + $0xe0] sm:$0xff]  ;;  %v4237_v47 = vld [vmem:[%s6297_s7 + $0x48] sm:$0xff] }
 0x2e9   :  { %6545 = vst [vmem:[#allocation22_spill] sm:$0xff] %v4129_v61 }
 0x2ea   :  { %v962_v3 = vpop.f32.mrf.mxu2  ;;  %6548 = vst [vmem:[#allocation25_spill] sm:$0xff] %v4148_v5 }
 0x2eb   :  { %v963_v36 = vadd.f32 %v962_v3, %v858_v58  ;;  %v954_v3 = vadd.f32 %v953_v41, %v858_v58  ;;  %v948_v41 = vadd.f32 %v3968_v12, %v858_v58  ;;  %v4155_v12 = vld [vmem:[%s6297_s7 + $0x78] sm:$0xff] }
 0x2ec   :  { %v924_v17 = vpop.f32.mrf.mxu1 }
 0x2ed   :  { %v925_v46 = vadd.f32 %v924_v17, %v857_v34  ;;  %v4111_v10 = vmax.f32 %v963_v36, 0.0  ;;  %v4120_v17 = vmax.f32 %v960_v43, 0.0  ;;  %v4138_v34 = vmax.f32 %v954_v3, 0.0  ;;  %v985_v36 = vld [vmem:[%s6299_s6 + $0x8] sm:$0xff]  ;;  %v4231_v3 = vld [vmem:[%s6297_s7 + $0xd8] sm:$0xff] }
 0x2ee   :  { %v4159_v30 = vmax.f32 %v948_v41, 0.0  ;;  %v4206_v43 = vld [vmem:[%s6297_s7 + $0xe8] sm:$0xff]  ;;  %v986_v41 = vld [vmem:[%s6299_s6 + $0x10] sm:$0xff] }
 0x2ef   :  { %v4091_v39 = vmax.f32 %v925_v46, 0.0  ;;  %6543 = vst [vmem:[#allocation20_spill] sm:$0xff] %v4120_v17  ;;  %v945_v46 = vadd.f32 %v3916_v29, %v858_v58  ;;  %v4166_v29 = vld [vmem:[%s6297_s7 + $0x70] sm:$0xff] }
 0x2f0   :  { %6547 = vst [vmem:[#allocation24_spill] sm:$0xff] %v4138_v34 }
 0x2f1   :  { %1148 = vmatpush.msrb.mxu3 %v4091_v39  ;;  %1415 = vmatpush.msra.mxu1 %v4091_v39  ;;  %6549 = vst [vmem:[#allocation26_spill] sm:$0xff] %v4159_v30 }
 0x2f2   :  { %v965_v49 = vpop.f32.mrf.mxu2 }
 0x2f3   :  { %v966_v2 = vadd.f32 %v965_v49, %v858_v58  ;;  %1149 = vmatpush.msrb.mxu3 %v4093_v25  ;;  %1416 = vmatpush.msra.mxu1 %v4093_v25  ;;  %v4170_v58 = vmax.f32 %v945_v46, 0.0  ;;  %v4177_v49 = vld [vmem:[%s6297_s7 + $0xf8] sm:$0xff]  ;;  %v4253_v46 = vld [vmem:[%s6297_s7 + $0x40] sm:$0xff] }
 0x2f5   :  { %v4104_v23 = vmax.f32 %v966_v2, 0.0  ;;  %1150 = vmatpush.msrb.mxu3 %v4097_v37  ;;  %1417 = vmatpush.msra.mxu1 %v4097_v37  ;;  %6550 = vst [vmem:[#allocation27_spill] sm:$0xff] %v4170_v58  ;;  %v4194_v2 = vld [vmem:[%s6297_s7 + $0xf0] sm:$0xff]  ;;  %v4337_v37 = vld [vmem:[%s6297_s7 + $0x98] sm:$0xff] }
 0x2f6   :  { %6555 = vst [vmem:[#allocation32_spill] sm:$0xff] %v4337_v37 }
 0x2f7   :  { %1151 = vmatpush.msrb.mxu3 %v4102_v54  ;;  %1177 = vmatpush.msrb.mxu0 %v4104_v23 }
 0x2f8   :  { %1418 = vmatpush.msra.mxu1 %v4102_v54  ;;  %1444 = vmatpush.msrb.mxu2 %v4104_v23  ;;  %v4325_v54 = vld [vmem:[%s6297_s7 + $0xa0] sm:$0xff] }
 0x2f9   :  { %1152 = vmatpush.msrb.mxu3 %v4109_v52  ;;  %1178 = vmatpush.msrb.mxu0 %v4111_v10  ;;  %6553 = vst [vmem:[#allocation30_spill] sm:$0xff] %v4325_v54 }
 0x2fa   :  { %1419 = vmatpush.msra.mxu1 %v4109_v52  ;;  %1445 = vmatpush.msrb.mxu2 %v4111_v10  ;;  %v4306_v52 = vld [vmem:[%s6297_s7 + $0x20] sm:$0xff] }
 0x2fb   :  { %1153 = vmatpush.msrb.mxu3 %v4118_v57  ;;  %1179 = vmatpush.msrb.mxu0 %v4120_v17  ;;  %6551 = vst [vmem:[#allocation28_spill] sm:$0xff] %v4306_v52 }
 0x2fc   :  { %1420 = vmatpush.msra.mxu1 %v4118_v57  ;;  %1446 = vmatpush.msrb.mxu2 %v4120_v17  ;;  %v987_v57 = vld [vmem:[%s6299_s6 + $0x18] sm:$0xff]  ;;  %v4331_v17 = vld [vmem:[%s6297_s7 + $0x10] sm:$0xff] }
 0x2fd   :  { %1154 = vmatpush.msrb.mxu3 %v4126_v63  ;;  %1180 = vmatpush.msrb.mxu0 %v4129_v61  ;;  %6554 = vst [vmem:[#allocation31_spill] sm:$0xff] %v4331_v17 }
 0x2fe   :  { %1421 = vmatpush.msra.mxu1 %v4126_v63  ;;  %1447 = vmatpush.msrb.mxu2 %v4129_v61  ;;  %v4284_v63 = vld [vmem:[%s6297_s7 + $0xb8] sm:$0xff] }
 0x2ff   :  { %1155 = vmatpush.msrb.mxu3 %v4135_v35  ;;  %1181 = vmatpush.msrb.mxu0 %v4138_v34  ;;  %v4319_v61 = vld [vmem:[%s6297_s7 + $0x18] sm:$0xff] }
 0x300   :  { %1422 = vmatpush.msra.mxu1 %v4135_v35  ;;  %1448 = vmatpush.msrb.mxu2 %v4138_v34  ;;  %v4272_v35 = vld [vmem:[%s6297_s7 + $0xc0] sm:$0xff]  ;;  %v4300_v34 = vld [vmem:[%s6297_s7 + $0xb0] sm:$0xff]  ;;  %6552 = vst [vmem:[#allocation29_spill] sm:$0xff] %v4319_v61 }
 0x301   :  { %3042 = vmatmul.msk.f32.vlgmr.msrb.gmra.mxu3 %vm1127_vm2, %v984_v50  ;;  %1182 = vmatpush.msrb.mxu0 %v4148_v5 }
 0x302   :  { %1449 = vmatpush.msrb.mxu2 %v4148_v5  ;;  %1198 = vmatpush.msra.mxu3 %v4155_v12  ;;  %v4290_v5 = vld [vmem:[%s6297_s7 + $0x28] sm:$0xff] }
 0x303   :  { %1183 = vmatpush.msrb.mxu0 %v4159_v30 }
 0x304   :  { %1450 = vmatpush.msrb.mxu2 %v4159_v30  ;;  %1199 = vmatpush.msra.mxu3 %v4166_v29  ;;  %v4278_v30 = vld [vmem:[%s6297_s7 + $0x30] sm:$0xff] }
 0x305   :  { %1184 = vmatpush.msrb.mxu0 %v4170_v58 }
 0x306   :  { %1451 = vmatpush.msrb.mxu2 %v4170_v58  ;;  %3046 = vmatmul.msk.f32.vlgmr.msrb.gmra.mxu0 %vm1127_vm2, %v984_v50  ;;  %v4247_v50 = vld [vmem:[%s6297_s7 + $0xd0] sm:$0xff]  ;;  %v4266_v58 = vld [vmem:[%s6297_s7 + $0x38] sm:$0xff] }
 0x307   :  { %1227 = vmatpush.msra.mxu0 %v4177_v49  ;;  %1200 = vmatpush.msra.mxu3 %v4183_v48 }
 0x309   :  { %3043 = vmatmul.msk.f32.gmra.mxu3 %vm1127_vm2, %v985_v36  ;;  %1228 = vmatpush.msra.mxu0 %v4194_v2 }
 0x30a   :  { %1201 = vmatpush.msra.mxu3 %v4201_v11 }
 0x30b   :  { %1229 = vmatpush.msra.mxu0 %v4206_v43 }
 0x30c   :  { %1202 = vmatpush.msra.mxu3 %v4213_v33 }
 0x30d   :  { %1230 = vmatpush.msra.mxu0 %v4219_v21 }
 0x30e   :  { %3047 = vmatmul.msk.f32.gmra.mxu0 %vm1127_vm2, %v985_v36  ;;  %1203 = vmatpush.msra.mxu3 %v4225_v7  ;;  %v4259_v36 = vld [vmem:[%s6297_s7 + $0xc8] sm:$0xff] }
 0x30f   :  { %1231 = vmatpush.msra.mxu0 %v4231_v3 }
 0x310   :  { %1204 = vmatpush.msra.mxu3 %v4237_v47 }
 0x311   :  { %3044 = vmatmul.msk.f32.gmra.mxu3 %vm1127_vm2, %v986_v41  ;;  %1232 = vmatpush.msra.mxu0 %v4247_v50 }
 0x312   :  { %1205 = vmatpush.msra.mxu3 %v4253_v46 }
 0x313   :  { %1233 = vmatpush.msra.mxu0 %v4259_v36 }
 0x314   :  { %1206 = vmatpush.msra.mxu3 %v4266_v58 }
 0x315   :  { %1234 = vmatpush.msra.mxu0 %v4272_v35 }
 0x316   :  { %3048 = vmatmul.msk.f32.gmra.mxu0 %vm1127_vm2, %v986_v41  ;;  %1207 = vmatpush.msra.mxu3 %v4278_v30  ;;  %v4312_v41 = vld [vmem:[%s6297_s7 + $0xa8] sm:$0xff] }
 0x317   :  { %1235 = vmatpush.msra.mxu0 %v4284_v63 }
 0x318   :  { %1208 = vmatpush.msra.mxu3 %v4290_v5 }
 0x319   :  { %3045 = vmatmul.msk.f32.gmra.mxu3 %vm1127_vm2, %v987_v57  ;;  %1236 = vmatpush.msra.mxu0 %v4300_v34 }
 0x31a   :  { %1209 = vmatpush.msra.mxu3 %v4306_v52  ;;  %v4343_v52 = vld [vmem:[%s6297_s7 + $0x8] sm:$0xff] }
 0x31b   :  { %1237 = vmatpush.msra.mxu0 %v4312_v41  ;;  %6556 = vst [vmem:[#allocation33_spill] sm:$0xff] %v4343_v52 }
 0x31c   :  { %1210 = vmatpush.msra.mxu3 %v4319_v61  ;;  %v4350_v61 = vld [vmem:[%s6297_s7 + $0x90] sm:$0xff] }
 0x31d   :  { %1238 = vmatpush.msra.mxu0 %v4325_v54  ;;  %6557 = vst [vmem:[#allocation34_spill] sm:$0xff] %v4350_v61  ;;  %v4357_v54 = vld [vmem:[%s6297_s7 + $0x88] sm:$0xff] }
 0x31e   :  { %3049 = vmatmul.msk.f32.gmra.mxu0 %vm1127_vm2, %v987_v57  ;;  %1211 = vmatpush.msra.mxu3 %v4331_v17  ;;  %6558 = vst [vmem:[#allocation35_spill] sm:$0xff] %v4357_v54  ;;  %v4364_v57 = vld [vmem:[%s6297_s7] sm:$0xff] }
 0x31f   :  { %1239 = vmatpush.msra.mxu0 %v4337_v37  ;;  %6559 = vst [vmem:[#allocation36_spill] sm:$0xff] %v4364_v57  ;;  %v4369_v17 = vld [vmem:[%s6297_s7 + $0x80] sm:$0xff] }
 0x320   :  { %1212 = vmatpush.msra.mxu3 %v4343_v52  ;;  %6560 = vst [vmem:[#allocation37_spill] sm:$0xff] %v4369_v17  ;;  %v4376_v52 = vld [vmem:[%s6297_s7 + $0x278] sm:$0xff] }
 0x321   :  { %1240 = vmatpush.msra.mxu0 %v4350_v61  ;;  %6561 = vst [vmem:[#allocation38_spill] sm:$0xff] %v4376_v52 }
 0x322   :  { %1213 = vmatpush.msra.mxu3 %v4364_v57  ;;  %v4388_v57 = vld [vmem:[%s6297_s7 + $0x270] sm:$0xff] }
 0x323   :  { %1241 = vmatpush.msra.mxu0 %v4357_v54  ;;  %v4381_v54 = vld [vmem:[%s6297_s7 + $0x2f8] sm:$0xff]  ;;  %6563 = vst [vmem:[#allocation40_spill] sm:$0xff] %v4388_v57 }
 0x324   :  { %6562 = vst [vmem:[#allocation39_spill] sm:$0xff] %v4381_v54  ;;  %1328 = vmatpush.msrb.mxu3 %v4376_v52  ;;  %v4400_v52 = vld [vmem:[%s6297_s7 + $0x268] sm:$0xff] }
 0x325   :  { %1242 = vmatpush.msra.mxu0 %v4369_v17  ;;  %v4393_v17 = vld [vmem:[%s6297_s7 + $0x2f0] sm:$0xff]  ;;  %6565 = vst [vmem:[#allocation42_spill] sm:$0xff] %v4400_v52 }
 0x326   :  { %6564 = vst [vmem:[#allocation41_spill] sm:$0xff] %v4393_v17  ;;  %1329 = vmatpush.msrb.mxu3 %v4388_v57  ;;  %v4412_v57 = vld [vmem:[%s6297_s7 + $0x260] sm:$0xff] }
 0x327   :  { %1357 = vmatpush.msrb.mxu0 %v4381_v54  ;;  %v4405_v54 = vld [vmem:[%s6297_s7 + $0x2e8] sm:$0xff]  ;;  %6567 = vst [vmem:[#allocation44_spill] sm:$0xff] %v4412_v57 }
 0x328   :  { %6566 = vst [vmem:[#allocation43_spill] sm:$0xff] %v4405_v54  ;;  %1330 = vmatpush.msrb.mxu3 %v4400_v52  ;;  %v4424_v52 = vld [vmem:[%s6297_s7 + $0x258] sm:$0xff] }
 0x329   :  { %1358 = vmatpush.msrb.mxu0 %v4393_v17  ;;  %v4417_v17 = vld [vmem:[%s6297_s7 + $0x2e0] sm:$0xff]  ;;  %6569 = vst [vmem:[#allocation46_spill] sm:$0xff] %v4424_v52 }
 0x32a   :  { %6568 = vst [vmem:[#allocation45_spill] sm:$0xff] %v4417_v17  ;;  %1331 = vmatpush.msrb.mxu3 %v4412_v57  ;;  %v4436_v57 = vld [vmem:[%s6297_s7 + $0x250] sm:$0xff] }
 0x32b   :  { %1359 = vmatpush.msrb.mxu0 %v4405_v54  ;;  %v4429_v54 = vld [vmem:[%s6297_s7 + $0x2d8] sm:$0xff]  ;;  %6571 = vst [vmem:[#allocation48_spill] sm:$0xff] %v4436_v57 }
 0x32c   :  { %6570 = vst [vmem:[#allocation47_spill] sm:$0xff] %v4429_v54  ;;  %1332 = vmatpush.msrb.mxu3 %v4424_v52  ;;  %v4448_v52 = vld [vmem:[%s6297_s7 + $0x248] sm:$0xff] }
 0x32d   :  { %1360 = vmatpush.msrb.mxu0 %v4417_v17  ;;  %v4441_v17 = vld [vmem:[%s6297_s7 + $0x2d0] sm:$0xff]  ;;  %6573 = vst [vmem:[#allocation50_spill] sm:$0xff] %v4448_v52 }
 0x32e   :  { %6572 = vst [vmem:[#allocation49_spill] sm:$0xff] %v4441_v17  ;;  %1333 = vmatpush.msrb.mxu3 %v4436_v57  ;;  %v4460_v57 = vld [vmem:[%s6297_s7 + $0x240] sm:$0xff] }
 0x32f   :  { %1361 = vmatpush.msrb.mxu0 %v4429_v54  ;;  %v4453_v54 = vld [vmem:[%s6297_s7 + $0x2c8] sm:$0xff]  ;;  %6575 = vst [vmem:[#allocation52_spill] sm:$0xff] %v4460_v57 }
 0x330   :  { %6574 = vst [vmem:[#allocation51_spill] sm:$0xff] %v4453_v54  ;;  %1334 = vmatpush.msrb.mxu3 %v4448_v52  ;;  %v4472_v52 = vld [vmem:[%s6297_s7 + $0x238] sm:$0xff] }
 0x331   :  { %1362 = vmatpush.msrb.mxu0 %v4441_v17  ;;  %v4465_v17 = vld [vmem:[%s6297_s7 + $0x2c0] sm:$0xff]  ;;  %6577 = vst [vmem:[#allocation54_spill] sm:$0xff] %v4472_v52 }
 0x332   :  { %6576 = vst [vmem:[#allocation53_spill] sm:$0xff] %v4465_v17  ;;  %1335 = vmatpush.msrb.mxu3 %v4460_v57  ;;  %v4484_v57 = vld [vmem:[%s6297_s7 + $0x230] sm:$0xff] }
 0x333   :  { %1363 = vmatpush.msrb.mxu0 %v4453_v54  ;;  %v4477_v54 = vld [vmem:[%s6297_s7 + $0x2b8] sm:$0xff]  ;;  %6579 = vst [vmem:[#allocation56_spill] sm:$0xff] %v4484_v57 }
 0x334   :  { %6578 = vst [vmem:[#allocation55_spill] sm:$0xff] %v4477_v54  ;;  %1336 = vmatpush.msrb.mxu3 %v4472_v52  ;;  %v4496_v52 = vld [vmem:[%s6297_s7 + $0x228] sm:$0xff] }
 0x335   :  { %1364 = vmatpush.msrb.mxu0 %v4465_v17  ;;  %v4489_v17 = vld [vmem:[%s6297_s7 + $0x2b0] sm:$0xff]  ;;  %6581 = vst [vmem:[#allocation58_spill] sm:$0xff] %v4496_v52 }
 0x336   :  { %6580 = vst [vmem:[#allocation57_spill] sm:$0xff] %v4489_v17  ;;  %1337 = vmatpush.msrb.mxu3 %v4484_v57  ;;  %v4508_v57 = vld [vmem:[%s6297_s7 + $0x220] sm:$0xff] }
 0x337   :  { %1365 = vmatpush.msrb.mxu0 %v4477_v54  ;;  %v4501_v54 = vld [vmem:[%s6297_s7 + $0x2a8] sm:$0xff]  ;;  %6583 = vst [vmem:[#allocation60_spill] sm:$0xff] %v4508_v57 }
 0x338   :  { %6582 = vst [vmem:[#allocation59_spill] sm:$0xff] %v4501_v54  ;;  %1338 = vmatpush.msrb.mxu3 %v4496_v52  ;;  %v4520_v52 = vld [vmem:[%s6297_s7 + $0x218] sm:$0xff] }
 0x339   :  { %1366 = vmatpush.msrb.mxu0 %v4489_v17  ;;  %v4513_v17 = vld [vmem:[%s6297_s7 + $0x2a0] sm:$0xff]  ;;  %6585 = vst [vmem:[#allocation62_spill] sm:$0xff] %v4520_v52 }
 0x33a   :  { %6584 = vst [vmem:[#allocation61_spill] sm:$0xff] %v4513_v17  ;;  %1339 = vmatpush.msrb.mxu3 %v4508_v57  ;;  %v4532_v57 = vld [vmem:[%s6297_s7 + $0x210] sm:$0xff] }
 0x33b   :  { %1367 = vmatpush.msrb.mxu0 %v4501_v54  ;;  %v4525_v54 = vld [vmem:[%s6297_s7 + $0x298] sm:$0xff]  ;;  %6587 = vst [vmem:[#allocation64_spill] sm:$0xff] %v4532_v57 }
 0x33c   :  { %6586 = vst [vmem:[#allocation63_spill] sm:$0xff] %v4525_v54  ;;  %1340 = vmatpush.msrb.mxu3 %v4520_v52  ;;  %v4555_v52 = vld [vmem:[%s6297_s7 + $0x288] sm:$0xff] }
 0x33d   :  { %1368 = vmatpush.msrb.mxu0 %v4513_v17  ;;  %v4537_v17 = vld [vmem:[%s6297_s7 + $0x290] sm:$0xff]  ;;  %6590 = vst [vmem:[#allocation67_spill] sm:$0xff] %v4555_v52 }
 0x33e   :  { %6588 = vst [vmem:[#allocation65_spill] sm:$0xff] %v4537_v17  ;;  %1341 = vmatpush.msrb.mxu3 %v4532_v57  ;;  %v4569_v57 = vld [vmem:[%s6297_s7 + $0x280] sm:$0xff] }
 0x33f   :  { %1369 = vmatpush.msrb.mxu0 %v4525_v54  ;;  %v4550_v54 = vld [vmem:[%s6297_s7 + $0x208] sm:$0xff] }
 0x340   :  { %6589 = vst [vmem:[#allocation66_spill] sm:$0xff] %v4550_v54  ;;  %1342 = vmatpush.msrb.mxu3 %v4550_v54 }
 0x341   :  { %1370 = vmatpush.msrb.mxu0 %v4537_v17  ;;  %v4564_v17 = vld [vmem:[%s6297_s7 + $0x200] sm:$0xff] }
 0x342   :  { %1343 = vmatpush.msrb.mxu3 %v4564_v17 }
 0x343   :  { %1371 = vmatpush.msrb.mxu0 %v4555_v52 }
 0x345   :  { %1372 = vmatpush.msrb.mxu0 %v4569_v57 }
 0x383   :  { %v4539_v61 = vpop.f32.mrf.mxu0 }
 0x384   :  { %v4543_v37 = vpop.f32.mrf.mxu3  ;;  %1243 = vmatmul.f32.vlgmr.msra.gmra.mxu0 %v4539_v61  ;;  %1306 = vmatmul.f32.vlgmr.msra.gmra.mxu2 %v4539_v61 }
 0x385   :  { %1214 = vmatmul.f32.vlgmr.msra.gmra.mxu3 %v4543_v37  ;;  %1277 = vmatmul.f32.vlgmr.msrb.gmra.mxu1 %v4543_v37 }
 0x386   :  { %1532 = vmatpush.msrb.mxu1 %v3887_v19  ;;  %1561 = vmatpush.msra.mxu2 %v3912_v60 }
 0x387   :  { %1465 = vmatpush.msra.mxu3 %v4155_v12  ;;  %1494 = vmatpush.msra.mxu0 %v4177_v49 }
 0x388   :  { %1533 = vmatpush.msrb.mxu1 %v3895_v1  ;;  %1562 = vmatpush.msra.mxu2 %v3926_v53 }
 0x389   :  { %1466 = vmatpush.msra.mxu3 %v4166_v29  ;;  %1495 = vmatpush.msra.mxu0 %v4194_v2 }
 0x38a   :  { %1534 = vmatpush.msrb.mxu1 %v3901_v20  ;;  %1563 = vmatpush.msra.mxu2 %v3940_v18 }
 0x38b   :  { %v4579_v60 = vpop.f32.mrf.mxu0  ;;  %1467 = vmatpush.msra.mxu3 %v4183_v48  ;;  %1496 = vmatpush.msra.mxu0 %v4206_v43 }
 0x38c   :  { %v4583_v19 = vpop.f32.mrf.mxu3  ;;  %1535 = vmatpush.msrb.mxu1 %v3907_v6  ;;  %1564 = vmatpush.msra.mxu2 %v3952_v45 }
 0x38d   :  { %1217 = vmatmul.f32.gmra.mxu3 %v4583_v19  ;;  %1246 = vmatmul.f32.gmra.mxu0 %v4579_v60 }
 0x38e   :  { %1280 = vmatmul.f32.gmra.mxu1 %v4583_v19  ;;  %1309 = vmatmul.f32.gmra.mxu2 %v4579_v60 }
 0x38f   :  { %1536 = vmatpush.msrb.mxu1 %v3921_v27  ;;  %1565 = vmatpush.msra.mxu2 %v3964_v15 }
 0x390   :  { %1468 = vmatpush.msra.mxu3 %v4201_v11  ;;  %1497 = vmatpush.msra.mxu0 %v4219_v21 }
 0x391   :  { %1537 = vmatpush.msrb.mxu1 %v3935_v24  ;;  %1566 = vmatpush.msra.mxu2 %v3978_v56 }
 0x392   :  { %1469 = vmatpush.msra.mxu3 %v4213_v33  ;;  %1498 = vmatpush.msra.mxu0 %v4231_v3 }
 0x393   :  { %1538 = vmatpush.msrb.mxu1 %v3947_v38  ;;  %1567 = vmatpush.msra.mxu2 %v3992_v40  ;;  %v4601_v45 = vpop.f32.mrf.mxu0 }
 0x394   :  { %v4603_v18 = vpop.f32.mrf.mxu3  ;;  %1470 = vmatpush.msra.mxu3 %v4225_v7  ;;  %1499 = vmatpush.msra.mxu0 %v4247_v50 }
 0x395   :  { %1539 = vmatpush.msrb.mxu1 %v3959_v31  ;;  %1568 = vmatpush.msra.mxu2 %v4004_v59 }
 0x396   :  { %1220 = vmatmul.f32.gmra.mxu3 %v4603_v18  ;;  %1249 = vmatmul.f32.gmra.mxu0 %v4601_v45 }
 0x397   :  { %1283 = vmatmul.f32.gmra.mxu1 %v4603_v18  ;;  %1312 = vmatmul.f32.gmra.mxu2 %v4601_v45 }
 0x398   :  { %1540 = vmatpush.msrb.mxu1 %v3973_v42  ;;  %1569 = vmatpush.msra.mxu2 %v4016_v14 }
 0x399   :  { %1471 = vmatpush.msra.mxu3 %v4237_v47  ;;  %1500 = vmatpush.msra.mxu0 %v4259_v36 }
 0x39a   :  { %1541 = vmatpush.msrb.mxu1 %v3987_v0  ;;  %1570 = vmatpush.msra.mxu2 %v4030_v13 }
 0x39b   :  { %v4625_v40 = vpop.f32.mrf.mxu0  ;;  %1472 = vmatpush.msra.mxu3 %v4253_v46  ;;  %1501 = vmatpush.msra.mxu0 %v4272_v35 }
 0x39c   :  { %1542 = vmatpush.msrb.mxu1 %v3999_v9  ;;  %1571 = vmatpush.msra.mxu2 %v4042_v32  ;;  %v4623_v59 = vpop.f32.mrf.mxu3 }
 0x39d   :  { %1473 = vmatpush.msra.mxu3 %v4266_v58  ;;  %1502 = vmatpush.msra.mxu0 %v4284_v63 }
 0x39e   :  { %1543 = vmatpush.msrb.mxu1 %v4011_v62  ;;  %1572 = vmatpush.msra.mxu2 %v4054_v44 }
 0x39f   :  { %1223 = vmatmul.f32.gmra.mxu3 %v4623_v59  ;;  %1252 = vmatmul.f32.gmra.mxu0 %v4625_v40 }
 0x3a0   :  { %1286 = vmatmul.f32.gmra.mxu1 %v4623_v59  ;;  %1315 = vmatmul.f32.gmra.mxu2 %v4625_v40 }
 0x3a1   :  { %1544 = vmatpush.msrb.mxu1 %v4025_v8  ;;  %1573 = vmatpush.msra.mxu2 %v4066_v4  ;;  %v988_v4 = vld [vmem:[%s6299_s6 + $0x20] sm:$0xff]  ;;  %v6628_v8 = vld [vmem:[#allocation53_spill] sm:$0xff] }
 0x3a2   :  { %1474 = vmatpush.msra.mxu3 %v4278_v30  ;;  %1503 = vmatpush.msra.mxu0 %v4300_v34 }
 0x3a3   :  { %1545 = vmatpush.msrb.mxu1 %v4037_v16  ;;  %1574 = vmatpush.msra.mxu2 %v4073_v22  ;;  %v6602_v16 = vld [vmem:[#allocation34_spill] sm:$0xff] }
 0x3a4   :  { %1475 = vmatpush.msra.mxu3 %v4290_v5  ;;  %1504 = vmatpush.msra.mxu0 %v4312_v41  ;;  %v6608_v22 = vld [vmem:[#allocation26_spill] sm:$0xff] }
 0x3a5   :  { %1546 = vmatpush.msrb.mxu1 %v4049_v51  ;;  %1575 = vmatpush.msra.mxu2 %v4079_v55  ;;  %v6594_v51 = vld [vmem:[#allocation20_spill] sm:$0xff]  ;;  %v6603_v55 = vld [vmem:[#allocation19_spill] sm:$0xff] }
 0x3a7   :  { %1547 = vmatpush.msrb.mxu1 %v4061_v26  ;;  %1576 = vmatpush.msra.mxu2 %v4085_v28  ;;  %v6591_v26 = vld [vmem:[#allocation28_spill] sm:$0xff]  ;;  %v6597_v28 = vld [vmem:[#allocation17_spill] sm:$0xff] }
 0x3a8   :  { %1344 = vmatmul.f32.vlgmr.msrb.gmra.mxu3 %v4543_v37  ;;  %1373 = vmatmul.f32.vlgmr.msrb.gmra.mxu0 %v4539_v61  ;;  %v6592_v37 = vld [vmem:[#allocation30_spill] sm:$0xff]  ;;  %v6593_v61 = vld [vmem:[#allocation16_spill] sm:$0xff] }
 0x3a9   :  { %3050 = vmatmul.msk.f32.vlgmr.msra.gmra.mxu1 %vm1127_vm2, %v988_v4  ;;  %3054 = vmatmul.msk.f32.vlgmr.msrb.gmra.mxu2 %vm1127_vm2, %v988_v4  ;;  %v989_v4 = vld [vmem:[%s6299_s6 + $0x28] sm:$0xff] }
 0x3aa   :  { %1686 = vmatpush.msra.mxu1 %v4091_v39  ;;  %1715 = vmatpush.msrb.mxu2 %v4104_v23  ;;  %v6595_v39 = vld [vmem:[#allocation29_spill] sm:$0xff]  ;;  %v6596_v23 = vld [vmem:[#allocation32_spill] sm:$0xff] }
 0x3ab   :  { %1476 = vmatpush.msra.mxu3 %v6591_v26  ;;  %1505 = vmatpush.msra.mxu0 %v6592_v37 }
 0x3ac   :  { %1687 = vmatpush.msra.mxu1 %v4093_v25  ;;  %1716 = vmatpush.msrb.mxu2 %v4111_v10  ;;  %v6598_v25 = vld [vmem:[#allocation22_spill] sm:$0xff]  ;;  %v6600_v10 = vld [vmem:[#allocation24_spill] sm:$0xff] }
 0x3ad   :  { %1477 = vmatpush.msra.mxu3 %v6595_v39  ;;  %1506 = vmatpush.msra.mxu0 %v6596_v23 }
 0x3ae   :  { %1688 = vmatpush.msra.mxu1 %v6593_v61  ;;  %1717 = vmatpush.msrb.mxu2 %v6594_v51  ;;  %v6599_v51 = vld [vmem:[#allocation18_spill] sm:$0xff]  ;;  %v6601_v61 = vld [vmem:[#allocation31_spill] sm:$0xff] }
 0x3af   :  { %1478 = vmatpush.msra.mxu3 %v6601_v61  ;;  %1507 = vmatpush.msra.mxu0 %v6602_v16  ;;  %v6611_v16 = vld [vmem:[#allocation23_spill] sm:$0xff] }
 0x3b0   :  { %1689 = vmatpush.msra.mxu1 %v6597_v28  ;;  %1718 = vmatpush.msrb.mxu2 %v6598_v25  ;;  %v6604_v28 = vld [vmem:[#allocation25_spill] sm:$0xff] }
 0x3b1   :  { %1347 = vmatmul.f32.gmra.mxu3 %v4583_v19  ;;  %1376 = vmatmul.f32.gmra.mxu0 %v4579_v60  ;;  %v6605_v25 = vld [vmem:[#allocation33_spill] sm:$0xff]  ;;  %v6606_v19 = vld [vmem:[#allocation35_spill] sm:$0xff] }
 0x3b2   :  { %3051 = vmatmul.msk.f32.gmra.mxu1 %vm1127_vm2, %v989_v4  ;;  %3055 = vmatmul.msk.f32.gmra.mxu2 %vm1127_vm2, %v989_v4  ;;  %v6607_v60 = vld [vmem:[#allocation21_spill] sm:$0xff]  ;;  %v990_v4 = vld [vmem:[%s6299_s6 + $0x30] sm:$0xff] }
 0x3b3   :  { %1690 = vmatpush.msra.mxu1 %v6599_v51  ;;  %1719 = vmatpush.msrb.mxu2 %v6600_v10  ;;  %v6609_v51 = vld [vmem:[#allocation36_spill] sm:$0xff]  ;;  %v6610_v10 = vld [vmem:[#allocation37_spill] sm:$0xff] }
 0x3b4   :  { %1479 = vmatpush.msra.mxu3 %v6605_v25  ;;  %1508 = vmatpush.msra.mxu0 %v6606_v19  ;;  %v6616_v19 = vld [vmem:[#allocation41_spill] sm:$0xff] }
 0x3b5   :  { %1691 = vmatpush.msra.mxu1 %v6603_v55  ;;  %1720 = vmatpush.msrb.mxu2 %v6604_v28  ;;  %v6612_v55 = vld [vmem:[#allocation27_spill] sm:$0xff] }
 0x3b6   :  { %1480 = vmatpush.msra.mxu3 %v6609_v51  ;;  %1509 = vmatpush.msra.mxu0 %v6610_v10  ;;  %v6614_v28 = vld [vmem:[#allocation39_spill] sm:$0xff]  ;;  %v6623_v10 = vld [vmem:[#allocation48_spill] sm:$0xff] }
 0x3b7   :  { %1692 = vmatpush.msra.mxu1 %v6607_v60  ;;  %1721 = vmatpush.msrb.mxu2 %v6608_v22  ;;  %v6613_v22 = vld [vmem:[#allocation38_spill] sm:$0xff]  ;;  %v6615_v60 = vld [vmem:[#allocation40_spill] sm:$0xff] }
 0x3b8   :  { %1599 = vmatpush.msrb.mxu3 %v6613_v22  ;;  %1628 = vmatpush.msrb.mxu0 %v6614_v28  ;;  %v6622_v28 = vld [vmem:[#allocation47_spill] sm:$0xff] }
 0x3b9   :  { %1693 = vmatpush.msra.mxu1 %v6611_v16  ;;  %1722 = vmatpush.msrb.mxu2 %v6612_v55  ;;  %v991_v16 = vld [vmem:[%s6299_s6 + $0x38] sm:$0xff]  ;;  %v6617_v55 = vld [vmem:[#allocation42_spill] sm:$0xff] }
 0x3ba   :  { %1350 = vmatmul.f32.gmra.mxu3 %v4603_v18  ;;  %1379 = vmatmul.f32.gmra.mxu0 %v4601_v45  ;;  %v6618_v18 = vld [vmem:[#allocation43_spill] sm:$0xff]  ;;  %v6619_v45 = vld [vmem:[#allocation44_spill] sm:$0xff] }
 0x3bb   :  { %3052 = vmatmul.msk.f32.gmra.mxu1 %vm1127_vm2, %v990_v4  ;;  %3056 = vmatmul.msk.f32.gmra.mxu2 %vm1127_vm2, %v990_v4  ;;  %v6620_v4 = vld [vmem:[#allocation45_spill] sm:$0xff] }
 0x3bc   :  { %1600 = vmatpush.msrb.mxu3 %v6615_v60  ;;  %1629 = vmatpush.msrb.mxu0 %v6616_v19  ;;  %v6621_v19 = vld [vmem:[#allocation46_spill] sm:$0xff] }
 0x3be   :  { %1601 = vmatpush.msrb.mxu3 %v6617_v55  ;;  %1630 = vmatpush.msrb.mxu0 %v6618_v18  ;;  %v6624_v55 = vld [vmem:[#allocation49_spill] sm:$0xff]  ;;  %v6625_v18 = vld [vmem:[#allocation50_spill] sm:$0xff] }
 0x3c0   :  { %1602 = vmatpush.msrb.mxu3 %v6619_v45  ;;  %1631 = vmatpush.msrb.mxu0 %v6620_v4  ;;  %v6630_v45 = vld [vmem:[#allocation55_spill] sm:$0xff]  ;;  %v6631_v4 = vld [vmem:[#allocation56_spill] sm:$0xff] }
 0x3c2   :  { %1353 = vmatmul.f32.gmra.mxu3 %v4623_v59  ;;  %1382 = vmatmul.f32.gmra.mxu0 %v4625_v40  ;;  %v6626_v59 = vld [vmem:[#allocation51_spill] sm:$0xff]  ;;  %v6627_v40 = vld [vmem:[#allocation52_spill] sm:$0xff] }
 0x3c3   :  { %3053 = vmatmul.msk.f32.gmra.mxu1 %vm1127_vm2, %v991_v16  ;;  %3057 = vmatmul.msk.f32.gmra.mxu2 %vm1127_vm2, %v991_v16  ;;  %v6629_v16 = vld [vmem:[#allocation54_spill] sm:$0xff] }
 0x3c4   :  { %1603 = vmatpush.msrb.mxu3 %v6621_v19  ;;  %1632 = vmatpush.msrb.mxu0 %v6622_v28  ;;  %v6632_v19 = vld [vmem:[#allocation57_spill] sm:$0xff]  ;;  %v6633_v28 = vld [vmem:[#allocation58_spill] sm:$0xff] }
 0x3c6   :  { %1604 = vmatpush.msrb.mxu3 %v6623_v10  ;;  %1633 = vmatpush.msrb.mxu0 %v6624_v55  ;;  %v6634_v10 = vld [vmem:[#allocation59_spill] sm:$0xff]  ;;  %v6635_v55 = vld [vmem:[#allocation60_spill] sm:$0xff] }
 0x3c8   :  { %1605 = vmatpush.msrb.mxu3 %v6625_v18  ;;  %1634 = vmatpush.msrb.mxu0 %v6626_v59  ;;  %v6636_v18 = vld [vmem:[#allocation61_spill] sm:$0xff]  ;;  %v6637_v59 = vld [vmem:[#allocation62_spill] sm:$0xff] }
 0x3ca   :  { %1606 = vmatpush.msrb.mxu3 %v6627_v40  ;;  %1635 = vmatpush.msrb.mxu0 %v6628_v8  ;;  %v6638_v40 = vld [vmem:[#allocation63_spill] sm:$0xff]  ;;  %v6639_v8 = vld [vmem:[#allocation64_spill] sm:$0xff] }
 0x3cc   :  { %1607 = vmatpush.msrb.mxu3 %v6629_v16  ;;  %1636 = vmatpush.msrb.mxu0 %v6630_v45  ;;  %v6640_v16 = vld [vmem:[#allocation65_spill] sm:$0xff] }
 0x3ce   :  { %1608 = vmatpush.msrb.mxu3 %v6631_v4  ;;  %1637 = vmatpush.msrb.mxu0 %v6632_v19 }
 0x3d0   :  { %1609 = vmatpush.msrb.mxu3 %v6633_v28  ;;  %1638 = vmatpush.msrb.mxu0 %v6634_v10 }
 0x3d2   :  { %1610 = vmatpush.msrb.mxu3 %v6635_v55  ;;  %1639 = vmatpush.msrb.mxu0 %v6636_v18 }
 0x3d4   :  { %1611 = vmatpush.msrb.mxu3 %v6637_v59  ;;  %1640 = vmatpush.msrb.mxu0 %v6638_v40 }
 0x3d6   :  { %1612 = vmatpush.msrb.mxu3 %v6639_v8  ;;  %1641 = vmatpush.msrb.mxu0 %v6640_v16 }
 0x3d8   :  { %1613 = vmatpush.msrb.mxu3 %v4550_v54  ;;  %1642 = vmatpush.msrb.mxu0 %v4555_v52 }
 0x3da   :  { %1614 = vmatpush.msrb.mxu3 %v4564_v17  ;;  %1643 = vmatpush.msrb.mxu0 %v4569_v57 }
 0x402   :  { %v4737_v10 = vpop.f32.mrf.mxu1 }
 0x407   :  { %v4739_v19 = vpop.f32.mrf.mxu2 }
 0x408   :  { %6641 = vst [vmem:[#allocation28_spill] sm:$0xff] %v4739_v19  ;;  %v6643_v19 = vld [vmem:[#allocation2_spill] sm:$0xff] }
 0x40b   :  { %v4741_v18 = vpop.f32.mrf.mxu1 }
 0x411   :  { %v4743_v45 = vpop.f32.mrf.mxu2 }
 0x414   :  { %v4745_v40 = vpop.f32.mrf.mxu1 }
 0x415   :  { %6642 = vst [vmem:[#allocation30_spill] sm:$0xff] %v4745_v40 }
 0x41a   :  { %v4747_v8 = vpop.f32.mrf.mxu2 }
 0x41d   :  { %v4749_v16 = vpop.f32.mrf.mxu1 }
 0x423   :  { %v4751_v54 = vpop.f32.mrf.mxu2 }
 0x426   :  { %v4753_v52 = vpop.f32.mrf.mxu1 }
 0x427   :  { %1481 = vmatmul.f32.vlgmr.msra.gmra.mxu3 %v4753_v52  ;;  %1548 = vmatmul.f32.vlgmr.msrb.gmra.mxu1 %v4753_v52 }
 0x428   :  { %1736 = vmatpush.msra.mxu3 %v4155_v12  ;;  %1803 = vmatpush.msrb.mxu1 %v6643_v19  ;;  %v6644_v19 = vld [vmem:[#allocation3_spill] sm:$0xff] }
 0x42a   :  { %1737 = vmatpush.msra.mxu3 %v4166_v29  ;;  %1804 = vmatpush.msrb.mxu1 %v3895_v1  ;;  %v6645_v1 = vld [vmem:[#allocation4_spill] sm:$0xff] }
 0x42b   :  { %v6662_v29 = vld [vmem:[#allocation48_spill] sm:$0xff] }
 0x42c   :  { %v4761_v40 = vpop.f32.mrf.mxu2  ;;  %1738 = vmatpush.msra.mxu3 %v4183_v48  ;;  %1805 = vmatpush.msrb.mxu1 %v3901_v20  ;;  %v6665_v48 = vld [vmem:[#allocation41_spill] sm:$0xff] }
 0x42d   :  { %1510 = vmatmul.f32.vlgmr.msra.gmra.mxu0 %v4761_v40  ;;  %1577 = vmatmul.f32.vlgmr.msra.gmra.mxu2 %v4761_v40 }
 0x42e   :  { %1739 = vmatpush.msra.mxu3 %v4201_v11  ;;  %1765 = vmatpush.msra.mxu0 %v4177_v49  ;;  %v6664_v49 = vld [vmem:[#allocation50_spill] sm:$0xff]  ;;  %v6667_v11 = vld [vmem:[#allocation11_spill] sm:$0xff] }
 0x42f   :  { %v4769_v12 = vpop.f32.mrf.mxu1  ;;  %1832 = vmatpush.msra.mxu2 %v6644_v19  ;;  %1806 = vmatpush.msrb.mxu1 %v3907_v6  ;;  %v6646_v6 = vld [vmem:[#allocation5_spill] sm:$0xff] }
 0x430   :  { %1484 = vmatmul.f32.gmra.mxu3 %v4769_v12  ;;  %1551 = vmatmul.f32.gmra.mxu1 %v4769_v12 }
 0x431   :  { %1740 = vmatpush.msra.mxu3 %v4213_v33  ;;  %1766 = vmatpush.msra.mxu0 %v4194_v2  ;;  %v6666_v2 = vld [vmem:[#allocation52_spill] sm:$0xff]  ;;  %v6669_v33 = vld [vmem:[#allocation54_spill] sm:$0xff] }
 0x432   :  { %1833 = vmatpush.msra.mxu2 %v3926_v53  ;;  %1807 = vmatpush.msrb.mxu1 %v3921_v27 }
 0x433   :  { %1741 = vmatpush.msra.mxu3 %v4225_v7  ;;  %1767 = vmatpush.msra.mxu0 %v4206_v43  ;;  %v6668_v43 = vld [vmem:[#allocation43_spill] sm:$0xff]  ;;  %v995_v7 = vld [vmem:[%s6299_s6 + $0x58] sm:$0xff] }
 0x434   :  { %1834 = vmatpush.msra.mxu2 %v6645_v1  ;;  %1808 = vmatpush.msrb.mxu1 %v3935_v24  ;;  %v6647_v24 = vld [vmem:[#allocation6_spill] sm:$0xff] }
 0x435   :  { %v4783_v20 = vpop.f32.mrf.mxu2  ;;  %1742 = vmatpush.msra.mxu3 %v4237_v47  ;;  %1768 = vmatpush.msra.mxu0 %v4219_v21  ;;  %v6670_v21 = vld [vmem:[#allocation45_spill] sm:$0xff] }
 0x436   :  { %1513 = vmatmul.f32.gmra.mxu0 %v4783_v20  ;;  %1580 = vmatmul.f32.gmra.mxu2 %v4783_v20  ;;  %v6672_v47 = vld [vmem:[#allocation49_spill] sm:$0xff] }
 0x437   :  { %1743 = vmatpush.msra.mxu3 %v4253_v46  ;;  %1835 = vmatpush.msra.mxu2 %v6646_v6  ;;  %v6674_v46 = vld [vmem:[#allocation64_spill] sm:$0xff] }
 0x438   :  { %v4791_v27 = vpop.f32.mrf.mxu1  ;;  %1769 = vmatpush.msra.mxu0 %v4231_v3  ;;  %1809 = vmatpush.msrb.mxu1 %v3947_v38  ;;  %v6671_v3 = vld [vmem:[#allocation47_spill] sm:$0xff] }
 0x439   :  { %1487 = vmatmul.f32.gmra.mxu3 %v4791_v27  ;;  %1554 = vmatmul.f32.gmra.mxu1 %v4791_v27 }
 0x43a   :  { %1744 = vmatpush.msra.mxu3 %v4266_v58  ;;  %1836 = vmatpush.msra.mxu2 %v3964_v15  ;;  %v6663_v58 = vld [vmem:[#allocation10_spill] sm:$0xff] }
 0x43b   :  { %1770 = vmatpush.msra.mxu0 %v4247_v50  ;;  %1810 = vmatpush.msrb.mxu1 %v3959_v31  ;;  %v6648_v31 = vld [vmem:[#allocation7_spill] sm:$0xff] }
 0x43c   :  { %1745 = vmatpush.msra.mxu3 %v4278_v30  ;;  %1837 = vmatpush.msra.mxu2 %v3978_v56  ;;  %v6649_v56 = vld [vmem:[#allocation8_spill] sm:$0xff]  ;;  %v6673_v50 = vld [vmem:[#allocation51_spill] sm:$0xff] }
 0x43d   :  { %1771 = vmatpush.msra.mxu0 %v4259_v36  ;;  %1811 = vmatpush.msrb.mxu1 %v3973_v42  ;;  %v992_v42 = vld [vmem:[%s6299_s6 + $0x40] sm:$0xff]  ;;  %v994_v30 = vld [vmem:[%s6299_s6 + $0x50] sm:$0xff]  ;;  %v6675_v36 = vld [vmem:[#allocation53_spill] sm:$0xff] }
 0x43e   :  { %v4805_v53 = vpop.f32.mrf.mxu2  ;;  %1746 = vmatpush.msra.mxu3 %v4290_v5  ;;  %1838 = vmatpush.msra.mxu2 %v6647_v24  ;;  %v6661_v5 = vld [vmem:[#allocation39_spill] sm:$0xff] }
 0x43f   :  { %1516 = vmatmul.f32.gmra.mxu0 %v4805_v53  ;;  %1583 = vmatmul.f32.gmra.mxu2 %v4805_v53 }
 0x440   :  { %v4811_v38 = vpop.f32.mrf.mxu1  ;;  %1747 = vmatpush.msra.mxu3 %v6591_v26  ;;  %1772 = vmatpush.msra.mxu0 %v4272_v35  ;;  %v6656_v26 = vld [vmem:[#allocation14_spill] sm:$0xff]  ;;  %v6659_v35 = vld [vmem:[#allocation37_spill] sm:$0xff] }
 0x441   :  { %1490 = vmatmul.f32.gmra.mxu3 %v4811_v38  ;;  %1557 = vmatmul.f32.gmra.mxu1 %v4811_v38 }
 0x442   :  { %1748 = vmatpush.msra.mxu3 %v6595_v39  ;;  %1839 = vmatpush.msra.mxu2 %v6648_v31  ;;  %v6678_v39 = vld [vmem:[#allocation57_spill] sm:$0xff] }
 0x443   :  { %1773 = vmatpush.msra.mxu0 %v4284_v63  ;;  %1812 = vmatpush.msrb.mxu1 %v3987_v0  ;;  %v993_v0 = vld [vmem:[%s6299_s6 + $0x48] sm:$0xff]  ;;  %v6658_v63 = vld [vmem:[#allocation46_spill] sm:$0xff] }
 0x444   :  { %1749 = vmatpush.msra.mxu3 %v6601_v61  ;;  %1840 = vmatpush.msra.mxu2 %v4016_v14  ;;  %v6651_v14 = vld [vmem:[#allocation42_spill] sm:$0xff]  ;;  %v6680_v61 = vld [vmem:[#allocation61_spill] sm:$0xff] }
 0x445   :  { %1774 = vmatpush.msra.mxu0 %v4300_v34  ;;  %1813 = vmatpush.msrb.mxu1 %v3999_v9  ;;  %v6650_v9 = vld [vmem:[#allocation12_spill] sm:$0xff]  ;;  %v6660_v34 = vld [vmem:[#allocation15_spill] sm:$0xff] }
 0x446   :  { %v1462_v15 = vpop.f32.mrf.mxu2  ;;  %1750 = vmatpush.msra.mxu3 %v6605_v25  ;;  %1841 = vmatpush.msra.mxu2 %v4030_v13  ;;  %v6653_v13 = vld [vmem:[#allocation13_spill] sm:$0xff]  ;;  %v6681_v25 = vld [vmem:[#allocation63_spill] sm:$0xff] }
 0x447   :  { %1519 = vmatmul.f32.gmra.mxu0 %v1462_v15  ;;  %1586 = vmatmul.f32.gmra.mxu2 %v1462_v15 }
 0x448   :  { %1751 = vmatpush.msra.mxu3 %v6609_v51  ;;  %1775 = vmatpush.msra.mxu0 %v4312_v41  ;;  %v6676_v41 = vld [vmem:[#allocation66_spill] sm:$0xff]  ;;  %v6682_v51 = vld [vmem:[#allocation65_spill] sm:$0xff] }
 0x449   :  { %1615 = vmatmul.f32.vlgmr.msrb.gmra.mxu3 %v4753_v52  ;;  %3058 = vmatmul.msk.f32.vlgmr.msra.gmra.mxu1 %vm1127_vm2, %v992_v42  ;;  %v6657_v52 = vld [vmem:[#allocation9_spill] sm:$0xff] }
 0x44a   :  { %1842 = vmatpush.msra.mxu2 %v4042_v32  ;;  %1870 = vmatpush.msrb.mxu3 %v6613_v22  ;;  %v6654_v32 = vld [vmem:[#allocation44_spill] sm:$0xff]  ;;  %v6683_v22 = vld [vmem:[#allocation67_spill] sm:$0xff] }
 0x44b   :  { %1776 = vmatpush.msra.mxu0 %v6592_v37  ;;  %1814 = vmatpush.msrb.mxu1 %v4011_v62  ;;  %v6652_v62 = vld [vmem:[#allocation34_spill] sm:$0xff]  ;;  %v6677_v37 = vld [vmem:[#allocation55_spill] sm:$0xff] }
 0x44c   :  { %1843 = vmatpush.msra.mxu2 %v4054_v44  ;;  %1871 = vmatpush.msrb.mxu3 %v6615_v60  ;;  %v6655_v44 = vld [vmem:[#allocation35_spill] sm:$0xff] }
 0x44d   :  { %1777 = vmatpush.msra.mxu0 %v6596_v23  ;;  %1815 = vmatpush.msrb.mxu1 %v6649_v56  ;;  %v6679_v23 = vld [vmem:[#allocation59_spill] sm:$0xff] }
 0x44e   :  { %1844 = vmatpush.msra.mxu2 %v6650_v9  ;;  %1872 = vmatpush.msrb.mxu3 %v6651_v14 }
 0x44f   :  { %1644 = vmatmul.f32.vlgmr.msrb.gmra.mxu0 %v4761_v40  ;;  %3062 = vmatmul.msk.f32.vlgmr.msrb.gmra.mxu2 %vm1127_vm2, %v992_v42 }
 0x450   :  { %1778 = vmatpush.msra.mxu0 %v6652_v62  ;;  %1845 = vmatpush.msra.mxu2 %v6653_v13 }
 0x451   :  { %1618 = vmatmul.f32.gmra.mxu3 %v4769_v12  ;;  %3059 = vmatmul.msk.f32.gmra.mxu1 %vm1127_vm2, %v993_v0 }
 0x452   :  { %1873 = vmatpush.msrb.mxu3 %v6654_v32  ;;  %1779 = vmatpush.msra.mxu0 %v6655_v44 }
 0x453   :  { %1846 = vmatpush.msra.mxu2 %v6656_v26  ;;  %1816 = vmatpush.msrb.mxu1 %v6657_v52 }
 0x454   :  { %1874 = vmatpush.msrb.mxu3 %v6658_v63  ;;  %1780 = vmatpush.msra.mxu0 %v6659_v35 }
 0x455   :  { %1847 = vmatpush.msra.mxu2 %v6660_v34  ;;  %1817 = vmatpush.msrb.mxu1 %v6663_v58 }
 0x456   :  { %1899 = vmatpush.msrb.mxu0 %v6661_v5  ;;  %1875 = vmatpush.msrb.mxu3 %v6662_v29 }
 0x457   :  { %1647 = vmatmul.f32.gmra.mxu0 %v4783_v20  ;;  %3063 = vmatmul.msk.f32.gmra.mxu2 %vm1127_vm2, %v993_v0 }
 0x458   :  { %1876 = vmatpush.msrb.mxu3 %v6664_v49  ;;  %1900 = vmatpush.msrb.mxu0 %v6665_v48 }
 0x459   :  { %1621 = vmatmul.f32.gmra.mxu3 %v4791_v27  ;;  %3060 = vmatmul.msk.f32.gmra.mxu1 %vm1127_vm2, %v994_v30 }
 0x45a   :  { %1877 = vmatpush.msrb.mxu3 %v6666_v2  ;;  %1818 = vmatpush.msrb.mxu1 %v6667_v11 }
 0x45b   :  { %1901 = vmatpush.msrb.mxu0 %v6668_v43 }
 0x45c   :  { %1878 = vmatpush.msrb.mxu3 %v6669_v33 }
 0x45d   :  { %1902 = vmatpush.msrb.mxu0 %v6670_v21 }
 0x45e   :  { %1879 = vmatpush.msrb.mxu3 %v6631_v4  ;;  %v4912_v4 = vpop.f32.mrf.mxu0 }
 0x45f   :  { %1650 = vmatmul.f32.gmra.mxu0 %v4805_v53  ;;  %3064 = vmatmul.msk.f32.gmra.mxu2 %vm1127_vm2, %v994_v30 }
 0x460   :  { %1880 = vmatpush.msrb.mxu3 %v6633_v28  ;;  %1903 = vmatpush.msrb.mxu0 %v6671_v3  ;;  %v1124_v3 = vld [vmem:[%s6300_s9 + $0xf0] sm:$0xff] }
 0x461   :  { %1624 = vmatmul.f32.gmra.mxu3 %v4811_v38  ;;  %3061 = vmatmul.msk.f32.gmra.mxu1 %vm1127_vm2, %v995_v7 }
 0x462   :  { %1881 = vmatpush.msrb.mxu3 %v6635_v55  ;;  %1904 = vmatpush.msrb.mxu0 %v6672_v47  ;;  %v4908_v55 = vpop.f32.mrf.mxu3  ;;  %v1125_v47 = vld [vmem:[%s6300_s9 + $0xf8] sm:$0xff] }
 0x463   :  { %1951 = vmatpush.msra.mxu1 %v1124_v3  ;;  %1980 = vmatpush.msrb.mxu2 %v1125_v47  ;;  %v1109_v3 = vld [vmem:[%s6300_s9 + $0x78] sm:$0xff]  ;;  %v1106_v47 = vld [vmem:[%s6300_s9 + $0x60] sm:$0xff] }
 0x464   :  { %1882 = vmatpush.msrb.mxu3 %v6637_v59  ;;  %1905 = vmatpush.msrb.mxu0 %v6673_v50  ;;  %v1122_v50 = vld [vmem:[%s6300_s9 + $0xe0] sm:$0xff] }
 0x465   :  { %1952 = vmatpush.msra.mxu1 %v1122_v50  ;;  %v1107_v50 = vld [vmem:[%s6300_s9 + $0x68] sm:$0xff] }
 0x466   :  { %1883 = vmatpush.msrb.mxu3 %v6674_v46  ;;  %1906 = vmatpush.msrb.mxu0 %v6675_v36  ;;  %v4920_v19 = vpop.f32.mrf.mxu0  ;;  %v1123_v46 = vld [vmem:[%s6300_s9 + $0xe8] sm:$0xff] }
 0x467   :  { %1653 = vmatmul.f32.gmra.mxu0 %v1462_v15  ;;  %3065 = vmatmul.msk.f32.gmra.mxu2 %vm1127_vm2, %v995_v7 }
 0x468   :  { %1884 = vmatpush.msrb.mxu3 %v6676_v41  ;;  %1907 = vmatpush.msrb.mxu0 %v6677_v37  ;;  %v1120_v41 = vld [vmem:[%s6300_s9 + $0xd0] sm:$0xff]  ;;  %v1121_v37 = vld [vmem:[%s6300_s9 + $0xd8] sm:$0xff] }
 0x469   :  { %1981 = vmatpush.msrb.mxu2 %v1123_v46  ;;  %1953 = vmatpush.msra.mxu1 %v1120_v41  ;;  %v1104_v46 = vld [vmem:[%s6300_s9 + $0x50] sm:$0xff]  ;;  %v1105_v41 = vld [vmem:[%s6300_s9 + $0x58] sm:$0xff] }
 0x46a   :  { %1885 = vmatpush.msrb.mxu3 %v4564_v17  ;;  %1908 = vmatpush.msrb.mxu0 %v6678_v39  ;;  %v4916_v40 = vpop.f32.mrf.mxu3  ;;  %v1118_v39 = vld [vmem:[%s6300_s9 + $0xc0] sm:$0xff] }
 0x46b   :  { %1982 = vmatpush.msrb.mxu2 %v1121_v37  ;;  %1954 = vmatpush.msra.mxu1 %v1118_v39  ;;  %v1102_v39 = vld [vmem:[%s6300_s9 + $0x40] sm:$0xff] }
 0x46c   :  { %1909 = vmatpush.msrb.mxu0 %v6679_v23  ;;  %v1119_v23 = vld [vmem:[%s6300_s9 + $0xc8] sm:$0xff] }
 0x46d   :  { %1983 = vmatpush.msrb.mxu2 %v1119_v23  ;;  %v1103_v23 = vld [vmem:[%s6300_s9 + $0x48] sm:$0xff] }
 0x46e   :  { %1910 = vmatpush.msrb.mxu0 %v6680_v61  ;;  %v4928_v27 = vpop.f32.mrf.mxu0 }
 0x470   :  { %1911 = vmatpush.msrb.mxu0 %v6681_v25  ;;  %v1116_v25 = vld [vmem:[%s6300_s9 + $0xb0] sm:$0xff] }
 0x471   :  { %1955 = vmatpush.msra.mxu1 %v1116_v25 }
 0x472   :  { %1912 = vmatpush.msrb.mxu0 %v6682_v51  ;;  %v1117_v51 = vld [vmem:[%s6300_s9 + $0xb8] sm:$0xff] }
 0x473   :  { %1984 = vmatpush.msrb.mxu2 %v1117_v51  ;;  %v1100_v51 = vld [vmem:[%s6300_s9 + $0x30] sm:$0xff] }
 0x474   :  { %1913 = vmatpush.msrb.mxu0 %v6683_v22  ;;  %v1114_v22 = vld [vmem:[%s6300_s9 + $0xa0] sm:$0xff] }
 0x475   :  { %1956 = vmatpush.msra.mxu1 %v1114_v22  ;;  %v1101_v22 = vld [vmem:[%s6300_s9 + $0x38] sm:$0xff] }
 0x476   :  { %1914 = vmatpush.msrb.mxu0 %v4569_v57  ;;  %v4924_v57 = vpop.f32.mrf.mxu3  ;;  %v4934_v31 = vpop.f32.mrf.mxu0 }
 0x47e   :  { %v4932_v24 = vpop.f32.mrf.mxu3  ;;  %v4938_v9 = vpop.f32.mrf.mxu0 }
 0x486   :  { %v4936_v42 = vpop.f32.mrf.mxu3  ;;  %v4942_v32 = vpop.f32.mrf.mxu0 }
 0x48e   :  { %v4940_v62 = vpop.f32.mrf.mxu3  ;;  %v4946_v52 = vpop.f32.mrf.mxu0 }
 0x496   :  { %v4944_v44 = vpop.f32.mrf.mxu3  ;;  %v4950_v35 = vpop.f32.mrf.mxu0 }
 0x49e   :  { %v4948_v63 = vpop.f32.mrf.mxu3 }
 0x4a4   :  { %v4904_v28 = vpop.f32.mrf.mxu1 }
 0x4aa   :  { %v4952_v34 = vpop.f32.mrf.mxu3  ;;  %v4954_v5 = vpop.f32.mrf.mxu0 }
 0x4ad   :  { %v4906_v60 = vpop.f32.mrf.mxu1 }
 0x4b0   :  { %v4910_v17 = vpop.f32.mrf.mxu2 }
 0x4b3   :  { %v4956_v30 = vpop.f32.mrf.mxu3  ;;  %v4958_v29 = vpop.f32.mrf.mxu0 }
 0x4b6   :  { %v4914_v59 = vpop.f32.mrf.mxu1 }
 0x4b9   :  { %v4918_v12 = vpop.f32.mrf.mxu2 }
 0x4bc   :  { %v4960_v58 = vpop.f32.mrf.mxu3  ;;  %v4962_v49 = vpop.f32.mrf.mxu0 }
 0x4be   :  { %v4922_v1 = vpop.f32.mrf.mxu1 }
 0x4c2   :  { %v4926_v20 = vpop.f32.mrf.mxu2 }
 0x4c4   :  { %v4964_v48 = vpop.f32.mrf.mxu3  ;;  %v4966_v2 = vpop.f32.mrf.mxu0 }
 0x4c6   :  { %v1695_v6 = vpop.f32.mrf.mxu1 }
 0x4c7   :  { %1752 = vmatmul.f32.vlgmr.msra.gmra.mxu3 %v1695_v6  ;;  %1819 = vmatmul.f32.vlgmr.msrb.gmra.mxu1 %v1695_v6 }
 0x4ca   :  { %v4930_v53 = vpop.f32.mrf.mxu2 }
 0x4cc   :  { %v4968_v11 = vpop.f32.mrf.mxu3  ;;  %v4970_v43 = vpop.f32.mrf.mxu0 }
 0x4ce   :  { %v1698_v38 = vpop.f32.mrf.mxu1 }
 0x4cf   :  { %1755 = vmatmul.f32.gmra.mxu3 %v1698_v38  ;;  %1822 = vmatmul.f32.gmra.mxu1 %v1698_v38 }
 0x4d2   :  { %v1724_v15 = vpop.f32.mrf.mxu2 }
 0x4d3   :  { %1781 = vmatmul.f32.vlgmr.msra.gmra.mxu0 %v1724_v15  ;;  %1848 = vmatmul.f32.vlgmr.msra.gmra.mxu2 %v1724_v15 }
 0x4d4   :  { %v4972_v33 = vpop.f32.mrf.mxu3  ;;  %v4974_v21 = vpop.f32.mrf.mxu0 }
 0x4d6   :  { %v1701_v56 = vpop.f32.mrf.mxu1 }
 0x4d7   :  { %1758 = vmatmul.f32.gmra.mxu3 %v1701_v56  ;;  %1825 = vmatmul.f32.gmra.mxu1 %v1701_v56 }
 0x4da   :  { %v1727_v0 = vpop.f32.mrf.mxu2 }
 0x4db   :  { %1784 = vmatmul.f32.gmra.mxu0 %v1727_v0  ;;  %1851 = vmatmul.f32.gmra.mxu2 %v1727_v0 }
 0x4dc   :  { %v4976_v7 = vpop.f32.mrf.mxu3  ;;  %v4990_v36 = vpop.f32.mrf.mxu0 }
 0x4de   :  { %v1704_v14 = vpop.f32.mrf.mxu1 }
 0x4df   :  { %1761 = vmatmul.f32.gmra.mxu3 %v1704_v14  ;;  %1828 = vmatmul.f32.gmra.mxu1 %v1704_v14 }
 0x4e2   :  { %v1730_v13 = vpop.f32.mrf.mxu2 }
 0x4e3   :  { %1787 = vmatmul.f32.gmra.mxu0 %v1730_v13  ;;  %1854 = vmatmul.f32.gmra.mxu2 %v1730_v13 }
 0x4e4   :  { %v5004_v61 = vpop.f32.mrf.mxu3 }
 0x4e5   :  { %6684 = vst [vmem:[#allocation16_spill] sm:$0xff] %v5004_v61 }
 0x4e7   :  { %1886 = vmatmul.f32.vlgmr.msrb.gmra.mxu3 %v1695_v6  ;;  %v1115_v6 = vld [vmem:[%s6300_s9 + $0xa8] sm:$0xff] }
 0x4e8   :  { %1985 = vmatpush.msrb.mxu2 %v1115_v6  ;;  %v1098_v6 = vld [vmem:[%s6300_s9 + $0x20] sm:$0xff] }
 0x4ea   :  { %v1733_v26 = vpop.f32.mrf.mxu2 }
 0x4eb   :  { %1790 = vmatmul.f32.gmra.mxu0 %v1733_v26  ;;  %1857 = vmatmul.f32.gmra.mxu2 %v1733_v26 }
 0x4ef   :  { %1889 = vmatmul.f32.gmra.mxu3 %v1698_v38  ;;  %v1112_v38 = vld [vmem:[%s6300_s9 + $0x90] sm:$0xff] }
 0x4f0   :  { %1957 = vmatpush.msra.mxu1 %v1112_v38  ;;  %v1099_v38 = vld [vmem:[%s6300_s9 + $0x28] sm:$0xff] }
 0x4f3   :  { %1915 = vmatmul.f32.vlgmr.msrb.gmra.mxu0 %v1724_v15  ;;  %v1113_v15 = vld [vmem:[%s6300_s9 + $0x98] sm:$0xff] }
 0x4f4   :  { %1986 = vmatpush.msrb.mxu2 %v1113_v15  ;;  %v1096_v15 = vld [vmem:[%s6300_s9 + $0x10] sm:$0xff] }
 0x4f7   :  { %1892 = vmatmul.f32.gmra.mxu3 %v1701_v56  ;;  %v5024_v56 = vpop.f32.mrf.mxu0 }
 0x4f8   :  { %6685 = vst [vmem:[#allocation20_spill] sm:$0xff] %v5024_v56 }
 0x4fb   :  { %1918 = vmatmul.f32.gmra.mxu0 %v1727_v0  ;;  %v1110_v0 = vld [vmem:[%s6300_s9 + $0x80] sm:$0xff] }
 0x4fc   :  { %1958 = vmatpush.msra.mxu1 %v1110_v0  ;;  %v1097_v0 = vld [vmem:[%s6300_s9 + $0x18] sm:$0xff] }
 0x4ff   :  { %1895 = vmatmul.f32.gmra.mxu3 %v1704_v14  ;;  %v1111_v14 = vld [vmem:[%s6300_s9 + $0x88] sm:$0xff] }
 0x500   :  { %1987 = vmatpush.msrb.mxu2 %v1111_v14 }
 0x502   :  { %1988 = vmatpush.msrb.mxu2 %v1109_v3  ;;  %v1095_v3 = vld [vmem:[%s6300_s9 + $0x8] sm:$0xff] }
 0x503   :  { %1921 = vmatmul.f32.gmra.mxu0 %v1730_v13 }
 0x504   :  { %1989 = vmatpush.msrb.mxu2 %v1107_v50  ;;  %v1092_v50 = vld [vmem:[%s6301_s8] sm:$0xff] }
 0x506   :  { %1990 = vmatpush.msrb.mxu2 %v1105_v41  ;;  %v5093_v41 = vperm.slane %v1092_v50, 0 }
 0x508   :  { %1991 = vmatpush.msrb.mxu2 %v1103_v23 }
 0x50a   :  { %1992 = vmatpush.msrb.mxu2 %v1101_v22 }
 0x50b   :  { %1924 = vmatmul.f32.gmra.mxu0 %v1733_v26  ;;  %v1108_v26 = vld [vmem:[%s6300_s9 + $0x70] sm:$0xff] }
 0x50c   :  { %1959 = vmatpush.msra.mxu1 %v1108_v26  ;;  %1993 = vmatpush.msrb.mxu2 %v1099_v38  ;;  %v1094_v26 = vld [vmem:[%s6300_s9] sm:$0xff]  ;;  %v5103_v38 = vperm.slane %v1092_v50, 2 }
 0x50e   :  { %1960 = vmatpush.msra.mxu1 %v1106_v47  ;;  %1994 = vmatpush.msrb.mxu2 %v1097_v0 }
 0x510   :  { %1961 = vmatpush.msra.mxu1 %v1104_v46  ;;  %1995 = vmatpush.msrb.mxu2 %v1095_v3  ;;  %v1245_v46 = vadd.f32 %v4912_v4, %v4908_v55  ;;  %v1512_v4 = vadd.f32 %v4954_v5, %v4952_v34  ;;  %v1646_v34 = vadd.f32 %v4970_v43, %v4968_v11  ;;  %v5125_v5 = vperm.slane %v1092_v50, 5 }
 0x511   :  { %v1515_v11 = vadd.f32 %v4958_v29, %v4956_v30  ;;  %v1582_v30 = vadd.f32 %v4918_v12, %v4906_v60  ;;  %v1381_v12 = vadd.f32 %v4946_v52, %v4944_v44 }
 0x512   :  { %1962 = vmatpush.msra.mxu1 %v1102_v39  ;;  %v6686_v39 = vld [vmem:[#allocation28_spill] sm:$0xff] }
 0x513   :  { %v1308_v23 = vadd.f32 %v6686_v39, %v4737_v10  ;;  %v5111_v10 = vperm.slane %v1092_v50, 3 }
 0x514   :  { %1963 = vmatpush.msra.mxu1 %v1100_v51  ;;  %v5097_v51 = vperm.slane %v1092_v50, 1 }
 0x515   :  { %v1524_v56 = vmul.f32 %v5111_v10, %v1512_v4  ;;  %v1251_v4 = vadd.f32 %v4928_v27, %v4924_v57  ;;  %v1649_v57 = vadd.f32 %v4974_v21, %v4972_v33 }
 0x516   :  { %1964 = vmatpush.msra.mxu1 %v1098_v6  ;;  %v1375_v6 = vadd.f32 %v4938_v9, %v4936_v42  ;;  %v1320_v55 = vmul.f32 %v5097_v51, %v1308_v23  ;;  %v1579_v42 = vadd.f32 %v4910_v17, %v4904_v28  ;;  %v5116_v9 = vperm.slane %v1092_v50, 4 }
 0x518   :  { %1965 = vmatpush.msra.mxu1 %v1096_v15  ;;  %v1387_v39 = vmul.f32 %v5103_v38, %v1375_v6  ;;  %v1378_v6 = vadd.f32 %v4942_v32, %v4940_v62  ;;  %v1591_v61 = vmul.f32 %v5116_v9, %v1579_v42  ;;  %v1658_v62 = vmul.f32 %v5125_v5, %v1646_v34 }
 0x51a   :  { %1966 = vmatpush.msra.mxu1 %v1094_v26  ;;  %v1257_v26 = vmul.f32 %v5093_v41, %v1245_v46  ;;  %v1311_v46 = vadd.f32 %v4743_v45, %v4741_v18 }
 0x51c   :  { %v1324_v23 = vadd.f32 %v1320_v55, %v1257_v26  ;;  %v1321_v45 = vmul.f32 %v5097_v51, %v1311_v46  ;;  %v5140_v55 = vperm.slane %v1092_v50, 7 }
 0x51e   :  { %v1391_v17 = vadd.f32 %v1387_v39, %v1324_v23 }
 0x520   :  { %v1528_v26 = vadd.f32 %v1524_v56, %v1391_v17 }
 0x522   :  { %v1595_v39 = vadd.f32 %v1591_v61, %v1528_v26  ;;  %v1259_v61 = vmul.f32 %v5093_v41, %v1251_v4 }
 0x524   :  { %v1662_v42 = vadd.f32 %v1658_v62, %v1595_v39  ;;  %v5175_v62 = vld [vmem:[%s6302_s12 + $0x178] sm:$0xff] }
 0x525   :  { %2256 = vmatpush.msra.mxu2 %v5175_v62 }
 0x544   :  { %v1820_v3 = vpop.f32.mrf.mxu1 }
 0x54a   :  { %v5032_v13 = vpop.f32.mrf.mxu3 }
 0x54c   :  { %v1823_v27 = vpop.f32.mrf.mxu1 }
 0x550   :  { %v1782_v37 = vpop.f32.mrf.mxu0 }
 0x552   :  { %v5058_v25 = vpop.f32.mrf.mxu3 }
 0x556   :  { %v1849_v15 = vpop.f32.mrf.mxu2 }
 0x557   :  { %v1850_v32 = vadd.f32 %v1849_v15, %v1820_v3  ;;  %v6688_v15 = vld [vmem:[#allocation30_spill] sm:$0xff]  ;;  %v1525_v3 = vmul.f32 %v5111_v10, %v1515_v11 }
 0x558   :  { %v5078_v14 = vpop.f32.mrf.mxu0 }
 0x559   :  { %v1862_v46 = vmul.f32 %v5140_v55, %v1850_v32  ;;  %v1786_v17 = vadd.f32 %v5078_v14, %v5058_v25  ;;  %v1254_v25 = vadd.f32 %v4934_v31, %v4932_v24  ;;  %v1389_v14 = vmul.f32 %v5103_v38, %v1381_v12 }
 0x55a   :  { %v5086_v47 = vpop.f32.mrf.mxu3  ;;  %v1652_v24 = vadd.f32 %v4990_v36, %v4976_v7 }
 0x560   :  { %v5099_v22 = vpop.f32.mrf.mxu0 }
 0x561   :  { %v1789_v7 = vadd.f32 %v5099_v22, %v5086_v47  ;;  %v1588_v47 = vadd.f32 %v4930_v53, %v4922_v1 }
 0x562   :  { %v5105_v0 = vpop.f32.mrf.mxu3 }
 0x563   :  { %6687 = vst [vmem:[#allocation29_spill] sm:$0xff] %v5105_v0  ;;  %v1248_v0 = vadd.f32 %v4920_v19, %v4916_v40  ;;  %v1783_v40 = vadd.f32 %v1782_v37, %v5032_v13  ;;  %v5133_v19 = vperm.slane %v1092_v50, 6  ;;  %v1388_v13 = vmul.f32 %v5103_v38, %v1378_v6  ;;  %v1852_v37 = vpop.f32.mrf.mxu2 }
 0x564   :  { %v1314_v50 = vadd.f32 %v4747_v8, %v6688_v15  ;;  %v1592_v8 = vmul.f32 %v5116_v9, %v1582_v30  ;;  %v1853_v26 = vadd.f32 %v1852_v37, %v1823_v27  ;;  %v1317_v37 = vadd.f32 %v4751_v54, %v4749_v16  ;;  %v1826_v54 = vpop.f32.mrf.mxu1 }
 0x565   :  { %v1258_v18 = vmul.f32 %v5093_v41, %v1248_v0  ;;  %v1093_v0 = vld [vmem:[%s6301_s8 + $0x8] sm:$0x3]  ;;  %v1795_v29 = vmul.f32 %v5133_v19, %v1783_v40  ;;  %v1796_v32 = vmul.f32 %v5133_v19, %v1786_v17  ;;  %v1260_v30 = vmul.f32 %v5093_v41, %v1254_v25 }
 0x566   :  { %v5157_v23 = vperm.slane %v1093_v0, 0  ;;  %v1322_v21 = vmul.f32 %v5097_v51, %v1314_v50  ;;  %v5170_v52 = vperm.slane %v1093_v0, 1  ;;  %v1521_v41 = vadd.f32 %v4966_v2, %v4964_v48  ;;  %v6689_v2 = vld [vmem:[#allocation16_spill] sm:$0xff] }
 0x567   :  { %v1325_v56 = vadd.f32 %v1321_v45, %v1258_v18  ;;  %v1799_v6 = vadd.f32 %v1795_v29, %v1662_v42  ;;  %v1518_v18 = vadd.f32 %v4962_v49, %v4960_v58  ;;  %v1659_v45 = vmul.f32 %v5125_v5, %v1649_v57 }
 0x568   :  { %v5129_v28 = vpop.f32.mrf.mxu0  ;;  %v1585_v58 = vadd.f32 %v4926_v20, %v4914_v59  ;;  %v1863_v59 = vmul.f32 %v5140_v55, %v1853_v26  ;;  %v1323_v57 = vmul.f32 %v5097_v51, %v1317_v37  ;;  %v1660_v42 = vmul.f32 %v5125_v5, %v1652_v24 }
 0x569   :  { %v1392_v60 = vadd.f32 %v1388_v13, %v1325_v56  ;;  %v1866_v11 = vadd.f32 %v1862_v46, %v1799_v6  ;;  %v1326_v13 = vadd.f32 %v1322_v21, %v1259_v61  ;;  %v1526_v0 = vmul.f32 %v5111_v10, %v1518_v18 }
 0x56a   :  { %v1887_v43 = vpop.f32.mrf.mxu3  ;;  %v1384_v56 = vadd.f32 %v4950_v35, %v4948_v63  ;;  %v1593_v15 = vmul.f32 %v5116_v9, %v1585_v58  ;;  %v1797_v51 = vmul.f32 %v5133_v19, %v1789_v7  ;;  %v1327_v12 = vadd.f32 %v1323_v57, %v1260_v30  ;;  %v5272_v7 = vld [vmem:[%s6302_s12 + $0x130] sm:$0xff]  ;;  %v5290_v57 = vld [vmem:[%s6302_s12 + $0x118] sm:$0xff] }
 0x56b   :  { %v1529_v40 = vadd.f32 %v1525_v3, %v1392_v60  ;;  %v1855_v31 = vpop.f32.mrf.mxu2  ;;  %v1393_v29 = vadd.f32 %v1389_v14, %v1326_v13  ;;  %v1527_v48 = vmul.f32 %v5111_v10, %v1521_v41  ;;  %6694 = vst [vmem:[#allocation22_spill] sm:$0xff] %v5290_v57  ;;  %v5302_v41 = vld [vmem:[%s6302_s12 + $0x108] sm:$0xff] }
 0x56c   :  { %v1856_v63 = vadd.f32 %v1855_v31, %v1826_v54  ;;  %v1390_v61 = vmul.f32 %v5103_v38, %v1384_v56  ;;  %v1829_v14 = vpop.f32.mrf.mxu1  ;;  %v5230_v56 = vld [vmem:[%s6302_s12 + $0x168] sm:$0xff]  ;;  %6696 = vst [vmem:[#allocation24_spill] sm:$0xff] %v5302_v41 }
 0x56d   :  { %v1530_v27 = vadd.f32 %v1526_v0, %v1393_v29  ;;  %v5254_v54 = vld [vmem:[%s6302_s12 + $0x148] sm:$0xff] }
 0x56e   :  { %v1394_v38 = vadd.f32 %v1390_v61, %v1327_v12 }
 0x56f   :  { %v1597_v22 = vadd.f32 %v1593_v15, %v1530_v27  ;;  %v5248_v15 = vld [vmem:[%s6302_s12 + $0x150] sm:$0xff] }
 0x570   :  { %v1916_v34 = vpop.f32.mrf.mxu0  ;;  %v5296_v27 = vld [vmem:[%s6302_s12 + $0x110] sm:$0xff] }
 0x571   :  { %v1917_v33 = vadd.f32 %v1916_v34, %v1887_v43  ;;  %v1596_v43 = vadd.f32 %v1592_v8, %v1529_v40  ;;  %v6690_v34 = vld [vmem:[#allocation20_spill] sm:$0xff]  ;;  %v1664_v17 = vadd.f32 %v1660_v42, %v1597_v22  ;;  %v1594_v40 = vmul.f32 %v5116_v9, %v1588_v47  ;;  %6695 = vst [vmem:[#allocation18_spill] sm:$0xff] %v5296_v27  ;;  %v5308_v42 = vld [vmem:[%s6302_s12 + $0x100] sm:$0xff] }
 0x572   :  { %v1890_v49 = vpop.f32.mrf.mxu3  ;;  %v1655_v8 = vadd.f32 %v6690_v34, %v6689_v2  ;;  %6697 = vst [vmem:[#allocation31_spill] sm:$0xff] %v5308_v42  ;;  %v1126_v22 = vld [vmem:[%s6303_s10] sm:$0x3] }
 0x573   :  { %v1929_v44 = vmul.f32 %v5157_v23, %v1917_v33  ;;  %v1663_v39 = vadd.f32 %v1659_v45, %v1596_v43  ;;  %v1864_v33 = vmul.f32 %v5140_v55, %v1856_v63  ;;  %v1858_v1 = vpop.f32.mrf.mxu2  ;;  %v1801_v18 = vadd.f32 %v1797_v51, %v1664_v17  ;;  %v6691_v45 = vld [vmem:[#allocation29_spill] sm:$0xff] }
 0x574   :  { %v1661_v25 = vmul.f32 %v5125_v5, %v1655_v8 }
 0x575   :  { %v1933_v4 = vadd.f32 %v1929_v44, %v1866_v11  ;;  %v1800_v50 = vadd.f32 %v1796_v32, %v1663_v39  ;;  %v1792_v11 = vadd.f32 %v5129_v28, %v6691_v45  ;;  %v1531_v44 = vadd.f32 %v1527_v48, %v1394_v38  ;;  %v5328_v38 = vld [vmem:[%s6302_s12 + $0xf0] sm:$0xff]  ;;  %v5343_v45 = vld [vmem:[%s6302_s12 + $0xe8] sm:$0xff] }
 0x576   :  { %v1868_v58 = vadd.f32 %v1864_v33, %v1801_v18  ;;  %v1948_v33 = vperm.slane %v1126_v22, 1  ;;  %6701 = vst [vmem:[#allocation21_spill] sm:$0xff] %v5343_v45 }
 0x577   :  { %v1938_v20 = vadd.f32 %v5170_v52, %v1933_v4  ;;  %v1867_v46 = vadd.f32 %v1863_v59, %v1800_v50  ;;  %v1598_v32 = vadd.f32 %v1594_v40, %v1531_v44  ;;  %v1798_v9 = vmul.f32 %v5133_v19, %v1792_v11  ;;  %v5266_v50 = vld [vmem:[%s6302_s12 + $0x138] sm:$0xff]  ;;  %v5348_v11 = vld [vmem:[%s6302_s12 + $0x70] sm:$0xff] }
 0x578   :  { %v1919_v16 = vpop.f32.mrf.mxu0 }
 0x579   :  { %v1942_v36 = vmax.f32 %v1938_v20, 0.0  ;;  %v1920_v3 = vadd.f32 %v1919_v16, %v1890_v49  ;;  %v1859_v49 = vadd.f32 %v1858_v1, %v1829_v14  ;;  %v1665_v13 = vadd.f32 %v1661_v25, %v1598_v32  ;;  %v5260_v16 = vld [vmem:[%s6302_s12 + $0x140] sm:$0xff]  ;;  %v5334_v1 = vld [vmem:[%s6302_s12 + $0x78] sm:$0xff] }
 0x57a   :  { %v1893_v6 = vpop.f32.mrf.mxu3  ;;  %2207 = vmatpush.msra.mxu0 %v5334_v1  ;;  %v2017_v25 = vld [vmem:[%s6304_s11] sm:$0xff] }
 0x57b   :  { %v1930_v35 = vmul.f32 %v5157_v23, %v1920_v3  ;;  %1967 = vmatmul.f32.vlgmr.msra.gmra.mxu1 %v1942_v36  ;;  %1996 = vmatmul.f32.vlgmr.msrb.gmra.mxu2 %v1942_v36  ;;  %v1865_v37 = vmul.f32 %v5140_v55, %v1859_v49  ;;  %v1802_v31 = vadd.f32 %v1798_v9, %v1665_v13  ;;  %v5224_v55 = vld [vmem:[%s6302_s12 + $0x170] sm:$0xff]  ;;  %v5278_v36 = vld [vmem:[%s6302_s12 + $0x128] sm:$0xff]  ;;  %v5284_v3 = vld [vmem:[%s6302_s12 + $0x120] sm:$0xff] }
 0x57c   :  { %2257 = vmatpush.msra.mxu2 %v5224_v55  ;;  %6692 = vst [vmem:[#allocation32_spill] sm:$0xff] %v5278_v36  ;;  %v5364_v14 = vld [vmem:[%s6302_s12 + $0xe0] sm:$0xff]  ;;  %2208 = vmatpush.msra.mxu0 %v5348_v11  ;;  %v5393_v13 = vld [vmem:[%s6302_s12 + $0xd0] sm:$0xff] }
 0x57d   :  { %v1934_v60 = vadd.f32 %v1930_v35, %v1867_v46  ;;  %v1869_v59 = vadd.f32 %v1865_v37, %v1802_v31  ;;  %6693 = vst [vmem:[#allocation17_spill] sm:$0xff] %v5284_v3  ;;  %v5385_v32 = vld [vmem:[%s6302_s12 + $0x60] sm:$0xff]  ;;  %v5400_v37 = vld [vmem:[%s6302_s12 + $0x58] sm:$0xff] }
 0x57e   :  { %2258 = vmatpush.msra.mxu2 %v5230_v56 }
 0x57f   :  { %v1939_v21 = vadd.f32 %v5170_v52, %v1934_v60  ;;  %v1947_v60 = vperm.slane %v1126_v22, 0  ;;  %v5493_v22 = vld [vmem:[%s6302_s12 + $0xa0] sm:$0xff] }
 0x580   :  { %v1922_v53 = vpop.f32.mrf.mxu0  ;;  %6707 = vst [vmem:[#allocation40_spill] sm:$0xff] %v5493_v22 }
 0x581   :  { %v1923_v26 = vadd.f32 %v1922_v53, %v1893_v6  ;;  %v1943_v10 = vmax.f32 %v1939_v21, 0.0  ;;  %v5319_v6 = vld [vmem:[%s6302_s12 + $0xf8] sm:$0xff] }
 0x582   :  { %v1896_v0 = vpop.f32.mrf.mxu3  ;;  %2230 = vmatpush.msrb.mxu1 %v5319_v6 }
 0x583   :  { %v1931_v43 = vmul.f32 %v5157_v23, %v1923_v26  ;;  %1970 = vmatmul.f32.gmra.mxu1 %v1943_v10  ;;  %1999 = vmatmul.f32.gmra.mxu2 %v1943_v10 }
 0x584   :  { %2231 = vmatpush.msrb.mxu1 %v5328_v38 }
 0x585   :  { %v1935_v4 = vadd.f32 %v1931_v43, %v1868_v58  ;;  %v5371_v58 = vld [vmem:[%s6302_s12 + $0x68] sm:$0xff]  ;;  %v5378_v43 = vld [vmem:[%s6302_s12 + $0xd8] sm:$0xff] }
 0x586   :  { %2232 = vmatpush.msrb.mxu1 %v5343_v45  ;;  %2209 = vmatpush.msra.mxu0 %v5371_v58 }
 0x587   :  { %v1940_v28 = vadd.f32 %v5170_v52, %v1935_v4 }
 0x588   :  { %v1925_v24 = vpop.f32.mrf.mxu0  ;;  %2233 = vmatpush.msrb.mxu1 %v5364_v14  ;;  %2210 = vmatpush.msra.mxu0 %v5385_v32 }
 0x589   :  { %v1926_v5 = vadd.f32 %v1925_v24, %v1896_v0  ;;  %v1944_v39 = vmax.f32 %v1940_v28, 0.0  ;;  %v5408_v0 = vld [vmem:[%s6302_s12 + $0xc8] sm:$0xff]  ;;  %v5415_v24 = vld [vmem:[%s6302_s12 + $0x50] sm:$0xff] }
 0x58a   :  { %2234 = vmatpush.msrb.mxu1 %v5378_v43  ;;  %2211 = vmatpush.msra.mxu0 %v5400_v37 }
 0x58b   :  { %v1932_v20 = vmul.f32 %v5157_v23, %v1926_v5  ;;  %1973 = vmatmul.f32.gmra.mxu1 %v1944_v39  ;;  %2002 = vmatmul.f32.gmra.mxu2 %v1944_v39  ;;  %v5236_v23 = vld [vmem:[%s6302_s12 + $0x160] sm:$0xff]  ;;  %v2018_v5 = vld [vmem:[%s6304_s11 + $0x8] sm:$0xff] }
 0x58c   :  { %2259 = vmatpush.msra.mxu2 %v5236_v23  ;;  %2235 = vmatpush.msrb.mxu1 %v5393_v13  ;;  %v5426_v39 = vld [vmem:[%s6302_s12 + $0xc0] sm:$0xff] }
 0x58d   :  { %v1936_v30 = vadd.f32 %v1932_v20, %v1869_v59  ;;  %6703 = vst [vmem:[#allocation36_spill] sm:$0xff] %v5426_v39  ;;  %v5433_v59 = vld [vmem:[%s6302_s12 + $0x48] sm:$0xff]  ;;  %v5438_v20 = vld [vmem:[%s6302_s12 + $0x1f8] sm:$0xff]  ;;  %2212 = vmatpush.msra.mxu0 %v5415_v24 }
 0x58e   :  { %2236 = vmatpush.msrb.mxu1 %v5408_v0 }
 0x58f   :  { %v1941_v29 = vadd.f32 %v5170_v52, %v1936_v30  ;;  %v5242_v52 = vld [vmem:[%s6302_s12 + $0x158] sm:$0xff]  ;;  %2213 = vmatpush.msra.mxu0 %v5433_v59 }
 0x590   :  { %2260 = vmatpush.msra.mxu2 %v5242_v52  ;;  %v5444_v30 = vld [vmem:[%s6302_s12 + $0xb8] sm:$0xff]  ;;  %2237 = vmatpush.msrb.mxu1 %v5426_v39 }
 0x591   :  { %v1945_v19 = vmax.f32 %v1941_v29, 0.0  ;;  %v5452_v29 = vld [vmem:[%s6302_s12 + $0x40] sm:$0xff] }
 0x592   :  { %2261 = vmatpush.msra.mxu2 %v5248_v15  ;;  %6704 = vst [vmem:[#allocation23_spill] sm:$0xff] %v5452_v29  ;;  %2238 = vmatpush.msrb.mxu1 %v5444_v30 }
 0x593   :  { %1976 = vmatmul.f32.gmra.mxu1 %v1945_v19  ;;  %2005 = vmatmul.f32.gmra.mxu2 %v1945_v19  ;;  %v5457_v19 = vld [vmem:[%s6302_s12 + $0x1f0] sm:$0xff] }
 0x594   :  { %2262 = vmatpush.msra.mxu2 %v5254_v54  ;;  %2214 = vmatpush.msra.mxu0 %v5452_v29 }
 0x596   :  { %2263 = vmatpush.msra.mxu2 %v5260_v16 }
 0x598   :  { %2264 = vmatpush.msra.mxu2 %v5266_v50 }
 0x59a   :  { %2265 = vmatpush.msra.mxu2 %v5272_v7 }
 0x59c   :  { %2266 = vmatpush.msra.mxu2 %v5278_v36  ;;  %v5731_v36 = vld [vmem:[%s6302_s12 + $0x1a8] sm:$0xff] }
 0x59d   :  { %6733 = vst [vmem:[#allocation50_spill] sm:$0xff] %v5731_v36 }
 0x59e   :  { %2267 = vmatpush.msra.mxu2 %v5284_v3  ;;  %v5695_v3 = vld [vmem:[%s6302_s12 + $0x1b8] sm:$0xff] }
 0x5a0   :  { %2268 = vmatpush.msra.mxu2 %v5290_v57  ;;  %v5683_v57 = vld [vmem:[%s6302_s12 + $0x240] sm:$0xff] }
 0x5a1   :  { %6726 = vst [vmem:[#allocation9_spill] sm:$0xff] %v5683_v57 }
 0x5a2   :  { %2269 = vmatpush.msra.mxu2 %v5296_v27  ;;  %v5673_v27 = vld [vmem:[%s6302_s12 + $0x2c0] sm:$0xff] }
 0x5a3   :  { %6725 = vst [vmem:[#allocation14_spill] sm:$0xff] %v5673_v27 }
 0x5a4   :  { %2270 = vmatpush.msra.mxu2 %v5302_v41  ;;  %v5661_v41 = vld [vmem:[%s6302_s12 + $0x1c8] sm:$0xff] }
 0x5a6   :  { %2271 = vmatpush.msra.mxu2 %v5308_v42  ;;  %v5649_v42 = vld [vmem:[%s6302_s12 + $0x1d0] sm:$0xff] }
 0x5f8   :  { %v1968_v46 = vpop.f32.mrf.mxu1 }
 0x5f9   :  { %v1969_v17 = vadd.f32 %v1968_v46, %v1947_v60  ;;  %v5462_v46 = vld [vmem:[%s6302_s12 + $0xb0] sm:$0xff] }
 0x5fa   :  { %6705 = vst [vmem:[#allocation27_spill] sm:$0xff] %v5462_v46  ;;  %2239 = vmatpush.msrb.mxu1 %v5462_v46 }
 0x5fb   :  { %v5352_v26 = vmax.f32 %v1969_v17, 0.0  ;;  %v5538_v17 = vld [vmem:[%s6302_s12 + $0x10] sm:$0xff] }
 0x5fd   :  { %6702 = vst [vmem:[#allocation26_spill] sm:$0xff] %v5352_v26 }
 0x5fe   :  { %v1997_v63 = vpop.f32.mrf.mxu2 }
 0x5ff   :  { %v1998_v9 = vadd.f32 %v1997_v63, %v1948_v33  ;;  %v5470_v63 = vld [vmem:[%s6302_s12 + $0x38] sm:$0xff] }
 0x600   :  { %v1971_v35 = vpop.f32.mrf.mxu1  ;;  %2215 = vmatpush.msra.mxu0 %v5470_v63 }
 0x601   :  { %v1972_v34 = vadd.f32 %v1971_v35, %v1947_v60  ;;  %v5417_v31 = vmax.f32 %v1998_v9, 0.0  ;;  %v5475_v35 = vld [vmem:[%s6302_s12 + $0x1e8] sm:$0xff]  ;;  %v5582_v9 = vld [vmem:[%s6302_s12 + $0x2e0] sm:$0xff] }
 0x602   :  { %6716 = vst [vmem:[#allocation6_spill] sm:$0xff] %v5582_v9 }
 0x603   :  { %v5336_v53 = vmax.f32 %v1972_v34, 0.0  ;;  %v5531_v34 = vld [vmem:[%s6302_s12 + $0x88] sm:$0xff] }
 0x604   :  { %6711 = vst [vmem:[#allocation62_spill] sm:$0xff] %v5531_v34 }
 0x605   :  { %6700 = vst [vmem:[#allocation33_spill] sm:$0xff] %v5336_v53 }
 0x606   :  { %v2000_v61 = vpop.f32.mrf.mxu2 }
 0x607   :  { %v2001_v49 = vadd.f32 %v2000_v61, %v1948_v33  ;;  %v5480_v61 = vld [vmem:[%s6302_s12 + $0xa8] sm:$0xff] }
 0x608   :  { %v1974_v47 = vpop.f32.mrf.mxu1  ;;  %6706 = vst [vmem:[#allocation38_spill] sm:$0xff] %v5480_v61  ;;  %2240 = vmatpush.msrb.mxu1 %v5480_v61 }
 0x609   :  { %v1975_v48 = vadd.f32 %v1974_v47, %v1947_v60  ;;  %v5402_v28 = vmax.f32 %v2001_v49, 0.0  ;;  %v5488_v47 = vld [vmem:[%s6302_s12 + $0x30] sm:$0xff]  ;;  %v5575_v49 = vld [vmem:[%s6302_s12 + $0x2e8] sm:$0xff] }
 0x60a   :  { %2216 = vmatpush.msra.mxu0 %v5488_v47  ;;  %2241 = vmatpush.msrb.mxu1 %v5493_v22  ;;  %6715 = vst [vmem:[#allocation5_spill] sm:$0xff] %v5575_v49 }
 0x60b   :  { %v5321_v21 = vmax.f32 %v1975_v48, 0.0  ;;  %v5519_v48 = vld [vmem:[%s6302_s12 + $0x90] sm:$0xff] }
 0x60c   :  { %6710 = vst [vmem:[#allocation60_spill] sm:$0xff] %v5519_v48 }
 0x60d   :  { %6699 = vst [vmem:[#allocation25_spill] sm:$0xff] %v5321_v21 }
 0x60e   :  { %v2003_v51 = vpop.f32.mrf.mxu2 }
 0x60f   :  { %v2004_v10 = vadd.f32 %v2003_v51, %v1948_v33  ;;  %v5501_v51 = vld [vmem:[%s6302_s12 + $0x28] sm:$0xff] }
 0x610   :  { %v1977_v12 = vpop.f32.mrf.mxu1  ;;  %6708 = vst [vmem:[#allocation56_spill] sm:$0xff] %v5501_v51  ;;  %2217 = vmatpush.msra.mxu0 %v5501_v51 }
 0x611   :  { %v1978_v2 = vadd.f32 %v1977_v12, %v1947_v60  ;;  %v5387_v4 = vmax.f32 %v2004_v10, 0.0  ;;  %v5506_v60 = vld [vmem:[%s6302_s12 + $0x98] sm:$0xff]  ;;  %v5514_v12 = vld [vmem:[%s6302_s12 + $0x20] sm:$0xff]  ;;  %v5563_v10 = vld [vmem:[%s6302_s12 + $0x2f0] sm:$0xff] }
 0x612   :  { %6709 = vst [vmem:[#allocation58_spill] sm:$0xff] %v5506_v60  ;;  %2242 = vmatpush.msrb.mxu1 %v5506_v60  ;;  %2218 = vmatpush.msra.mxu0 %v5514_v12 }
 0x613   :  { %v5314_v8 = vmax.f32 %v1978_v2, 0.0  ;;  %v5526_v2 = vld [vmem:[%s6302_s12 + $0x18] sm:$0xff]  ;;  %6714 = vst [vmem:[#allocation4_spill] sm:$0xff] %v5563_v10 }
 0x614   :  { %2243 = vmatpush.msrb.mxu1 %v5519_v48  ;;  %2219 = vmatpush.msra.mxu0 %v5526_v2  ;;  %v5790_v48 = vld [vmem:[%s6302_s12 + $0x190] sm:$0xff] }
 0x615   :  { %6698 = vst [vmem:[#allocation19_spill] sm:$0xff] %v5314_v8  ;;  %2173 = vmatpush.msra.mxu3 %v5314_v8  ;;  %2376 = vmatpush.msrb.mxu2 %v5314_v8  ;;  %v5642_v8 = vld [vmem:[%s6302_s12 + $0x258] sm:$0xff] }
 0x616   :  { %v2006_v40 = vpop.f32.mrf.mxu2  ;;  %2244 = vmatpush.msrb.mxu1 %v5531_v34  ;;  %2220 = vmatpush.msra.mxu0 %v5538_v17  ;;  %6722 = vst [vmem:[#allocation13_spill] sm:$0xff] %v5642_v8  ;;  %v5713_v34 = vld [vmem:[%s6302_s12 + $0x1b0] sm:$0xff] }
 0x617   :  { %v2007_v18 = vadd.f32 %v2006_v40, %v1948_v33  ;;  %2174 = vmatpush.msra.mxu3 %v5321_v21  ;;  %2377 = vmatpush.msrb.mxu2 %v5321_v21  ;;  %v5543_v33 = vld [vmem:[%s6302_s12 + $0x80] sm:$0xff]  ;;  %v5550_v40 = vld [vmem:[%s6302_s12 + $0x2f8] sm:$0xff]  ;;  %6730 = vst [vmem:[#allocation39_spill] sm:$0xff] %v5713_v34 }
 0x618   :  { %6712 = vst [vmem:[#allocation2_spill] sm:$0xff] %v5543_v33  ;;  %2245 = vmatpush.msrb.mxu1 %v5543_v33  ;;  %v5630_v21 = vld [vmem:[%s6302_s12 + $0x260] sm:$0xff] }
 0x619   :  { %v5354_v44 = vmax.f32 %v2007_v18, 0.0  ;;  %2175 = vmatpush.msra.mxu3 %v5336_v53  ;;  %2378 = vmatpush.msrb.mxu2 %v5336_v53  ;;  %6713 = vst [vmem:[#allocation3_spill] sm:$0xff] %v5550_v40  ;;  %v5555_v18 = vld [vmem:[%s6302_s12 + $0x8] sm:$0xff]  ;;  %v5678_v33 = vld [vmem:[%s6302_s12 + $0x1c0] sm:$0xff] }
 0x61a   :  { %2330 = vmatpush.msra.mxu1 %v5550_v40  ;;  %2221 = vmatpush.msra.mxu0 %v5555_v18  ;;  %v5600_v53 = vld [vmem:[%s6302_s12 + $0x2c8] sm:$0xff]  ;;  %6721 = vst [vmem:[#allocation34_spill] sm:$0xff] %v5630_v21 }
 0x61b   :  { %2176 = vmatpush.msra.mxu3 %v5352_v26  ;;  %2379 = vmatpush.msrb.mxu2 %v5352_v26  ;;  %v5594_v26 = vld [vmem:[%s6302_s12 + $0x2d0] sm:$0xff]  ;;  %6719 = vst [vmem:[#allocation12_spill] sm:$0xff] %v5600_v53  ;;  %v5666_v40 = vld [vmem:[%s6302_s12 + $0x248] sm:$0xff] }
 0x61c   :  { %3066 = vmatmul.msk.f32.vlgmr.msra.gmra.mxu3 %vm2154_vm3, %v2017_v25  ;;  %2331 = vmatpush.msra.mxu1 %v5563_v10  ;;  %6718 = vst [vmem:[#allocation8_spill] sm:$0xff] %v5594_v26  ;;  %v5654_v10 = vld [vmem:[%s6302_s12 + $0x250] sm:$0xff] }
 0x61d   :  { %2196 = vmatpush.msrb.mxu3 %v5354_v44  ;;  %6723 = vst [vmem:[#allocation44_spill] sm:$0xff] %v5654_v10 }
 0x61e   :  { %2332 = vmatpush.msra.mxu1 %v5575_v49  ;;  %v5637_v49 = vld [vmem:[%s6302_s12 + $0x1d8] sm:$0xff]  ;;  %6724 = vst [vmem:[#allocation35_spill] sm:$0xff] %v5666_v40 }
 0x61f   :  { %2197 = vmatpush.msrb.mxu3 %v5387_v4  ;;  %6743 = vst [vmem:[#allocation64_spill] sm:$0xff] %v5790_v48 }
 0x620   :  { %2333 = vmatpush.msra.mxu1 %v5582_v9  ;;  %v5607_v9 = vld [vmem:[%s6302_s12 + $0x278] sm:$0xff] }
 0x621   :  { %2198 = vmatpush.msrb.mxu3 %v5402_v28 }
 0x623   :  { %2199 = vmatpush.msrb.mxu3 %v5417_v31 }
 0x624   :  { %3067 = vmatmul.msk.f32.gmra.mxu3 %vm2154_vm3, %v2018_v5 }
 0x625   :  { %2279 = vmatpush.msra.mxu3 %v5438_v20 }
 0x627   :  { %2280 = vmatpush.msra.mxu3 %v5457_v19 }
 0x629   :  { %2281 = vmatpush.msra.mxu3 %v5475_v35 }
 0x62c   :  { %3068 = vmatmul.msk.f32.vlgmr.msrb.gmra.mxu3 %vm2154_vm3, %v2017_v25  ;;  %v5568_v25 = vld [vmem:[%s6302_s12] sm:$0xff] }
 0x62d   :  { %2222 = vmatpush.msra.mxu0 %v5568_v25 }
 0x62f   :  { %2307 = vmatpush.msrb.mxu0 %v5607_v9 }
 0x634   :  { %3069 = vmatmul.msk.f32.gmra.mxu3 %vm2154_vm3, %v2018_v5  ;;  %v5588_v5 = vld [vmem:[%s6302_s12 + $0x2d8] sm:$0xff] }
 0x635   :  { %6717 = vst [vmem:[#allocation7_spill] sm:$0xff] %v5588_v5  ;;  %2334 = vmatpush.msra.mxu1 %v5588_v5  ;;  %v5613_v5 = vld [vmem:[%s6302_s12 + $0x270] sm:$0xff] }
 0x636   :  { %2308 = vmatpush.msrb.mxu0 %v5613_v5 }
 0x637   :  { %2335 = vmatpush.msra.mxu1 %v5594_v26  ;;  %v5619_v26 = vld [vmem:[%s6302_s12 + $0x268] sm:$0xff] }
 0x638   :  { %6720 = vst [vmem:[#allocation42_spill] sm:$0xff] %v5619_v26  ;;  %2309 = vmatpush.msrb.mxu0 %v5619_v26 }
 0x639   :  { %2336 = vmatpush.msra.mxu1 %v5600_v53  ;;  %v5625_v53 = vld [vmem:[%s6302_s12 + $0x1e0] sm:$0xff] }
 0x63a   :  { %2282 = vmatpush.msra.mxu3 %v5625_v53  ;;  %2310 = vmatpush.msrb.mxu0 %v5630_v21 }
 0x63b   :  { %2337 = vmatpush.msra.mxu1 %v5673_v27  ;;  %v5708_v27 = vld [vmem:[%s6302_s12 + $0x2b0] sm:$0xff] }
 0x63c   :  { %2283 = vmatpush.msra.mxu3 %v5637_v49  ;;  %2311 = vmatpush.msrb.mxu0 %v5642_v8  ;;  %6729 = vst [vmem:[#allocation15_spill] sm:$0xff] %v5708_v27  ;;  %v5749_v8 = vld [vmem:[%s6302_s12 + $0x1a0] sm:$0xff] }
 0x63d   :  { %6736 = vst [vmem:[#allocation11_spill] sm:$0xff] %v5749_v8 }
 0x63e   :  { %2284 = vmatpush.msra.mxu3 %v5649_v42  ;;  %2312 = vmatpush.msrb.mxu0 %v5654_v10  ;;  %v5701_v10 = vld [vmem:[%s6302_s12 + $0x238] sm:$0xff] }
 0x63f   :  { %6728 = vst [vmem:[#allocation37_spill] sm:$0xff] %v5701_v10 }
 0x640   :  { %2285 = vmatpush.msra.mxu3 %v5661_v41  ;;  %2313 = vmatpush.msrb.mxu0 %v5666_v40  ;;  %v5690_v40 = vld [vmem:[%s6302_s12 + $0x2b8] sm:$0xff] }
 0x641   :  { %6727 = vst [vmem:[#allocation46_spill] sm:$0xff] %v5690_v40  ;;  %2338 = vmatpush.msra.mxu1 %v5690_v40  ;;  %v5726_v40 = vld [vmem:[%s6302_s12 + $0x2a8] sm:$0xff] }
 0x642   :  { %2286 = vmatpush.msra.mxu3 %v5678_v33  ;;  %2314 = vmatpush.msrb.mxu0 %v5683_v57  ;;  %v5719_v57 = vld [vmem:[%s6302_s12 + $0x230] sm:$0xff]  ;;  %6732 = vst [vmem:[#allocation10_spill] sm:$0xff] %v5726_v40 }
 0x643   :  { %6731 = vst [vmem:[#allocation48_spill] sm:$0xff] %v5719_v57  ;;  %2339 = vmatpush.msra.mxu1 %v5708_v27  ;;  %v5744_v27 = vld [vmem:[%s6302_s12 + $0x2a0] sm:$0xff] }
 0x644   :  { %2287 = vmatpush.msra.mxu3 %v5695_v3  ;;  %2315 = vmatpush.msrb.mxu0 %v5701_v10  ;;  %v5737_v10 = vld [vmem:[%s6302_s12 + $0x228] sm:$0xff]  ;;  %6735 = vst [vmem:[#allocation52_spill] sm:$0xff] %v5744_v27 }
 0x645   :  { %6734 = vst [vmem:[#allocation41_spill] sm:$0xff] %v5737_v10  ;;  %2340 = vmatpush.msra.mxu1 %v5726_v40  ;;  %v5761_v40 = vld [vmem:[%s6302_s12 + $0x298] sm:$0xff] }
 0x646   :  { %2288 = vmatpush.msra.mxu3 %v5713_v34  ;;  %2316 = vmatpush.msrb.mxu0 %v5719_v57  ;;  %v5755_v57 = vld [vmem:[%s6302_s12 + $0x220] sm:$0xff]  ;;  %6738 = vst [vmem:[#allocation54_spill] sm:$0xff] %v5761_v40 }
 0x647   :  { %6737 = vst [vmem:[#allocation43_spill] sm:$0xff] %v5755_v57  ;;  %2341 = vmatpush.msra.mxu1 %v5744_v27  ;;  %v5778_v27 = vld [vmem:[%s6302_s12 + $0x218] sm:$0xff] }
 0x648   :  { %2289 = vmatpush.msra.mxu3 %v5731_v36  ;;  %2317 = vmatpush.msrb.mxu0 %v5737_v10  ;;  %v5767_v36 = vld [vmem:[%s6302_s12 + $0x290] sm:$0xff]  ;;  %v5772_v10 = vld [vmem:[%s6302_s12 + $0x198] sm:$0xff]  ;;  %6741 = vst [vmem:[#allocation49_spill] sm:$0xff] %v5778_v27 }
 0x649   :  { %6739 = vst [vmem:[#allocation45_spill] sm:$0xff] %v5767_v36  ;;  %2342 = vmatpush.msra.mxu1 %v5761_v40  ;;  %v5798_v40 = vld [vmem:[%s6302_s12 + $0x210] sm:$0xff] }
 0x64a   :  { %2290 = vmatpush.msra.mxu3 %v5749_v8  ;;  %6740 = vst [vmem:[#allocation47_spill] sm:$0xff] %v5772_v10  ;;  %2318 = vmatpush.msrb.mxu0 %v5755_v57  ;;  %v5785_v8 = vld [vmem:[%s6302_s12 + $0x288] sm:$0xff] }
 0x64b   :  { %6742 = vst [vmem:[#allocation51_spill] sm:$0xff] %v5785_v8  ;;  %2343 = vmatpush.msra.mxu1 %v5767_v36  ;;  %v5803_v57 = vld [vmem:[%s6302_s12 + $0x188] sm:$0xff] }
 0x64c   :  { %2291 = vmatpush.msra.mxu3 %v5772_v10  ;;  %2319 = vmatpush.msrb.mxu0 %v5778_v27  ;;  %6744 = vst [vmem:[#allocation53_spill] sm:$0xff] %v5798_v40  ;;  %v5811_v36 = vld [vmem:[%s6302_s12 + $0x208] sm:$0xff]  ;;  %v5816_v27 = vld [vmem:[%s6302_s12 + $0x280] sm:$0xff] }
 0x64d   :  { %6745 = vst [vmem:[#allocation66_spill] sm:$0xff] %v5803_v57  ;;  %2344 = vmatpush.msra.mxu1 %v5785_v8  ;;  %v5829_v8 = vld [vmem:[%s6302_s12 + $0x200] sm:$0xff] }
 0x64e   :  { %2292 = vmatpush.msra.mxu3 %v5790_v48  ;;  %2320 = vmatpush.msrb.mxu0 %v5798_v40  ;;  %6746 = vst [vmem:[#allocation55_spill] sm:$0xff] %v5811_v36  ;;  %v5821_v48 = vld [vmem:[%s6302_s12 + $0x180] sm:$0xff] }
 0x64f   :  { %6747 = vst [vmem:[#allocation57_spill] sm:$0xff] %v5816_v27  ;;  %2345 = vmatpush.msra.mxu1 %v5816_v27 }
 0x650   :  { %2293 = vmatpush.msra.mxu3 %v5803_v57  ;;  %6748 = vst [vmem:[#allocation59_spill] sm:$0xff] %v5821_v48  ;;  %2321 = vmatpush.msrb.mxu0 %v5811_v36 }
 0x651   :  { %6749 = vst [vmem:[#allocation61_spill] sm:$0xff] %v5829_v8 }
 0x652   :  { %2294 = vmatpush.msra.mxu3 %v5821_v48  ;;  %2322 = vmatpush.msrb.mxu0 %v5829_v8 }
 0x654   :  { %2410 = vmatpush.msrb.mxu3 %v5334_v1 }
 0x656   :  { %2411 = vmatpush.msrb.mxu3 %v5348_v11 }
 0x658   :  { %2412 = vmatpush.msrb.mxu3 %v5371_v58 }
 0x65a   :  { %2413 = vmatpush.msrb.mxu3 %v5385_v32 }
 0x65c   :  { %2414 = vmatpush.msrb.mxu3 %v5400_v37 }
 0x65e   :  { %2415 = vmatpush.msrb.mxu3 %v5415_v24 }
 0x660   :  { %2416 = vmatpush.msrb.mxu3 %v5433_v59 }
 0x662   :  { %2417 = vmatpush.msrb.mxu3 %v5452_v29 }
 0x664   :  { %2418 = vmatpush.msrb.mxu3 %v5470_v63 }
 0x666   :  { %2419 = vmatpush.msrb.mxu3 %v5488_v47 }
 0x668   :  { %2420 = vmatpush.msrb.mxu3 %v5501_v51 }
 0x66a   :  { %2421 = vmatpush.msrb.mxu3 %v5514_v12 }
 0x66c   :  { %2422 = vmatpush.msrb.mxu3 %v5526_v2 }
 0x66e   :  { %2423 = vmatpush.msrb.mxu3 %v5538_v17 }
 0x670   :  { %2424 = vmatpush.msrb.mxu3 %v5555_v18 }
 0x672   :  { %2425 = vmatpush.msrb.mxu3 %v5568_v25 }
 0x69f   :  { %v2178_v27 = vpop.f32.mrf.mxu3 }
 0x6a0   :  { %2272 = vmatmul.f32.vlgmr.msra.gmra.mxu2 %v2178_v27  ;;  %2223 = vmatmul.f32.vlgmr.msra.gmra.mxu0 %v2178_v27 }
 0x6a1   :  { %2399 = vmatpush.msra.mxu2 %v5354_v44  ;;  %2433 = vmatpush.msra.mxu0 %v5319_v6 }
 0x6a3   :  { %2400 = vmatpush.msra.mxu2 %v5387_v4  ;;  %2434 = vmatpush.msra.mxu0 %v5328_v38 }
 0x6a5   :  { %2401 = vmatpush.msra.mxu2 %v5402_v28  ;;  %2435 = vmatpush.msra.mxu0 %v5343_v45  ;;  %v2019_v45 = vld [vmem:[%s6304_s11 + $0x10] sm:$0xff] }
 0x6a7   :  { %2402 = vmatpush.msra.mxu2 %v5417_v31  ;;  %v2181_v29 = vpop.f32.mrf.mxu3  ;;  %2436 = vmatpush.msra.mxu0 %v5364_v14 }
 0x6a8   :  { %2275 = vmatmul.f32.gmra.mxu2 %v2181_v29  ;;  %2226 = vmatmul.f32.gmra.mxu0 %v2181_v29 }
 0x6a9   :  { %2437 = vmatpush.msra.mxu0 %v5378_v43 }
 0x6ab   :  { %2438 = vmatpush.msra.mxu0 %v5393_v13 }
 0x6ad   :  { %2439 = vmatpush.msra.mxu0 %v5408_v0 }
 0x6af   :  { %v2201_v51 = vpop.f32.mrf.mxu3  ;;  %2440 = vmatpush.msra.mxu0 %v5426_v39  ;;  %v2020_v39 = vld [vmem:[%s6304_s11 + $0x18] sm:$0xff] }
 0x6b0   :  { %2246 = vmatmul.f32.vlgmr.msrb.gmra.mxu1 %v2201_v51  ;;  %3070 = vmatmul.msk.f32.vlgmr.msrb.gmra.mxu2 %vm2154_vm3, %v2019_v45 }
 0x6b1   :  { %2461 = vmatpush.msrb.mxu1 %v5175_v62  ;;  %2484 = vmatpush.msrb.mxu2 %v5438_v20 }
 0x6b2   :  { %2295 = vmatmul.f32.vlgmr.msra.gmra.mxu3 %v2201_v51  ;;  %2323 = vmatmul.f32.vlgmr.msrb.gmra.mxu0 %v2178_v27 }
 0x6b3   :  { %2462 = vmatpush.msrb.mxu1 %v5224_v55  ;;  %2485 = vmatpush.msrb.mxu2 %v5457_v19 }
 0x6b4   :  { %2441 = vmatpush.msra.mxu0 %v5444_v30  ;;  %2512 = vmatpush.msra.mxu3 %v5607_v9 }
 0x6b5   :  { %2463 = vmatpush.msrb.mxu1 %v5230_v56  ;;  %2486 = vmatpush.msrb.mxu2 %v5475_v35 }
 0x6b6   :  { %2442 = vmatpush.msra.mxu0 %v5462_v46  ;;  %2513 = vmatpush.msra.mxu3 %v5613_v5  ;;  %v6756_v46 = vld [vmem:[#allocation17_spill] sm:$0xff] }
 0x6b7   :  { %2464 = vmatpush.msrb.mxu1 %v5236_v23  ;;  %2487 = vmatpush.msrb.mxu2 %v5625_v53  ;;  %v2204_v27 = vpop.f32.mrf.mxu3 }
 0x6b8   :  { %2249 = vmatmul.f32.gmra.mxu1 %v2204_v27  ;;  %3071 = vmatmul.msk.f32.gmra.mxu2 %vm2154_vm3, %v2020_v39 }
 0x6b9   :  { %2465 = vmatpush.msrb.mxu1 %v5242_v52  ;;  %2488 = vmatpush.msrb.mxu2 %v5637_v49 }
 0x6ba   :  { %2298 = vmatmul.f32.gmra.mxu3 %v2204_v27  ;;  %2326 = vmatmul.f32.gmra.mxu0 %v2181_v29  ;;  %v6750_v29 = vld [vmem:[#allocation60_spill] sm:$0xff] }
 0x6bb   :  { %2466 = vmatpush.msrb.mxu1 %v5248_v15  ;;  %2489 = vmatpush.msrb.mxu2 %v5649_v42 }
 0x6bc   :  { %2443 = vmatpush.msra.mxu0 %v5480_v61  ;;  %2514 = vmatpush.msra.mxu3 %v5619_v26  ;;  %v6752_v26 = vld [vmem:[#allocation32_spill] sm:$0xff] }
 0x6bd   :  { %2467 = vmatpush.msrb.mxu1 %v5254_v54  ;;  %2490 = vmatpush.msrb.mxu2 %v5661_v41  ;;  %v6755_v61 = vld [vmem:[#allocation44_spill] sm:$0xff] }
 0x6be   :  { %2444 = vmatpush.msra.mxu0 %v5493_v22  ;;  %2515 = vmatpush.msra.mxu3 %v5630_v21  ;;  %v6751_v22 = vld [vmem:[#allocation13_spill] sm:$0xff]  ;;  %v6758_v21 = vld [vmem:[#allocation22_spill] sm:$0xff] }
 0x6bf   :  { %2468 = vmatpush.msrb.mxu1 %v5260_v16  ;;  %2491 = vmatpush.msrb.mxu2 %v5678_v33 }
 0x6c0   :  { %2346 = vmatmul.f32.vlgmr.msra.gmra.mxu1 %v2201_v51  ;;  %3072 = vmatmul.msk.f32.vlgmr.msra.gmra.mxu2 %vm2154_vm3, %v2019_v45  ;;  %v6753_v51 = vld [vmem:[#allocation50_spill] sm:$0xff] }
 0x6c1   :  { %2469 = vmatpush.msrb.mxu1 %v5266_v50  ;;  %2492 = vmatpush.msrb.mxu2 %v5695_v3  ;;  %v6754_v45 = vld [vmem:[#allocation62_spill] sm:$0xff] }
 0x6c2   :  { %2445 = vmatpush.msra.mxu0 %v5506_v60  ;;  %2516 = vmatpush.msra.mxu3 %v6751_v22  ;;  %v6757_v60 = vld [vmem:[#allocation11_spill] sm:$0xff] }
 0x6c3   :  { %2470 = vmatpush.msrb.mxu1 %v5272_v7  ;;  %2493 = vmatpush.msrb.mxu2 %v5713_v34  ;;  %v6760_v22 = vld [vmem:[#allocation35_spill] sm:$0xff]  ;;  %v6764_v34 = vld [vmem:[#allocation9_spill] sm:$0xff] }
 0x6c4   :  { %2446 = vmatpush.msra.mxu0 %v6750_v29  ;;  %2517 = vmatpush.msra.mxu3 %v6755_v61  ;;  %v6759_v29 = vld [vmem:[#allocation2_spill] sm:$0xff]  ;;  %v6763_v61 = vld [vmem:[#allocation3_spill] sm:$0xff] }
 0x6c5   :  { %2471 = vmatpush.msrb.mxu1 %v6752_v26  ;;  %2494 = vmatpush.msrb.mxu2 %v6753_v51  ;;  %v6761_v51 = vld [vmem:[#allocation18_spill] sm:$0xff] }
 0x6c6   :  { %2447 = vmatpush.msra.mxu0 %v6754_v45  ;;  %2518 = vmatpush.msra.mxu3 %v6760_v22  ;;  %v6762_v45 = vld [vmem:[#allocation64_spill] sm:$0xff]  ;;  %v6770_v22 = vld [vmem:[#allocation5_spill] sm:$0xff] }
 0x6c7   :  { %2472 = vmatpush.msrb.mxu1 %v6756_v46  ;;  %2495 = vmatpush.msrb.mxu2 %v6757_v60  ;;  %v6765_v60 = vld [vmem:[#allocation24_spill] sm:$0xff] }
 0x6c8   :  { %2349 = vmatmul.f32.gmra.mxu1 %v2204_v27  ;;  %3073 = vmatmul.msk.f32.gmra.mxu2 %vm2154_vm3, %v2020_v39  ;;  %v6766_v39 = vld [vmem:[#allocation4_spill] sm:$0xff]  ;;  %v6767_v27 = vld [vmem:[#allocation37_spill] sm:$0xff] }
 0x6c9   :  { %2473 = vmatpush.msrb.mxu1 %v6758_v21  ;;  %2496 = vmatpush.msrb.mxu2 %v5772_v10  ;;  %v6768_v10 = vld [vmem:[#allocation31_spill] sm:$0xff] }
 0x6ca   :  { %2448 = vmatpush.msra.mxu0 %v6759_v29  ;;  %2519 = vmatpush.msra.mxu3 %v6764_v34  ;;  %v6769_v29 = vld [vmem:[#allocation19_spill] sm:$0xff]  ;;  %v6772_v34 = vld [vmem:[#allocation25_spill] sm:$0xff] }
 0x6cb   :  { %2474 = vmatpush.msrb.mxu1 %v6761_v51  ;;  %2497 = vmatpush.msrb.mxu2 %v6762_v45 }
 0x6cc   :  { %2535 = vmatpush.msrb.mxu0 %v6763_v61  ;;  %2520 = vmatpush.msra.mxu3 %v6767_v27  ;;  %v6771_v61 = vld [vmem:[#allocation48_spill] sm:$0xff]  ;;  %v6775_v27 = vld [vmem:[#allocation33_spill] sm:$0xff] }
 0x6cd   :  { %2475 = vmatpush.msrb.mxu1 %v6765_v60  ;;  %2498 = vmatpush.msrb.mxu2 %v5803_v57  ;;  %v6773_v57 = vld [vmem:[#allocation6_spill] sm:$0xff] }
 0x6ce   :  { %2536 = vmatpush.msrb.mxu0 %v6766_v39  ;;  %2521 = vmatpush.msra.mxu3 %v6771_v61  ;;  %v6774_v39 = vld [vmem:[#allocation41_spill] sm:$0xff]  ;;  %v6779_v61 = vld [vmem:[#allocation8_spill] sm:$0xff] }
 0x6cf   :  { %2476 = vmatpush.msrb.mxu1 %v6768_v10  ;;  %2499 = vmatpush.msrb.mxu2 %v5821_v48  ;;  %v6776_v48 = vld [vmem:[#allocation7_spill] sm:$0xff] }
 0x6d0   :  { %2537 = vmatpush.msrb.mxu0 %v6770_v22  ;;  %2522 = vmatpush.msra.mxu3 %v6774_v39  ;;  %v6782_v39 = vld [vmem:[#allocation14_spill] sm:$0xff] }
 0x6d1   :  { %2581 = vmatpush.msra.mxu1 %v6769_v29  ;;  %2604 = vmatpush.msra.mxu2 %v5354_v44  ;;  %v6777_v29 = vld [vmem:[#allocation43_spill] sm:$0xff]  ;;  %v6778_v44 = vld [vmem:[#allocation26_spill] sm:$0xff] }
 0x6d2   :  { %2538 = vmatpush.msrb.mxu0 %v6773_v57  ;;  %2523 = vmatpush.msra.mxu3 %v6777_v29 }
 0x6d3   :  { %2582 = vmatpush.msra.mxu1 %v6772_v34  ;;  %2605 = vmatpush.msra.mxu2 %v5387_v4  ;;  %v6780_v34 = vld [vmem:[#allocation49_spill] sm:$0xff]  ;;  %v6781_v4 = vld [vmem:[#allocation12_spill] sm:$0xff] }
 0x6d4   :  { %2539 = vmatpush.msrb.mxu0 %v6776_v48  ;;  %2524 = vmatpush.msra.mxu3 %v6780_v34  ;;  %v6788_v34 = vld [vmem:[#allocation45_spill] sm:$0xff] }
 0x6d5   :  { %2583 = vmatpush.msra.mxu1 %v6775_v27  ;;  %2606 = vmatpush.msra.mxu2 %v5402_v28  ;;  %v6783_v28 = vld [vmem:[#allocation46_spill] sm:$0xff]  ;;  %v6784_v27 = vld [vmem:[#allocation15_spill] sm:$0xff] }
 0x6d6   :  { %2540 = vmatpush.msrb.mxu0 %v6779_v61  ;;  %2525 = vmatpush.msra.mxu3 %v5798_v40  ;;  %v6787_v61 = vld [vmem:[#allocation54_spill] sm:$0xff]  ;;  %v6790_v40 = vld [vmem:[#allocation57_spill] sm:$0xff] }
 0x6d7   :  { %2584 = vmatpush.msra.mxu1 %v6778_v44  ;;  %2607 = vmatpush.msra.mxu2 %v5417_v31  ;;  %v6785_v44 = vld [vmem:[#allocation10_spill] sm:$0xff]  ;;  %v6786_v31 = vld [vmem:[#allocation52_spill] sm:$0xff] }
 0x6d8   :  { %2541 = vmatpush.msrb.mxu0 %v6781_v4  ;;  %2526 = vmatpush.msra.mxu3 %v5811_v36  ;;  %v6789_v4 = vld [vmem:[#allocation51_spill] sm:$0xff] }
 0x6da   :  { %2542 = vmatpush.msrb.mxu0 %v6782_v39  ;;  %2527 = vmatpush.msra.mxu3 %v5829_v8 }
 0x6dc   :  { %2543 = vmatpush.msrb.mxu0 %v6783_v28 }
 0x6de   :  { %2544 = vmatpush.msrb.mxu0 %v6784_v27  ;;  %v5953_v27 = vld [vmem:[%s6305_s13] sm:$0xff] }
 0x6e0   :  { %2545 = vmatpush.msrb.mxu0 %v6785_v44 }
 0x6e2   :  { %2546 = vmatpush.msrb.mxu0 %v6786_v31 }
 0x6e4   :  { %2547 = vmatpush.msrb.mxu0 %v6787_v61  ;;  %v2253_v61 = vperm.slane %v5953_v27, 0 }
 0x6e6   :  { %2548 = vmatpush.msrb.mxu0 %v6788_v34  ;;  %v2302_v34 = vperm.slane %v5953_v27, 1 }
 0x6e8   :  { %2549 = vmatpush.msrb.mxu0 %v6789_v4 }
 0x6ea   :  { %2550 = vmatpush.msrb.mxu0 %v6790_v40 }
 0x71d   :  { %v2224_v36 = vpop.f32.mrf.mxu0 }
 0x723   :  { %v2273_v39 = vpop.f32.mrf.mxu2 }
 0x725   :  { %v2227_v44 = vpop.f32.mrf.mxu0 }
 0x72b   :  { %v2276_v29 = vpop.f32.mrf.mxu2 }
 0x72d   :  { %v2247_v28 = vpop.f32.mrf.mxu1 }
 0x72e   :  { %v2248_v31 = vadd.f32 %v2247_v28, %v2224_v36 }
 0x72f   :  { %v2324_v45 = vpop.f32.mrf.mxu0 }
 0x730   :  { %v2254_v57 = vmul.f32 %v2253_v61, %v2248_v31  ;;  %v6836_v31 = vld [vmem:[#allocation45_spill] sm:$0xff] }
 0x733   :  { %v2381_v8 = vpop.f32.mrf.mxu2 }
 0x734   :  { %2426 = vmatmul.f32.vlgmr.msrb.gmra.mxu3 %v2381_v8  ;;  %2477 = vmatmul.f32.vlgmr.msrb.gmra.mxu1 %v2381_v8 }
 0x735   :  { %v2250_v4 = vpop.f32.mrf.mxu1  ;;  %v2296_v40 = vpop.f32.mrf.mxu3  ;;  %2615 = vmatpush.msrb.mxu1 %v5334_v1  ;;  %2666 = vmatpush.msrb.mxu3 %v5175_v62  ;;  %v2353_v62 = vperm.slane %v5953_v27, 2 }
 0x736   :  { %v2297_v48 = vadd.f32 %v2296_v40, %v2273_v39  ;;  %v2251_v1 = vadd.f32 %v2250_v4, %v2227_v44  ;;  %v6822_v40 = vld [vmem:[#allocation7_spill] sm:$0xff]  ;;  %v6831_v39 = vld [vmem:[#allocation61_spill] sm:$0xff]  ;;  %v6834_v4 = vld [vmem:[#allocation52_spill] sm:$0xff] }
 0x737   :  { %2616 = vmatpush.msrb.mxu1 %v5348_v11  ;;  %2667 = vmatpush.msrb.mxu3 %v5224_v55  ;;  %v6835_v44 = vld [vmem:[#allocation54_spill] sm:$0xff] }
 0x738   :  { %v2303_v22 = vmul.f32 %v2302_v34, %v2297_v48  ;;  %v6791_v48 = vld [vmem:[#allocation23_spill] sm:$0xff] }
 0x739   :  { %2617 = vmatpush.msrb.mxu1 %v5371_v58  ;;  %2668 = vmatpush.msrb.mxu3 %v5230_v56 }
 0x73a   :  { %v2305_v36 = vadd.f32 %v2303_v22, %v2254_v57  ;;  %v2255_v57 = vmul.f32 %v2253_v61, %v2251_v1  ;;  %v6815_v61 = vld [vmem:[#allocation59_spill] sm:$0xff] }
 0x73b   :  { %v2384_v28 = vpop.f32.mrf.mxu2  ;;  %2618 = vmatpush.msrb.mxu1 %v5385_v32  ;;  %2669 = vmatpush.msrb.mxu3 %v5236_v23 }
 0x73c   :  { %2429 = vmatmul.f32.gmra.mxu3 %v2384_v28  ;;  %2480 = vmatmul.f32.gmra.mxu1 %v2384_v28 }
 0x73d   :  { %v2347_v11 = vpop.f32.mrf.mxu1  ;;  %v2299_v55 = vpop.f32.mrf.mxu3  ;;  %2619 = vmatpush.msrb.mxu1 %v5400_v37  ;;  %2670 = vmatpush.msrb.mxu3 %v5242_v52  ;;  %v2021_v52 = vld [vmem:[%s6304_s11 + $0x20] sm:$0xff] }
 0x73e   :  { %v2348_v58 = vadd.f32 %v2347_v11, %v2324_v45  ;;  %v2300_v56 = vadd.f32 %v2299_v55, %v2276_v29  ;;  %v6830_v45 = vld [vmem:[#allocation46_spill] sm:$0xff]  ;;  %v6832_v29 = vld [vmem:[#allocation15_spill] sm:$0xff]  ;;  %v2327_v55 = vpop.f32.mrf.mxu0 }
 0x73f   :  { %2620 = vmatpush.msrb.mxu1 %v5415_v24  ;;  %2671 = vmatpush.msrb.mxu3 %v5248_v15  ;;  %v2022_v15 = vld [vmem:[%s6304_s11 + $0x28] sm:$0xff] }
 0x740   :  { %v2354_v23 = vmul.f32 %v2353_v62, %v2348_v58  ;;  %v2304_v32 = vmul.f32 %v2302_v34, %v2300_v56  ;;  %v6833_v34 = vld [vmem:[#allocation10_spill] sm:$0xff] }
 0x741   :  { %2621 = vmatpush.msrb.mxu1 %v5433_v59  ;;  %2672 = vmatpush.msrb.mxu3 %v5254_v54  ;;  %v6792_v54 = vld [vmem:[#allocation21_spill] sm:$0xff]  ;;  %v6808_v59 = vld [vmem:[#allocation62_spill] sm:$0xff] }
 0x742   :  { %v5974_v22 = vadd.f32 %v2354_v23, %v2305_v36  ;;  %v5976_v37 = vadd.f32 %v2304_v32, %v2255_v57  ;;  %v6837_v36 = vld [vmem:[#allocation51_spill] sm:$0xff]  ;;  %v2456_v32 = vperm.slane %v5953_v27, 3 }
 0x743   :  { %v2404_v24 = vpop.f32.mrf.mxu2  ;;  %2622 = vmatpush.msrb.mxu1 %v6791_v48  ;;  %2673 = vmatpush.msrb.mxu3 %v5260_v16  ;;  %v6793_v16 = vld [vmem:[#allocation56_spill] sm:$0xff]  ;;  %v2507_v48 = vperm.slane %v5953_v27, 4 }
 0x744   :  { %2449 = vmatmul.f32.vlgmr.msra.gmra.mxu0 %v2404_v24  ;;  %2500 = vmatmul.f32.vlgmr.msrb.gmra.mxu2 %v2404_v24 }
 0x745   :  { %2528 = vmatmul.f32.vlgmr.msra.gmra.mxu3 %v2381_v8  ;;  %3074 = vmatmul.msk.f32.vlgmr.msra.gmra.mxu1 %vm2154_vm3, %v2021_v52  ;;  %v2350_v1 = vpop.f32.mrf.mxu1 }
 0x746   :  { %2638 = vmatpush.msrb.mxu2 %v5319_v6  ;;  %2623 = vmatpush.msrb.mxu1 %v5470_v63  ;;  %v6798_v6 = vld [vmem:[#allocation42_spill] sm:$0xff]  ;;  %v6813_v63 = vld [vmem:[#allocation3_spill] sm:$0xff] }
 0x747   :  { %2689 = vmatpush.msra.mxu0 %v5438_v20  ;;  %2674 = vmatpush.msrb.mxu3 %v5266_v50  ;;  %v6794_v50 = vld [vmem:[#allocation36_spill] sm:$0xff] }
 0x748   :  { %2639 = vmatpush.msrb.mxu2 %v5328_v38  ;;  %2624 = vmatpush.msrb.mxu1 %v5488_v47  ;;  %v6800_v38 = vld [vmem:[#allocation50_spill] sm:$0xff]  ;;  %v6809_v20 = vld [vmem:[#allocation64_spill] sm:$0xff] }
 0x749   :  { %2690 = vmatpush.msra.mxu0 %v5457_v19  ;;  %2675 = vmatpush.msrb.mxu3 %v5272_v7  ;;  %v6795_v7 = vld [vmem:[#allocation27_spill] sm:$0xff]  ;;  %v6811_v19 = vld [vmem:[#allocation2_spill] sm:$0xff]  ;;  %v6816_v47 = vld [vmem:[#allocation4_spill] sm:$0xff] }
 0x74a   :  { %2640 = vmatpush.msrb.mxu2 %v6792_v54  ;;  %2625 = vmatpush.msrb.mxu1 %v6793_v16  ;;  %v2351_v54 = vadd.f32 %v2350_v1, %v2327_v55  ;;  %v2122_v55 = vld [vmem:[%s6306_s14 + $0x8] sm:$0xff] }
 0x74b   :  { %v2407_v8 = vpop.f32.mrf.mxu2  ;;  %2691 = vmatpush.msra.mxu0 %v5475_v35  ;;  %2676 = vmatpush.msrb.mxu3 %v6752_v26  ;;  %v6803_v26 = vld [vmem:[#allocation11_spill] sm:$0xff]  ;;  %v6814_v35 = vld [vmem:[#allocation9_spill] sm:$0xff] }
 0x74c   :  { %2452 = vmatmul.f32.gmra.mxu0 %v2407_v8  ;;  %2503 = vmatmul.f32.gmra.mxu2 %v2407_v8 }
 0x74d   :  { %2531 = vmatmul.f32.gmra.mxu3 %v2384_v28  ;;  %3075 = vmatmul.msk.f32.gmra.mxu1 %vm2154_vm3, %v2022_v15  ;;  %v6838_v28 = vld [vmem:[#allocation57_spill] sm:$0xff] }
 0x74e   :  { %2641 = vmatpush.msrb.mxu2 %v5364_v14  ;;  %2626 = vmatpush.msrb.mxu1 %v5514_v12  ;;  %v6804_v14 = vld [vmem:[#allocation13_spill] sm:$0xff] }
 0x74f   :  { %2692 = vmatpush.msra.mxu0 %v5625_v53  ;;  %2677 = vmatpush.msrb.mxu3 %v6756_v46  ;;  %v6801_v53 = vld [vmem:[#allocation34_spill] sm:$0xff]  ;;  %v6818_v12 = vld [vmem:[#allocation5_spill] sm:$0xff] }
 0x750   :  { %2642 = vmatpush.msrb.mxu2 %v5378_v43  ;;  %2627 = vmatpush.msrb.mxu1 %v5526_v2  ;;  %v6805_v43 = vld [vmem:[#allocation60_spill] sm:$0xff]  ;;  %v6812_v46 = vld [vmem:[#allocation66_spill] sm:$0xff] }
 0x751   :  { %2693 = vmatpush.msra.mxu0 %v5637_v49  ;;  %2678 = vmatpush.msrb.mxu3 %v6758_v21  ;;  %v6799_v21 = vld [vmem:[#allocation40_spill] sm:$0xff] }
 0x752   :  { %2643 = vmatpush.msrb.mxu2 %v5393_v13  ;;  %2628 = vmatpush.msrb.mxu1 %v5538_v17  ;;  %v6806_v13 = vld [vmem:[#allocation47_spill] sm:$0xff]  ;;  %v6819_v2 = vld [vmem:[#allocation48_spill] sm:$0xff]  ;;  %v6820_v17 = vld [vmem:[#allocation6_spill] sm:$0xff] }
 0x753   :  { %2694 = vmatpush.msra.mxu0 %v5649_v42  ;;  %2679 = vmatpush.msrb.mxu3 %v6761_v51  ;;  %v6797_v42 = vld [vmem:[#allocation39_spill] sm:$0xff]  ;;  %v6826_v49 = vld [vmem:[#allocation12_spill] sm:$0xff] }
 0x754   :  { %2551 = vmatmul.f32.vlgmr.msrb.gmra.mxu0 %v2404_v24  ;;  %3076 = vmatmul.msk.f32.vlgmr.msra.gmra.mxu2 %vm2154_vm3, %v2021_v52  ;;  %v6829_v51 = vld [vmem:[#allocation55_spill] sm:$0xff] }
 0x755   :  { %2644 = vmatpush.msrb.mxu2 %v5408_v0  ;;  %2629 = vmatpush.msrb.mxu1 %v5555_v18  ;;  %v6807_v0 = vld [vmem:[#allocation44_spill] sm:$0xff]  ;;  %v6823_v18 = vld [vmem:[#allocation43_spill] sm:$0xff] }
 0x756   :  { %2695 = vmatpush.msra.mxu0 %v5661_v41  ;;  %2680 = vmatpush.msrb.mxu3 %v6765_v60  ;;  %v6796_v41 = vld [vmem:[#allocation38_spill] sm:$0xff]  ;;  %v6817_v60 = vld [vmem:[#allocation37_spill] sm:$0xff] }
 0x757   :  { %2645 = vmatpush.msrb.mxu2 %v6794_v50  ;;  %2630 = vmatpush.msrb.mxu1 %v5568_v25  ;;  %v6825_v25 = vld [vmem:[#allocation49_spill] sm:$0xff] }
 0x758   :  { %2696 = vmatpush.msra.mxu0 %v5678_v33  ;;  %2681 = vmatpush.msrb.mxu3 %v6768_v10  ;;  %v6821_v33 = vld [vmem:[#allocation41_spill] sm:$0xff]  ;;  %v6824_v10 = vld [vmem:[#allocation8_spill] sm:$0xff] }
 0x759   :  { %2717 = vmatpush.msra.mxu1 %v5607_v9  ;;  %2646 = vmatpush.msrb.mxu2 %v5444_v30  ;;  %v6810_v30 = vld [vmem:[#allocation35_spill] sm:$0xff]  ;;  %v6827_v9 = vld [vmem:[#allocation53_spill] sm:$0xff] }
 0x75a   :  { %2697 = vmatpush.msra.mxu0 %v5695_v3  ;;  %v6802_v3 = vld [vmem:[#allocation58_spill] sm:$0xff] }
 0x75b   :  { %2718 = vmatpush.msra.mxu1 %v5613_v5  ;;  %2647 = vmatpush.msrb.mxu2 %v6795_v7  ;;  %v6828_v5 = vld [vmem:[#allocation14_spill] sm:$0xff] }
 0x75c   :  { %2554 = vmatmul.f32.gmra.mxu0 %v2407_v8  ;;  %3077 = vmatmul.msk.f32.gmra.mxu2 %vm2154_vm3, %v2022_v15 }
 0x75d   :  { %2648 = vmatpush.msrb.mxu2 %v6796_v41  ;;  %2698 = vmatpush.msra.mxu0 %v6797_v42 }
 0x75e   :  { %2719 = vmatpush.msra.mxu1 %v6798_v6 }
 0x75f   :  { %2649 = vmatpush.msrb.mxu2 %v6799_v21  ;;  %2699 = vmatpush.msra.mxu0 %v6800_v38  ;;  %v2355_v21 = vmul.f32 %v2353_v62, %v2351_v54  ;;  %v2150_v62 = vld [vmem:[%s6306_s14 + $0xe8] sm:$0xff] }
 0x760   :  { %2720 = vmatpush.msra.mxu1 %v6801_v53 }
 0x761   :  { %2650 = vmatpush.msrb.mxu2 %v6802_v3  ;;  %2700 = vmatpush.msra.mxu0 %v6803_v26  ;;  %v2357_v26 = vadd.f32 %v2355_v21, %v5976_v37  ;;  %v2712_v21 = vperm.slane %v5953_v27, 7 }
 0x762   :  { %2721 = vmatpush.msra.mxu1 %v6804_v14 }
 0x763   :  { %2651 = vmatpush.msrb.mxu2 %v6805_v43  ;;  %2701 = vmatpush.msra.mxu0 %v6806_v13  ;;  %v2151_v43 = vld [vmem:[%s6306_s14 + $0xf0] sm:$0xff]  ;;  %v2149_v13 = vld [vmem:[%s6306_s14 + $0xe0] sm:$0xff] }
 0x764   :  { %2722 = vmatpush.msra.mxu1 %v6807_v0  ;;  %2778 = vmatpush.msra.mxu3 %v2151_v43 }
 0x765   :  { %2652 = vmatpush.msrb.mxu2 %v6808_v59  ;;  %2702 = vmatpush.msra.mxu0 %v6809_v20 }
 0x766   :  { %2723 = vmatpush.msra.mxu1 %v6810_v30  ;;  %2779 = vmatpush.msra.mxu3 %v2149_v13 }
 0x767   :  { %2653 = vmatpush.msrb.mxu2 %v6811_v19  ;;  %2703 = vmatpush.msra.mxu0 %v6812_v46  ;;  %v2147_v19 = vld [vmem:[%s6306_s14 + $0xd0] sm:$0xff]  ;;  %v2148_v46 = vld [vmem:[%s6306_s14 + $0xd8] sm:$0xff] }
 0x768   :  { %2724 = vmatpush.msra.mxu1 %v6814_v35  ;;  %2780 = vmatpush.msra.mxu3 %v2147_v19  ;;  %v2146_v35 = vld [vmem:[%s6306_s14 + $0xc8] sm:$0xff] }
 0x769   :  { %2740 = vmatpush.msra.mxu2 %v6813_v63  ;;  %2704 = vmatpush.msra.mxu0 %v6815_v61  ;;  %v2145_v63 = vld [vmem:[%s6306_s14 + $0xc0] sm:$0xff]  ;;  %v2143_v61 = vld [vmem:[%s6306_s14 + $0xb0] sm:$0xff] }
 0x76a   :  { %2725 = vmatpush.msra.mxu1 %v6817_v60  ;;  %2781 = vmatpush.msra.mxu3 %v2145_v63  ;;  %v2141_v60 = vld [vmem:[%s6306_s14 + $0xa0] sm:$0xff] }
 0x76b   :  { %2741 = vmatpush.msra.mxu2 %v6816_v47  ;;  %v2144_v47 = vld [vmem:[%s6306_s14 + $0xb8] sm:$0xff] }
 0x76c   :  { %2726 = vmatpush.msra.mxu1 %v6819_v2  ;;  %2782 = vmatpush.msra.mxu3 %v2143_v61  ;;  %v2139_v2 = vld [vmem:[%s6306_s14 + $0x90] sm:$0xff] }
 0x76d   :  { %2742 = vmatpush.msra.mxu2 %v6818_v12  ;;  %v2142_v12 = vld [vmem:[%s6306_s14 + $0xa8] sm:$0xff] }
 0x76e   :  { %2727 = vmatpush.msra.mxu1 %v6821_v33  ;;  %2783 = vmatpush.msra.mxu3 %v2141_v60  ;;  %v2137_v33 = vld [vmem:[%s6306_s14 + $0x80] sm:$0xff] }
 0x76f   :  { %2743 = vmatpush.msra.mxu2 %v6820_v17  ;;  %v2140_v17 = vld [vmem:[%s6306_s14 + $0x98] sm:$0xff] }
 0x770   :  { %2728 = vmatpush.msra.mxu1 %v6823_v18  ;;  %2784 = vmatpush.msra.mxu3 %v2139_v2  ;;  %v2135_v18 = vld [vmem:[%s6306_s14 + $0x70] sm:$0xff] }
 0x771   :  { %2744 = vmatpush.msra.mxu2 %v6822_v40  ;;  %v2138_v40 = vld [vmem:[%s6306_s14 + $0x88] sm:$0xff] }
 0x772   :  { %2729 = vmatpush.msra.mxu1 %v6825_v25  ;;  %2785 = vmatpush.msra.mxu3 %v2137_v33  ;;  %v2133_v25 = vld [vmem:[%s6306_s14 + $0x60] sm:$0xff] }
 0x773   :  { %2745 = vmatpush.msra.mxu2 %v6824_v10  ;;  %v2136_v10 = vld [vmem:[%s6306_s14 + $0x78] sm:$0xff] }
 0x774   :  { %2730 = vmatpush.msra.mxu1 %v6827_v9  ;;  %2786 = vmatpush.msra.mxu3 %v2135_v18  ;;  %v2131_v9 = vld [vmem:[%s6306_s14 + $0x50] sm:$0xff] }
 0x775   :  { %2746 = vmatpush.msra.mxu2 %v6826_v49  ;;  %v2134_v49 = vld [vmem:[%s6306_s14 + $0x68] sm:$0xff] }
 0x776   :  { %2731 = vmatpush.msra.mxu1 %v6829_v51  ;;  %2787 = vmatpush.msra.mxu3 %v2133_v25  ;;  %v2129_v51 = vld [vmem:[%s6306_s14 + $0x40] sm:$0xff] }
 0x777   :  { %2747 = vmatpush.msra.mxu2 %v6828_v5  ;;  %v2132_v5 = vld [vmem:[%s6306_s14 + $0x58] sm:$0xff] }
 0x778   :  { %2732 = vmatpush.msra.mxu1 %v6831_v39  ;;  %2788 = vmatpush.msra.mxu3 %v2131_v9  ;;  %v2904_v9 = vld [vmem:[%s6307_s17 + $0xf8] sm:$0xff] }
 0x779   :  { %2748 = vmatpush.msra.mxu2 %v6830_v45  ;;  %v2130_v45 = vld [vmem:[%s6306_s14 + $0x48] sm:$0xff] }
 0x77a   :  { %2789 = vmatpush.msra.mxu3 %v2129_v51  ;;  %v2903_v51 = vld [vmem:[%s6307_s17 + $0xf0] sm:$0xff] }
 0x77b   :  { %2749 = vmatpush.msra.mxu2 %v6832_v29  ;;  %v2127_v29 = vld [vmem:[%s6306_s14 + $0x30] sm:$0xff] }
 0x77c   :  { %2790 = vmatpush.msra.mxu3 %v2127_v29  ;;  %v2901_v29 = vld [vmem:[%s6307_s17 + $0xe0] sm:$0xff] }
 0x77d   :  { %2750 = vmatpush.msra.mxu2 %v6833_v34  ;;  %v2128_v34 = vld [vmem:[%s6306_s14 + $0x38] sm:$0xff] }
 0x77f   :  { %2751 = vmatpush.msra.mxu2 %v6834_v4 }
 0x781   :  { %2752 = vmatpush.msra.mxu2 %v6835_v44  ;;  %v2125_v44 = vld [vmem:[%s6306_s14 + $0x20] sm:$0xff] }
 0x782   :  { %2791 = vmatpush.msra.mxu3 %v2125_v44  ;;  %v2883_v44 = vld [vmem:[%s6307_s17 + $0x50] sm:$0xff] }
 0x783   :  { %2753 = vmatpush.msra.mxu2 %v6836_v31  ;;  %v2126_v31 = vld [vmem:[%s6306_s14 + $0x28] sm:$0xff] }
 0x785   :  { %2754 = vmatpush.msra.mxu2 %v6837_v36  ;;  %v2123_v36 = vld [vmem:[%s6306_s14 + $0x10] sm:$0xff] }
 0x786   :  { %2792 = vmatpush.msra.mxu3 %v2123_v36 }
 0x787   :  { %2755 = vmatpush.msra.mxu2 %v6838_v28  ;;  %v2124_v28 = vld [vmem:[%s6306_s14 + $0x18] sm:$0xff] }
 0x7b1   :  { %v2478_v11 = vpop.f32.mrf.mxu1 }
 0x7b7   :  { %v2427_v56 = vpop.f32.mrf.mxu3 }
 0x7b9   :  { %v2481_v58 = vpop.f32.mrf.mxu1 }
 0x7bf   :  { %v2430_v8 = vpop.f32.mrf.mxu3 }
 0x7c1   :  { %v2450_v57 = vpop.f32.mrf.mxu0 }
 0x7c2   :  { %v2451_v23 = vadd.f32 %v2450_v57, %v2427_v56  ;;  %v2586_v52 = vpop.f32.mrf.mxu1 }
 0x7c3   :  { %2682 = vmatmul.f32.vlgmr.msrb.gmra.mxu3 %v2586_v52  ;;  %2631 = vmatmul.f32.vlgmr.msrb.gmra.mxu1 %v2586_v52 }
 0x7c4   :  { %v2457_v24 = vmul.f32 %v2456_v32, %v2451_v23 }
 0x7c6   :  { %v2459_v7 = vadd.f32 %v2457_v24, %v5974_v22  ;;  %v2152_v22 = vld [vmem:[%s6306_s14 + $0xf8] sm:$0xff] }
 0x7c7   :  { %v2501_v15 = vpop.f32.mrf.mxu2  ;;  %2801 = vmatpush.msrb.mxu0 %v2152_v22 }
 0x7c8   :  { %v2502_v16 = vadd.f32 %v2501_v15, %v2478_v11  ;;  %v2529_v39 = vpop.f32.mrf.mxu3  ;;  %v2121_v11 = vld [vmem:[%s6306_s14] sm:$0xff] }
 0x7c9   :  { %v2453_v50 = vpop.f32.mrf.mxu0  ;;  %2802 = vmatpush.msrb.mxu0 %v2150_v62  ;;  %2793 = vmatpush.msra.mxu3 %v2121_v11  ;;  %v2153_v11 = vld [vmem:[%s6308_s15] sm:$0x3] }
 0x7ca   :  { %v2508_v41 = vmul.f32 %v2507_v48, %v2502_v16  ;;  %v2454_v42 = vadd.f32 %v2453_v50, %v2430_v8  ;;  %v2589_v6 = vpop.f32.mrf.mxu1 }
 0x7cb   :  { %2685 = vmatmul.f32.gmra.mxu3 %v2589_v6  ;;  %2634 = vmatmul.f32.gmra.mxu1 %v2589_v6 }
 0x7cc   :  { %v6075_v38 = vadd.f32 %v2508_v41, %v2459_v7  ;;  %v2458_v53 = vmul.f32 %v2456_v32, %v2454_v42  ;;  %2803 = vmatpush.msrb.mxu0 %v2148_v46  ;;  %v2120_v7 = vld [vmem:[%s6305_s13 + $0x8] sm:$0x3] }
 0x7cd   :  { %v2768_v46 = vperm.slane %v2120_v7, 1 }
 0x7ce   :  { %v2460_v37 = vadd.f32 %v2458_v53, %v2357_v26  ;;  %2804 = vmatpush.msrb.mxu0 %v2146_v35 }
 0x7cf   :  { %v2504_v3 = vpop.f32.mrf.mxu2 }
 0x7d0   :  { %v2505_v14 = vadd.f32 %v2504_v3, %v2481_v58  ;;  %2805 = vmatpush.msrb.mxu0 %v2144_v47  ;;  %v2532_v58 = vpop.f32.mrf.mxu3 }
 0x7d1   :  { %v2552_v4 = vpop.f32.mrf.mxu0 }
 0x7d2   :  { %v2509_v0 = vmul.f32 %v2507_v48, %v2505_v14  ;;  %2806 = vmatpush.msrb.mxu0 %v2142_v12  ;;  %v2553_v32 = vadd.f32 %v2552_v4, %v2529_v39  ;;  %v2661_v48 = vperm.slane %v5953_v27, 6  ;;  %v2763_v14 = vperm.slane %v2120_v7, 0  ;;  %v2885_v39 = vld [vmem:[%s6307_s17 + $0x60] sm:$0xff]  ;;  %v2900_v4 = vld [vmem:[%s6307_s17 + $0xd8] sm:$0xff] }
 0x7d3   :  { %2733 = vmatmul.f32.vlgmr.msra.gmra.mxu1 %v2586_v52  ;;  %v2558_v52 = vperm.slane %v5953_v27, 5  ;;  %v2774_v7 = vperm.slane %v2153_v11, 0 }
 0x7d4   :  { %v6090_v59 = vadd.f32 %v2509_v0, %v2460_v37  ;;  %2807 = vmatpush.msrb.mxu0 %v2140_v17 }
 0x7d5   :  { %v2559_v8 = vmul.f32 %v2558_v52, %v2553_v32 }
 0x7d6   :  { %2808 = vmatpush.msrb.mxu0 %v2138_v40 }
 0x7d7   :  { %v2609_v20 = vpop.f32.mrf.mxu2  ;;  %v2561_v41 = vadd.f32 %v2559_v8, %v6075_v38  ;;  %v2894_v8 = vld [vmem:[%s6307_s17 + $0xa8] sm:$0xff] }
 0x7d8   :  { %2654 = vmatmul.f32.vlgmr.msrb.gmra.mxu2 %v2609_v20  ;;  %2705 = vmatmul.f32.vlgmr.msra.gmra.mxu0 %v2609_v20 }
 0x7d9   :  { %2809 = vmatpush.msrb.mxu0 %v2136_v10  ;;  %v2555_v56 = vpop.f32.mrf.mxu0 }
 0x7da   :  { %v2556_v42 = vadd.f32 %v2555_v56, %v2532_v58  ;;  %v2897_v58 = vld [vmem:[%s6307_s17 + $0xc0] sm:$0xff]  ;;  %v2880_v56 = vld [vmem:[%s6307_s17 + $0x38] sm:$0xff] }
 0x7db   :  { %2736 = vmatmul.f32.gmra.mxu1 %v2589_v6  ;;  %2810 = vmatpush.msrb.mxu0 %v2134_v49  ;;  %v2887_v49 = vld [vmem:[%s6307_s17 + $0x70] sm:$0xff] }
 0x7dc   :  { %v2560_v22 = vmul.f32 %v2558_v52, %v2556_v42  ;;  %v2879_v52 = vld [vmem:[%s6307_s17 + $0x30] sm:$0xff]  ;;  %v2876_v42 = vld [vmem:[%s6307_s17 + $0x18] sm:$0xff] }
 0x7dd   :  { %2811 = vmatpush.msrb.mxu0 %v2132_v5  ;;  %v2886_v5 = vld [vmem:[%s6307_s17 + $0x68] sm:$0xff] }
 0x7de   :  { %v2562_v38 = vadd.f32 %v2560_v22, %v6090_v59  ;;  %v2888_v59 = vld [vmem:[%s6307_s17 + $0x78] sm:$0xff] }
 0x7df   :  { %v2612_v30 = vpop.f32.mrf.mxu2  ;;  %2812 = vmatpush.msrb.mxu0 %v2130_v45  ;;  %2909 = vmatpush.msrb.mxu3 %v2888_v59  ;;  %v2902_v45 = vld [vmem:[%s6307_s17 + $0xe8] sm:$0xff] }
 0x7e0   :  { %2657 = vmatmul.f32.gmra.mxu2 %v2612_v30  ;;  %2708 = vmatmul.f32.gmra.mxu0 %v2612_v30 }
 0x7e1   :  { %2813 = vmatpush.msrb.mxu0 %v2128_v34  ;;  %2910 = vmatpush.msrb.mxu3 %v2887_v49  ;;  %v2884_v34 = vld [vmem:[%s6307_s17 + $0x58] sm:$0xff] }
 0x7e3   :  { %2814 = vmatpush.msrb.mxu0 %v2126_v31  ;;  %2911 = vmatpush.msrb.mxu3 %v2886_v5  ;;  %v2899_v31 = vld [vmem:[%s6307_s17 + $0xd0] sm:$0xff] }
 0x7e5   :  { %2815 = vmatpush.msrb.mxu0 %v2124_v28  ;;  %2912 = vmatpush.msrb.mxu3 %v2885_v39  ;;  %v2882_v28 = vld [vmem:[%s6307_s17 + $0x48] sm:$0xff] }
 0x7e7   :  { %2816 = vmatpush.msrb.mxu0 %v2122_v55  ;;  %2913 = vmatpush.msrb.mxu3 %v2884_v34  ;;  %v2881_v55 = vld [vmem:[%s6307_s17 + $0x40] sm:$0xff] }
 0x7e8   :  { %2756 = vmatmul.f32.vlgmr.msra.gmra.mxu2 %v2609_v20 }
 0x7e9   :  { %2929 = vmatpush.msra.mxu0 %v2904_v9  ;;  %2914 = vmatpush.msrb.mxu3 %v2883_v44 }
 0x7eb   :  { %2930 = vmatpush.msra.mxu0 %v2903_v51  ;;  %2915 = vmatpush.msrb.mxu3 %v2882_v28 }
 0x7ed   :  { %2931 = vmatpush.msra.mxu0 %v2902_v45  ;;  %2916 = vmatpush.msrb.mxu3 %v2881_v55 }
 0x7ef   :  { %2932 = vmatpush.msra.mxu0 %v2901_v29  ;;  %2917 = vmatpush.msrb.mxu3 %v2880_v56 }
 0x7f0   :  { %2759 = vmatmul.f32.gmra.mxu2 %v2612_v30 }
 0x7f1   :  { %2933 = vmatpush.msra.mxu0 %v2900_v4  ;;  %2918 = vmatpush.msrb.mxu3 %v2879_v52 }
 0x7f3   :  { %2934 = vmatpush.msra.mxu0 %v2899_v31 }
 0x840   :  { %v2632_v1 = vpop.f32.mrf.mxu1 }
 0x846   :  { %v2683_v15 = vpop.f32.mrf.mxu3 }
 0x848   :  { %v2635_v23 = vpop.f32.mrf.mxu1 }
 0x84e   :  { %v2686_v37 = vpop.f32.mrf.mxu3 }
 0x850   :  { %v2734_v53 = vpop.f32.mrf.mxu1 }
 0x855   :  { %v2706_v54 = vpop.f32.mrf.mxu0 }
 0x856   :  { %v2707_v6 = vadd.f32 %v2706_v54, %v2683_v15  ;;  %v2878_v15 = vld [vmem:[%s6307_s17 + $0x28] sm:$0xff] }
 0x857   :  { %2919 = vmatpush.msrb.mxu3 %v2878_v15 }
 0x858   :  { %v2713_v13 = vmul.f32 %v2712_v21, %v2707_v6  ;;  %v2737_v47 = vpop.f32.mrf.mxu1 }
 0x85b   :  { %v2655_v57 = vpop.f32.mrf.mxu2 }
 0x85c   :  { %v2656_v24 = vadd.f32 %v2655_v57, %v2632_v1  ;;  %v2898_v1 = vld [vmem:[%s6307_s17 + $0xc8] sm:$0xff]  ;;  %v2775_v57 = vperm.slane %v2153_v11, 1 }
 0x85d   :  { %v2709_v0 = vpop.f32.mrf.mxu0  ;;  %2935 = vmatpush.msra.mxu0 %v2898_v1 }
 0x85e   :  { %v2662_v50 = vmul.f32 %v2661_v48, %v2656_v24  ;;  %v2710_v63 = vadd.f32 %v2709_v0, %v2686_v37  ;;  %v2895_v24 = vld [vmem:[%s6307_s17 + $0xb0] sm:$0xff]  ;;  %v2893_v37 = vld [vmem:[%s6307_s17 + $0xa0] sm:$0xff]  ;;  %v2892_v0 = vld [vmem:[%s6307_s17 + $0x98] sm:$0xff] }
 0x85f   :  { %2936 = vmatpush.msra.mxu0 %v2897_v58 }
 0x860   :  { %v2664_v3 = vadd.f32 %v2662_v50, %v2561_v41  ;;  %v2714_v12 = vmul.f32 %v2712_v21, %v2710_v63  ;;  %v2877_v50 = vld [vmem:[%s6307_s17 + $0x20] sm:$0xff] }
 0x861   :  { %2920 = vmatpush.msrb.mxu3 %v2877_v50  ;;  %v3086_v63 = vld [vmem:[%s6310_s18] ss:$0 sm:$0xff] }
 0x862   :  { %v2715_v20 = vadd.f32 %v2713_v13, %v2664_v3 }
 0x863   :  { %v2658_v16 = vpop.f32.mrf.mxu2  ;;  %2921 = vmatpush.msrb.mxu3 %v2876_v42 }
 0x864   :  { %v2659_v26 = vadd.f32 %v2658_v16, %v2635_v23  ;;  %v2896_v23 = vld [vmem:[%s6307_s17 + $0xb8] sm:$0xff] }
 0x865   :  { %2937 = vmatpush.msra.mxu0 %v2896_v23 }
 0x866   :  { %v2663_v30 = vmul.f32 %v2661_v48, %v2659_v26 }
 0x867   :  { %2938 = vmatpush.msra.mxu0 %v2895_v24 }
 0x868   :  { %v2665_v61 = vadd.f32 %v2663_v30, %v2562_v38  ;;  %v2890_v30 = vld [vmem:[%s6307_s17 + $0x88] sm:$0xff] }
 0x869   :  { %2939 = vmatpush.msra.mxu0 %v2894_v8 }
 0x86a   :  { %v2716_v33 = vadd.f32 %v2714_v12, %v2665_v61 }
 0x86b   :  { %v2757_v43 = vpop.f32.mrf.mxu2  ;;  %2940 = vmatpush.msra.mxu0 %v2893_v37 }
 0x86c   :  { %v2758_v62 = vadd.f32 %v2757_v43, %v2734_v53  ;;  %v2875_v53 = vld [vmem:[%s6307_s17 + $0x10] sm:$0xff]  ;;  %v2874_v43 = vld [vmem:[%s6307_s17 + $0x8] sm:$0xff] }
 0x86d   :  { %2922 = vmatpush.msrb.mxu3 %v2875_v53  ;;  %2941 = vmatpush.msra.mxu0 %v2892_v0 }
 0x86e   :  { %v2764_v19 = vmul.f32 %v2763_v14, %v2758_v62  ;;  %v2873_v62 = vld [vmem:[%s6307_s17] sm:$0xff] }
 0x86f   :  { %2923 = vmatpush.msrb.mxu3 %v2874_v43 }
 0x870   :  { %v2766_v35 = vadd.f32 %v2764_v19, %v2715_v20  ;;  %v2891_v20 = vld [vmem:[%s6307_s17 + $0x90] sm:$0xff]  ;;  %v2889_v19 = vld [vmem:[%s6307_s17 + $0x80] sm:$0xff] }
 0x871   :  { %2924 = vmatpush.msrb.mxu3 %v2873_v62  ;;  %2942 = vmatpush.msra.mxu0 %v2891_v20 }
 0x872   :  { %v2769_v27 = vadd.f32 %v2768_v46, %v2766_v35 }
 0x873   :  { %v2760_v60 = vpop.f32.mrf.mxu2  ;;  %2943 = vmatpush.msra.mxu0 %v2890_v30 }
 0x874   :  { %v2771_v2 = vmax.f32 %v2769_v27, 0.0  ;;  %v2761_v17 = vadd.f32 %v2760_v60, %v2737_v47 }
 0x875   :  { %2944 = vmatpush.msra.mxu0 %v2889_v19 }
 0x876   :  { %v2765_v40 = vmul.f32 %v2763_v14, %v2761_v17  ;;  %2794 = vmatmul.f32.vlgmr.msra.gmra.mxu3 %v2771_v2  ;;  %2817 = vmatmul.f32.vlgmr.msrb.gmra.mxu0 %v2771_v2  ;;  %v2828_v14 = vld [vmem:[%s6309_s16] sm:$0xff] }
 0x878   :  { %v2767_v18 = vadd.f32 %v2765_v40, %v2716_v33 }
 0x87a   :  { %v2770_v10 = vadd.f32 %v2768_v46, %v2767_v18 }
 0x87c   :  { %v2772_v25 = vmax.f32 %v2770_v10, 0.0 }
 0x87e   :  { %2797 = vmatmul.f32.gmra.mxu3 %v2772_v25  ;;  %2820 = vmatmul.f32.gmra.mxu0 %v2772_v25 }
 0x8f3   :  { %v2818_v36 = vpop.f32.mrf.mxu0 }
 0x8f4   :  { %v2819_v54 = vadd.f32 %v2818_v36, %v2775_v57 }
 0x8f6   :  { %v2825_v6 = vmax.f32 %v2819_v54, 0.0 }
 0x8f9   :  { %v2795_v32 = vpop.f32.mrf.mxu3 }
 0x8fa   :  { %v2796_v3 = vadd.f32 %v2795_v32, %v2774_v7 }
 0x8fb   :  { %v2821_v48 = vpop.f32.mrf.mxu0 }
 0x8fc   :  { %v2822_v16 = vadd.f32 %v2821_v48, %v2775_v57  ;;  %v2824_v13 = vmax.f32 %v2796_v3, 0.0 }
 0x8fe   :  { %v2827_v41 = vmax.f32 %v2822_v16, 0.0 }
 0x900   :  { %2867 = vmatpush.msrb.mxu2 %v2827_v41 }
 0x901   :  { %v2798_v21 = vpop.f32.mrf.mxu3 }
 0x902   :  { %v2799_v26 = vadd.f32 %v2798_v21, %v2774_v7  ;;  %2868 = vmatpush.msrb.mxu2 %v2825_v6 }
 0x903   :  { %3079 = vmatmul.msk.f32.vlgmr.msrb.gmra.mxu2 %vm2829_vm4, %v2828_v14 }
 0x904   :  { %v2826_v22 = vmax.f32 %v2799_v26, 0.0 }
 0x906   :  { %2847 = vmatpush.msrb.mxu1 %v2826_v22 }
 0x908   :  { %2848 = vmatpush.msrb.mxu1 %v2824_v13 }
 0x909   :  { %3078 = vmatmul.msk.f32.vlgmr.msrb.gmra.mxu1 %vm2829_vm4, %v2828_v14 }
 0x986   :  { %v2850_v46 = vpop.f32.mrf.mxu1  ;;  %v2870_v38 = vpop.f32.mrf.mxu2 }
 0x987   :  { %2925 = vmatmul.f32.vlgmr.msrb.gmra.mxu3 %v2850_v46  ;;  %2945 = vmatmul.f32.vlgmr.msra.gmra.mxu0 %v2870_v38 }
 0xa04   :  { %v2946_v61 = vpop.f32.mrf.mxu0 }
 0xa0a   :  { %v2926_v35 = vpop.f32.mrf.mxu3 }
 0xa0b   :  { %v2927_v27 = vadd.f32 %v3086_v63, %v2926_v35 }
 0xa0d   :  { %v2947_v47 = vadd.f32 %v2946_v61, %v2927_v27 }
 0xa0f   :  { %2949 = vst [vmem:[%s6311_s19] sm:$0xff] %v2947_v47 }

</bundles_post_ra>
